<compile_context>
chip_gen: v6e
topology: v6e:2x2x1
jax: 0.10.0
libtpu: 0.0.40
codegen_flags: <defaults>
</compile_context>

<pallas_src>
import jax
import jax.numpy as jnp
from jax.experimental import pallas as pl
from jax.experimental.pallas import tpu as pltpu

_LANE = 128
_M_ALIGN = 16   # bf16 packs 16 rows per sublane group


def _round_up(x, m):
    return ((x + m - 1) // m) * m


def _feedforward_kernel(x_ref, w1_ref, b1_ref, w2_ref, b2_ref, w3_ref, b3_ref,
                        o_ref, acc_ref):
    """One (tm, tk) batch/K tile of the fused 3-layer MLP.

    Grid = (batch_tiles, k_tiles).  fc1 accumulates over the K axis into an
    f32 VMEM scratch; the fc1 epilogue and fc2/fc3 (+ activations) run once
    per batch tile on the last K step.  With k_tiles == 1 this is the fully
    fused, fully weight-resident fast path.
    """
    k = pl.program_id(1)

    @pl.when(k == 0)
    def _():
        acc_ref[...] = jnp.zeros_like(acc_ref)

    # fc1 partial product: bf16 MXU matmul, f32 accumulation.
    acc_ref[...] += jnp.dot(x_ref[...], w1_ref[...],
                            preferred_element_type=jnp.float32)

    @pl.when(k == pl.num_programs(1) - 1)
    def _():
        cdt = w2_ref.dtype
        # fc1 epilogue: bias + ReLU (f32), cast back to bf16 for the MXU.
        h1 = jnp.maximum(acc_ref[...] + b1_ref[...], 0.0).astype(cdt)
        # fc2 + ReLU
        h2 = jnp.dot(h1, w2_ref[...], preferred_element_type=jnp.float32)
        h2 = jnp.maximum(h2 + b2_ref[...], 0.0).astype(cdt)
        # fc3 + Sigmoid (lane-dense bf16 writeback; real lanes sliced later)
        h3 = jnp.dot(h2, w3_ref[...], preferred_element_type=jnp.float32)
        o_ref[...] = jax.nn.sigmoid(h3 + b3_ref[...]).astype(o_ref.dtype)


def prepare_params(params, compute_dtype=jnp.bfloat16):
    """One-time packing of PyTorch-layout params for the kernel.

    - transpose (out, in) -> (in, out) so each layer is x @ W + b
    - pad the fc1 K dim and every output-feature dim up to a multiple of 128
      lanes (exact: zero x columns meet zero w1 rows; padded hidden units
      compute relu(0)=0 and feed zero weights downstream; padded fc3 lanes
      are sliced off after the call)
    - cast weights to bf16 (biases stay f32; accumulation is f32)
    """
    w1, w2, w3 = params["w1"], params["w2"], params["w3"]
    b1, b2, b3 = params["b1"], params["b2"], params["b3"]
    _in = w1.shape[1]
    h1, h2, out = w1.shape[0], w2.shape[0], w3.shape[0]
    in_p = _round_up(_in, _LANE)
    h1p, h2p, outp = (_round_up(d, _LANE) for d in (h1, h2, out))

    def pad2(a, rows, cols):
        return jnp.pad(a, ((0, rows - a.shape[0]), (0, cols - a.shape[1])))

    def pad1(a, cols):
        return jnp.pad(a, (0, cols - a.shape[0])).reshape(1, cols)

    return {
        "w1": pad2(w1.T, in_p, h1p).astype(compute_dtype),
        "w2": pad2(w2.T, h1p, h2p).astype(compute_dtype),
        "w3": pad2(w3.T, h2p, outp).astype(compute_dtype),
        "b1": pad1(b1, h1p).astype(jnp.float32),
        "b2": pad1(b2, h2p).astype(jnp.float32),
        "b3": pad1(b3, outp).astype(jnp.float32),
        "in_features": _in,
        "in_features_padded": in_p,
        "out_features": out,
        "compute_dtype": compute_dtype,
    }


def _vmem_budget_bytes():
    """Per-TensorCore VMEM budget with ~20% headroom for compiler scratch,
    semaphores and spill space (generation-aware, not a hard 64 MiB cap)."""
    cap = 64 << 20  # conservative default: v7x per-TC VMEM
    try:
        info = pltpu.get_tpu_info()
        cap = int(getattr(info, "vmem_capacity_bytes", cap))
    except Exception:
        pass
    return max(int(cap * 0.8), 32 << 20)


def _choose_tm(n):
    """Batch tile: big enough to amortize per-step overhead, multiple of 16
    (bf16 packing), and >=2 grid steps for moderate batches (megacore)."""
    if n >= 1024:
        return 512
    if n >= 512:
        return 256
    if n >= 2 * _M_ALIGN:
        return max(_M_ALIGN, _round_up((n + 1) // 2, _M_ALIGN))
    return max(_M_ALIGN, _round_up(n, _M_ALIGN))


def _choose_tk(in_p, h1p, itemsize, budget):
    """Largest multiple-of-128 divisor of in_p whose double-buffered w1
    K-chunk fits in ~1/4 of the VMEM budget."""
    m = in_p // _LANE
    for d in range(m, 0, -1):
        if m % d == 0 and 2 * d * _LANE * h1p * itemsize <= budget // 4:
            return d * _LANE
    return _LANE


def feedforward(x, prepped):
    """x: (N, ...) -> (N, out_features) f32.
    Matches torch.flatten(x, 1) + fc1/ReLU + fc2/ReLU + fc3/Sigmoid."""
    cdt = prepped["compute_dtype"]
    w1, w2, w3 = prepped["w1"], prepped["w2"], prepped["w3"]
    b1, b2, b3 = prepped["b1"], prepped["b2"], prepped["b3"]
    _in = prepped["in_features"]
    in_p = prepped["in_features_padded"]
    out_features = prepped["out_features"]
    h1p, h2p, outp = w1.shape[1], w2.shape[1], w3.shape[1]
    itemsize = jnp.dtype(cdt).itemsize

    n = x.shape[0]
    x2d = x.reshape(n, -1).astype(cdt)
    assert x2d.shape[1] == _in, "input feature dim mismatch"

    budget = _vmem_budget_bytes()

    # fc1 weight residency: keep w1 resident unless it eats > ~1/3 of the
    # budget; otherwise stream it in K chunks (double-buffered) and accumulate.
    w1_resident = in_p * h1p * itemsize <= budget // 3
    tk = in_p if w1_resident else _choose_tk(in_p, h1p, itemsize, budget)
    k_tiles = in_p // tk

    # Batch tile; halve it while the VMEM estimate overshoots the budget.
    tm = _choose_tm(n)

    def vmem_estimate(tm_, single_buffer):
        wbuf = 1 if single_buffer else 2
        resident = wbuf * itemsize * (h1p * h2p + h2p * outp)       # w2, w3
        resident += wbuf * 4 * (h1p + h2p + outp)                   # biases f32
        resident += (wbuf * itemsize * in_p * h1p) if w1_resident else 0
        w1_stream = 0 if w1_resident else 2 * tk * h1p * itemsize
        x_stream = 2 * tm_ * tk * itemsize
        o_stream = 2 * tm_ * outp * itemsize
        acc = tm_ * h1p * 4
        interm = tm_ * (h1p + h2p + outp) * 4                       # f32 headroom
        return resident + w1_stream + x_stream + o_stream + acc + interm

    while tm > _M_ALIGN and vmem_estimate(tm, True) > budget:
        tm = max(_M_ALIGN, tm // 2)

    n_pad = _round_up(n, tm)
    if n_pad != n:
        x2d = jnp.pad(x2d, ((0, n_pad - n), (0, 0)))
    if in_p != _in:
        x2d = jnp.pad(x2d, ((0, 0), (0, in_p - _in)))
    grid = (n_pad // tm, k_tiles)

    # Advisory cost estimate so XLA schedules surrounding reshape/pad/slice ops
    # around the kernel sensibly.
    flops = 2 * n_pad * (in_p * h1p + h1p * h2p + h2p * outp)
    bytes_accessed = (n_pad * in_p + n_pad * outp) * itemsize + sum(
        int(a.size) * a.dtype.itemsize for a in (w1, w2, w3, b1, b2, b3))
    cost = pl.CostEstimate(flops=int(flops), transcendentals=int(n_pad * outp),
                           bytes_accessed=int(bytes_accessed))

    def run(single_buffer):
        def const_spec(a):
            if single_buffer:
                # Block index never changes -> a 2nd buffer is pure VMEM waste.
                return pl.BlockSpec(a.shape, lambda i, k: (0, 0),
                                    pipeline_mode=pl.Buffered(1))
            return pl.BlockSpec(a.shape, lambda i, k: (0, 0))

        if w1_resident:
            w1_spec = const_spec(w1)
        else:
            w1_spec = pl.BlockSpec((tk, h1p), lambda i, k: (k, 0))

        x_spec = pl.BlockSpec((tm, tk), lambda i, k: (i, k))
        o_spec = pl.BlockSpec((tm, outp), lambda i, k: (i, 0))

        return pl.pallas_call(
            _feedforward_kernel,
            out_shape=jax.ShapeDtypeStruct((n_pad, outp), cdt),
            grid=grid,
            in_specs=[x_spec, w1_spec, const_spec(b1), const_spec(w2),
                      const_spec(b2), const_spec(w3), const_spec(b3)],
            out_specs=o_spec,
            scratch_shapes=[pltpu.VMEM((tm, h1p), jnp.float32)],
            compiler_params=pltpu.CompilerParams(
                dimension_semantics=("parallel", "arbitrary"),
                vmem_limit_bytes=int(budget)),
            cost_estimate=cost,
        )(x2d, w1, b1, w2, b2, w3, b3)

    try:
        out = run(single_buffer=True)
    except Exception:
        # Installed Pallas rejects Buffered(1): fall back to default buffering.
        out = run(single_buffer=False)

    # TODO(synk): for latency-critical repeated inference, prefetch packed
    # weights cross-call (P10 semaphore/VMEM-output future) so the first grid
    # step doesn't expose the resident-weight DMA.
    return out[:n, :out_features].astype(jnp.float32)


def init_params(key, _in, _out):
    """Deterministic PyTorch-Linear-shaped parameters (uniform like nn.Linear)."""
    dims = [(_in, _in // 2), (_in // 2, _in // 4), (_in // 4, _out)]
    params = {}
    for i, (fin, fout) in enumerate(dims, start=1):
        key, kw, kb = jax.random.split(key, 3)
        bound = 1.0 / (fin ** 0.5)
        params[f"w{i}"] = jax.random.uniform(
            kw, (fout, fin), jnp.float32, minval=-bound, maxval=bound)
        params[f"b{i}"] = jax.random.uniform(
            kb, (fout,), jnp.float32, minval=-bound, maxval=bound)
    return params


if __name__ == "__main__":
    key = jax.random.PRNGKey(0)
    k_x, k_p = jax.random.split(key)

    # Example: batch=2, channels=4, spatial=16x16 -> _in = 4*16*16 = 1024
    batch, C, H, W = 2, 4, 16, 16
    _in = C * H * W
    _out = 8

    x = jax.random.normal(k_x, (batch, C, H, W), jnp.float32)
    params = init_params(k_p, _in, _out)
    prepped = prepare_params(params)           # one-time pack (transpose/pad/bf16)

    out = feedforward(x, prepped)
    jax.block_until_ready(out)

    # Pure-JAX f32 reference of the same math (loose tol: bf16 matmuls/output).
    xf = x.reshape(batch, -1)
    ref = jnp.maximum(xf @ params["w1"].T + params["b1"], 0.0)
    ref = jnp.maximum(ref @ params["w2"].T + params["b2"], 0.0)
    ref = jax.nn.sigmoid(ref @ params["w3"].T + params["b3"])
    assert out.shape == (batch, _out)
    max_err = float(jnp.max(jnp.abs(out - ref)))
    assert max_err < 2.5e-2, f"mismatch vs reference (max_err={max_err})"

    print("KERNEL_OK")
</pallas_src>

<mosaic_0001>
module attributes {stable_mosaic.version = 11 : i64} {
  func.func @_feedforward_kernel(%arg0: i32, %arg1: i32, %arg2: memref<16x1024xbf16, #tpu.memory_space<vmem>>, %arg3: memref<1024x512xbf16, #tpu.memory_space<vmem>>, %arg4: memref<1x512xf32, #tpu.memory_space<vmem>>, %arg5: memref<512x256xbf16, #tpu.memory_space<vmem>>, %arg6: memref<1x256xf32, #tpu.memory_space<vmem>>, %arg7: memref<256x128xbf16, #tpu.memory_space<vmem>>, %arg8: memref<1x128xf32, #tpu.memory_space<vmem>>, %arg9: memref<16x128xbf16, #tpu.memory_space<vmem>>, %arg10: memref<16x512xf32, #tpu.memory_space<vmem>>) attributes {dimension_semantics = [#tpu.dimension_semantics<parallel>, #tpu.dimension_semantics<arbitrary>], iteration_bounds = array<i64: 1, 1>, scalar_prefetch = 0 : i64, scratch_operands = 1 : i64, tpu.core_type = #tpu.core_type<tc>, window_params = [{transform_indices = @transform_0, window_bounds = array<i64: 16, 1024>}, {pipeline_mode = #tpu.pipeline_mode<synchronous>, transform_indices = @transform_1, window_bounds = array<i64: 1024, 512>}, {pipeline_mode = #tpu.pipeline_mode<synchronous>, transform_indices = @transform_2, window_bounds = array<i64: 1, 512>}, {pipeline_mode = #tpu.pipeline_mode<synchronous>, transform_indices = @transform_3, window_bounds = array<i64: 512, 256>}, {pipeline_mode = #tpu.pipeline_mode<synchronous>, transform_indices = @transform_4, window_bounds = array<i64: 1, 256>}, {pipeline_mode = #tpu.pipeline_mode<synchronous>, transform_indices = @transform_5, window_bounds = array<i64: 256, 128>}, {pipeline_mode = #tpu.pipeline_mode<synchronous>, transform_indices = @transform_6, window_bounds = array<i64: 1, 128>}, {transform_indices = @transform_7, window_bounds = array<i64: 16, 128>}]} {
    %c0_i32 = arith.constant 0 : i32
    %0 = arith.cmpi eq, %arg1, %c0_i32 : i32
    %1 = arith.extui %0 : i1 to i32
    %c0_i32_0 = arith.constant 0 : i32
    %2 = arith.cmpi ne, %1, %c0_i32_0 : i32
    scf.if %2 {
      %cst_10 = arith.constant 0.000000e+00 : f32
      %12 = vector.broadcast %cst_10 : f32 to vector<16x512xf32>
      %c0_11 = arith.constant 0 : index
      %c0_12 = arith.constant 0 : index
      %13 = vector.load %arg10[%c0_11, %c0_12] : memref<16x512xf32, #tpu.memory_space<vmem>>, vector<16x512xf32>
      tpu.vector_store %arg10[%c0_11, %c0_12], %12 {strides = array<i32>} : memref<16x512xf32, #tpu.memory_space<vmem>>, vector<16x512xf32>,
    } else {
    }
    %c0 = arith.constant 0 : index
    %c0_1 = arith.constant 0 : index
    %3 = vector.load %arg10[%c0, %c0_1] : memref<16x512xf32, #tpu.memory_space<vmem>>, vector<16x512xf32>
    %c0_2 = arith.constant 0 : index
    %c0_3 = arith.constant 0 : index
    %4 = vector.load %arg2[%c0_2, %c0_3] : memref<16x1024xbf16, #tpu.memory_space<vmem>>, vector<16x1024xbf16>
    %c0_4 = arith.constant 0 : index
    %c0_5 = arith.constant 0 : index
    %5 = vector.load %arg3[%c0_4, %c0_5] : memref<1024x512xbf16, #tpu.memory_space<vmem>>, vector<1024x512xbf16>
    %cst = arith.constant dense<0.000000e+00> : vector<16x512xf32>
    %6 = tpu.matmul %4, %5, %cst {dimension_numbers = #tpu.dot_dimension_numbers<[1], [0], [0], [1], [0, 0, 1, 1], [], []>} : vector<16x1024xbf16>, vector<1024x512xbf16>, vector<16x512xf32> -> vector<16x512xf32>
    %7 = arith.addf %3, %6 : vector<16x512xf32>
    %c0_6 = arith.constant 0 : index
    %c0_7 = arith.constant 0 : index
    %8 = vector.load %arg10[%c0_6, %c0_7] : memref<16x512xf32, #tpu.memory_space<vmem>>, vector<16x512xf32>
    tpu.vector_store %arg10[%c0_6, %c0_7], %7 {strides = array<i32>} : memref<16x512xf32, #tpu.memory_space<vmem>>, vector<16x512xf32>,
    %c0_i32_8 = arith.constant 0 : i32
    %9 = arith.cmpi eq, %arg1, %c0_i32_8 : i32
    %10 = arith.extui %9 : i1 to i32
    %c0_i32_9 = arith.constant 0 : i32
    %11 = arith.cmpi ne, %10, %c0_i32_9 : i32
    scf.if %11 {
      %c0_10 = arith.constant 0 : index
      %c0_11 = arith.constant 0 : index
      %12 = vector.load %arg10[%c0_10, %c0_11] : memref<16x512xf32, #tpu.memory_space<vmem>>, vector<16x512xf32>
      %c0_12 = arith.constant 0 : index
      %c0_13 = arith.constant 0 : index
      %13 = vector.load %arg4[%c0_12, %c0_13] : memref<1x512xf32, #tpu.memory_space<vmem>>, vector<1x512xf32>
      %14 = vector.broadcast %13 : vector<1x512xf32> to vector<16x512xf32>
      %15 = arith.addf %12, %14 : vector<16x512xf32>
      %cst_14 = arith.constant 0.000000e+00 : f32
      %16 = vector.broadcast %cst_14 : f32 to vector<16x512xf32>
      %17 = arith.maximumf %15, %16 : vector<16x512xf32>
      %18 = arith.truncf %17 : vector<16x512xf32> to vector<16x512xbf16>
      %c0_15 = arith.constant 0 : index
      %c0_16 = arith.constant 0 : index
      %19 = vector.load %arg5[%c0_15, %c0_16] : memref<512x256xbf16, #tpu.memory_space<vmem>>, vector<512x256xbf16>
      %cst_17 = arith.constant dense<0.000000e+00> : vector<16x256xf32>
      %20 = tpu.matmul %18, %19, %cst_17 {dimension_numbers = #tpu.dot_dimension_numbers<[1], [0], [0], [1], [0, 0, 1, 1], [], []>} : vector<16x512xbf16>, vector<512x256xbf16>, vector<16x256xf32> -> vector<16x256xf32>
      %c0_18 = arith.constant 0 : index
      %c0_19 = arith.constant 0 : index
      %21 = vector.load %arg6[%c0_18, %c0_19] : memref<1x256xf32, #tpu.memory_space<vmem>>, vector<1x256xf32>
      %22 = vector.broadcast %21 : vector<1x256xf32> to vector<16x256xf32>
      %23 = arith.addf %20, %22 : vector<16x256xf32>
      %cst_20 = arith.constant 0.000000e+00 : f32
      %24 = vector.broadcast %cst_20 : f32 to vector<16x256xf32>
      %25 = arith.maximumf %23, %24 : vector<16x256xf32>
      %26 = arith.truncf %25 : vector<16x256xf32> to vector<16x256xbf16>
      %c0_21 = arith.constant 0 : index
      %c0_22 = arith.constant 0 : index
      %27 = vector.load %arg7[%c0_21, %c0_22] : memref<256x128xbf16, #tpu.memory_space<vmem>>, vector<256x128xbf16>
      %cst_23 = arith.constant dense<0.000000e+00> : vector<16x128xf32>
      %28 = tpu.matmul %26, %27, %cst_23 {dimension_numbers = #tpu.dot_dimension_numbers<[1], [0], [0], [1], [0, 0, 1, 1], [], []>} : vector<16x256xbf16>, vector<256x128xbf16>, vector<16x128xf32> -> vector<16x128xf32>
      %c0_24 = arith.constant 0 : index
      %c0_25 = arith.constant 0 : index
      %29 = vector.load %arg8[%c0_24, %c0_25] : memref<1x128xf32, #tpu.memory_space<vmem>>, vector<1x128xf32>
      %30 = vector.broadcast %29 : vector<1x128xf32> to vector<16x128xf32>
      %31 = arith.addf %28, %30 : vector<16x128xf32>
      %32 = arith.negf %31 : vector<16x128xf32>
      %33 = math.exp %32 : vector<16x128xf32>
      %cst_26 = arith.constant 1.000000e+00 : f32
      %34 = vector.broadcast %cst_26 : f32 to vector<16x128xf32>
      %35 = arith.addf %34, %33 : vector<16x128xf32>
      %36 = arith.divf %34, %35 : vector<16x128xf32>
      %37 = arith.truncf %36 : vector<16x128xf32> to vector<16x128xbf16>
      %c0_27 = arith.constant 0 : index
      %c0_28 = arith.constant 0 : index
      %38 = vector.load %arg9[%c0_27, %c0_28] : memref<16x128xbf16, #tpu.memory_space<vmem>>, vector<16x128xbf16>
      tpu.vector_store %arg9[%c0_27, %c0_28], %37 {strides = array<i32>} : memref<16x128xbf16, #tpu.memory_space<vmem>>, vector<16x128xbf16>,
    } else {
    }
    return
  }
  func.func @transform_0(%arg0: i32, %arg1: i32) -> (i32, i32) {
    %c0_i32 = arith.constant 0 : i32
    return %arg0, %arg1 : i32, i32
  }
  func.func @transform_1(%arg0: i32, %arg1: i32) -> (i32, i32) {
    %c0_i32 = arith.constant 0 : i32
    %c0_i32_0 = arith.constant 0 : i32
    %c0_i32_1 = arith.constant 0 : i32
    return %c0_i32, %c0_i32_0 : i32, i32
  }
  func.func @transform_2(%arg0: i32, %arg1: i32) -> (i32, i32) {
    %c0_i32 = arith.constant 0 : i32
    %c0_i32_0 = arith.constant 0 : i32
    %c0_i32_1 = arith.constant 0 : i32
    return %c0_i32, %c0_i32_0 : i32, i32
  }
  func.func @transform_3(%arg0: i32, %arg1: i32) -> (i32, i32) {
    %c0_i32 = arith.constant 0 : i32
    %c0_i32_0 = arith.constant 0 : i32
    %c0_i32_1 = arith.constant 0 : i32
    return %c0_i32, %c0_i32_0 : i32, i32
  }
  func.func @transform_4(%arg0: i32, %arg1: i32) -> (i32, i32) {
    %c0_i32 = arith.constant 0 : i32
    %c0_i32_0 = arith.constant 0 : i32
    %c0_i32_1 = arith.constant 0 : i32
    return %c0_i32, %c0_i32_0 : i32, i32
  }
  func.func @transform_5(%arg0: i32, %arg1: i32) -> (i32, i32) {
    %c0_i32 = arith.constant 0 : i32
    %c0_i32_0 = arith.constant 0 : i32
    %c0_i32_1 = arith.constant 0 : i32
    return %c0_i32, %c0_i32_0 : i32, i32
  }
  func.func @transform_6(%arg0: i32, %arg1: i32) -> (i32, i32) {
    %c0_i32 = arith.constant 0 : i32
    %c0_i32_0 = arith.constant 0 : i32
    %c0_i32_1 = arith.constant 0 : i32
    return %c0_i32, %c0_i32_0 : i32, i32
  }
  func.func @transform_7(%arg0: i32, %arg1: i32) -> (i32, i32) {
    %c0_i32 = arith.constant 0 : i32
    %c0_i32_0 = arith.constant 0 : i32
    return %arg0, %c0_i32 : i32, i32
  }
}

module attributes {stable_mosaic.version = 11 : i64} {
  func.func @_feedforward_kernel(%arg0: i32, %arg1: i32, %arg2: memref<16x1024xbf16, #tpu.memory_space<vmem>>, %arg3: memref<1024x512xbf16, #tpu.memory_space<vmem>>, %arg4: memref<1x512xf32, #tpu.memory_space<vmem>>, %arg5: memref<512x256xbf16, #tpu.memory_space<vmem>>, %arg6: memref<1x256xf32, #tpu.memory_space<vmem>>, %arg7: memref<256x128xbf16, #tpu.memory_space<vmem>>, %arg8: memref<1x128xf32, #tpu.memory_space<vmem>>, %arg9: memref<16x128xbf16, #tpu.memory_space<vmem>>, %arg10: memref<16x512xf32, #tpu.memory_space<vmem>>) attributes {dimension_semantics = [#tpu.dimension_semantics<parallel>, #tpu.dimension_semantics<arbitrary>], iteration_bounds = array<i64: 1, 1>, scalar_prefetch = 0 : i64, scratch_operands = 1 : i64, tpu.core_type = #tpu.core_type<tc>, window_params = [{transform_indices = @transform_0, window_bounds = array<i64: 16, 1024>}, {pipeline_mode = #tpu.pipeline_mode<synchronous>, transform_indices = @transform_1, window_bounds = array<i64: 1024, 512>}, {pipeline_mode = #tpu.pipeline_mode<synchronous>, transform_indices = @transform_2, window_bounds = array<i64: 1, 512>}, {pipeline_mode = #tpu.pipeline_mode<synchronous>, transform_indices = @transform_3, window_bounds = array<i64: 512, 256>}, {pipeline_mode = #tpu.pipeline_mode<synchronous>, transform_indices = @transform_4, window_bounds = array<i64: 1, 256>}, {pipeline_mode = #tpu.pipeline_mode<synchronous>, transform_indices = @transform_5, window_bounds = array<i64: 256, 128>}, {pipeline_mode = #tpu.pipeline_mode<synchronous>, transform_indices = @transform_6, window_bounds = array<i64: 1, 128>}, {transform_indices = @transform_7, window_bounds = array<i64: 16, 128>}]} {
    %c0_i32 = arith.constant 0 : i32
    %0 = arith.cmpi eq, %arg1, %c0_i32 : i32
    %1 = arith.extui %0 : i1 to i32
    %c0_i32_0 = arith.constant 0 : i32
    %2 = arith.cmpi ne, %1, %c0_i32_0 : i32
    scf.if %2 {
      %cst_10 = arith.constant 0.000000e+00 : f32
      %12 = vector.broadcast %cst_10 : f32 to vector<16x512xf32>
      %c0_11 = arith.constant 0 : index
      %c0_12 = arith.constant 0 : index
      %13 = vector.load %arg10[%c0_11, %c0_12] : memref<16x512xf32, #tpu.memory_space<vmem>>, vector<16x512xf32>
      tpu.vector_store %arg10[%c0_11, %c0_12], %12 {strides = array<i32>} : memref<16x512xf32, #tpu.memory_space<vmem>>, vector<16x512xf32>,
    } else {
    }
    %c0 = arith.constant 0 : index
    %c0_1 = arith.constant 0 : index
    %3 = vector.load %arg10[%c0, %c0_1] : memref<16x512xf32, #tpu.memory_space<vmem>>, vector<16x512xf32>
    %c0_2 = arith.constant 0 : index
    %c0_3 = arith.constant 0 : index
    %4 = vector.load %arg2[%c0_2, %c0_3] : memref<16x1024xbf16, #tpu.memory_space<vmem>>, vector<16x1024xbf16>
    %c0_4 = arith.constant 0 : index
    %c0_5 = arith.constant 0 : index
    %5 = vector.load %arg3[%c0_4, %c0_5] : memref<1024x512xbf16, #tpu.memory_space<vmem>>, vector<1024x512xbf16>
    %cst = arith.constant dense<0.000000e+00> : vector<16x512xf32>
    %6 = tpu.matmul %4, %5, %cst {dimension_numbers = #tpu.dot_dimension_numbers<[1], [0], [0], [1], [0, 0, 1, 1], [], []>} : vector<16x1024xbf16>, vector<1024x512xbf16>, vector<16x512xf32> -> vector<16x512xf32>
    %7 = arith.addf %3, %6 : vector<16x512xf32>
    %c0_6 = arith.constant 0 : index
    %c0_7 = arith.constant 0 : index
    %8 = vector.load %arg10[%c0_6, %c0_7] : memref<16x512xf32, #tpu.memory_space<vmem>>, vector<16x512xf32>
    tpu.vector_store %arg10[%c0_6, %c0_7], %7 {strides = array<i32>} : memref<16x512xf32, #tpu.memory_space<vmem>>, vector<16x512xf32>,
    %c0_i32_8 = arith.constant 0 : i32
    %9 = arith.cmpi eq, %arg1, %c0_i32_8 : i32
    %10 = arith.extui %9 : i1 to i32
    %c0_i32_9 = arith.constant 0 : i32
    %11 = arith.cmpi ne, %10, %c0_i32_9 : i32
    scf.if %11 {
      %c0_10 = arith.constant 0 : index
      %c0_11 = arith.constant 0 : index
      %12 = vector.load %arg10[%c0_10, %c0_11] : memref<16x512xf32, #tpu.memory_space<vmem>>, vector<16x512xf32>
      %c0_12 = arith.constant 0 : index
      %c0_13 = arith.constant 0 : index
      %13 = vector.load %arg4[%c0_12, %c0_13] : memref<1x512xf32, #tpu.memory_space<vmem>>, vector<1x512xf32>
      %14 = vector.broadcast %13 : vector<1x512xf32> to vector<16x512xf32>
      %15 = arith.addf %12, %14 : vector<16x512xf32>
      %cst_14 = arith.constant 0.000000e+00 : f32
      %16 = vector.broadcast %cst_14 : f32 to vector<16x512xf32>
      %17 = arith.maximumf %15, %16 : vector<16x512xf32>
      %18 = arith.truncf %17 : vector<16x512xf32> to vector<16x512xbf16>
      %c0_15 = arith.constant 0 : index
      %c0_16 = arith.constant 0 : index
      %19 = vector.load %arg5[%c0_15, %c0_16] : memref<512x256xbf16, #tpu.memory_space<vmem>>, vector<512x256xbf16>
      %cst_17 = arith.constant dense<0.000000e+00> : vector<16x256xf32>
      %20 = tpu.matmul %18, %19, %cst_17 {dimension_numbers = #tpu.dot_dimension_numbers<[1], [0], [0], [1], [0, 0, 1, 1], [], []>} : vector<16x512xbf16>, vector<512x256xbf16>, vector<16x256xf32> -> vector<16x256xf32>
      %c0_18 = arith.constant 0 : index
      %c0_19 = arith.constant 0 : index
      %21 = vector.load %arg6[%c0_18, %c0_19] : memref<1x256xf32, #tpu.memory_space<vmem>>, vector<1x256xf32>
      %22 = vector.broadcast %21 : vector<1x256xf32> to vector<16x256xf32>
      %23 = arith.addf %20, %22 : vector<16x256xf32>
      %cst_20 = arith.constant 0.000000e+00 : f32
      %24 = vector.broadcast %cst_20 : f32 to vector<16x256xf32>
      %25 = arith.maximumf %23, %24 : vector<16x256xf32>
      %26 = arith.truncf %25 : vector<16x256xf32> to vector<16x256xbf16>
      %c0_21 = arith.constant 0 : index
      %c0_22 = arith.constant 0 : index
      %27 = vector.load %arg7[%c0_21, %c0_22] : memref<256x128xbf16, #tpu.memory_space<vmem>>, vector<256x128xbf16>
      %cst_23 = arith.constant dense<0.000000e+00> : vector<16x128xf32>
      %28 = tpu.matmul %26, %27, %cst_23 {dimension_numbers = #tpu.dot_dimension_numbers<[1], [0], [0], [1], [0, 0, 1, 1], [], []>} : vector<16x256xbf16>, vector<256x128xbf16>, vector<16x128xf32> -> vector<16x128xf32>
      %c0_24 = arith.constant 0 : index
      %c0_25 = arith.constant 0 : index
      %29 = vector.load %arg8[%c0_24, %c0_25] : memref<1x128xf32, #tpu.memory_space<vmem>>, vector<1x128xf32>
      %30 = vector.broadcast %29 : vector<1x128xf32> to vector<16x128xf32>
      %31 = arith.addf %28, %30 : vector<16x128xf32>
      %32 = arith.negf %31 : vector<16x128xf32>
      %33 = math.exp %32 : vector<16x128xf32>
      %cst_26 = arith.constant 1.000000e+00 : f32
      %34 = vector.broadcast %cst_26 : f32 to vector<16x128xf32>
      %35 = arith.addf %34, %33 : vector<16x128xf32>
      %36 = arith.divf %34, %35 : vector<16x128xf32>
      %37 = arith.truncf %36 : vector<16x128xf32> to vector<16x128xbf16>
      %c0_27 = arith.constant 0 : index
      %c0_28 = arith.constant 0 : index
      %38 = vector.load %arg9[%c0_27, %c0_28] : memref<16x128xbf16, #tpu.memory_space<vmem>>, vector<16x128xbf16>
      tpu.vector_store %arg9[%c0_27, %c0_28], %37 {strides = array<i32>} : memref<16x128xbf16, #tpu.memory_space<vmem>>, vector<16x128xbf16>,
    } else {
    }
    return
  }
  func.func @transform_0(%arg0: i32, %arg1: i32) -> (i32, i32) {
    %c0_i32 = arith.constant 0 : i32
    return %arg0, %arg1 : i32, i32
  }
  func.func @transform_1(%arg0: i32, %arg1: i32) -> (i32, i32) {
    %c0_i32 = arith.constant 0 : i32
    %c0_i32_0 = arith.constant 0 : i32
    %c0_i32_1 = arith.constant 0 : i32
    return %c0_i32, %c0_i32_0 : i32, i32
  }
  func.func @transform_2(%arg0: i32, %arg1: i32) -> (i32, i32) {
    %c0_i32 = arith.constant 0 : i32
    %c0_i32_0 = arith.constant 0 : i32
    %c0_i32_1 = arith.constant 0 : i32
    return %c0_i32, %c0_i32_0 : i32, i32
  }
  func.func @transform_3(%arg0: i32, %arg1: i32) -> (i32, i32) {
    %c0_i32 = arith.constant 0 : i32
    %c0_i32_0 = arith.constant 0 : i32
    %c0_i32_1 = arith.constant 0 : i32
    return %c0_i32, %c0_i32_0 : i32, i32
  }
  func.func @transform_4(%arg0: i32, %arg1: i32) -> (i32, i32) {
    %c0_i32 = arith.constant 0 : i32
    %c0_i32_0 = arith.constant 0 : i32
    %c0_i32_1 = arith.constant 0 : i32
    return %c0_i32, %c0_i32_0 : i32, i32
  }
  func.func @transform_5(%arg0: i32, %arg1: i32) -> (i32, i32) {
    %c0_i32 = arith.constant 0 : i32
    %c0_i32_0 = arith.constant 0 : i32
    %c0_i32_1 = arith.constant 0 : i32
    return %c0_i32, %c0_i32_0 : i32, i32
  }
  func.func @transform_6(%arg0: i32, %arg1: i32) -> (i32, i32) {
    %c0_i32 = arith.constant 0 : i32
    %c0_i32_0 = arith.constant 0 : i32
    %c0_i32_1 = arith.constant 0 : i32
    return %c0_i32, %c0_i32_0 : i32, i32
  }
  func.func @transform_7(%arg0: i32, %arg1: i32) -> (i32, i32) {
    %c0_i32 = arith.constant 0 : i32
    %c0_i32_0 = arith.constant 0 : i32
    return %arg0, %c0_i32 : i32, i32
  }
}

</mosaic_0001>

<bundles_post_ra>
// kernel: tpu_custom_call.1
= control target key start
LH: loop header
LB: loop body
LE: loop exit
PB: predicated region body
PF: predicated region fallthrough
CT: control target
= control target key end

     0   :  { %12 = vsyncpa [#allocation4], 0  ;;  %s3992_s0 = inlined_call_operand.hbm [shape: bf16[16,1024], index: 0, kind: input, shape index: {}]   ;;  %s3993_s1 = inlined_call_operand.hbm [shape: bf16[1024,512], index: 1, kind: input, shape index: {}]   ;;  %s3994_s2 = inlined_call_operand.hbm [shape: f32[1,512], index: 2, kind: input, shape index: {}]   ;;  %s3995_s3 = inlined_call_operand.hbm [shape: bf16[512,256], index: 3, kind: input, shape index: {}]   ;;  %s3996_s4 = inlined_call_operand.vmem [shape: f32[1,256], index: 4, kind: input, shape index: {}]   ;;  %s3997_s5 = inlined_call_operand.hbm [shape: bf16[256,128], index: 5, kind: input, shape index: {}]   ;;  %s3998_s6 = inlined_call_operand.vmem [shape: f32[1,128], index: 6, kind: input, shape index: {}]   ;;  %s3999_s7 = inlined_call_operand.hbm [shape: bf16[16,128], index: 7, kind: output, shape index: {}]  }
   0x1   :  { %13 = vsyncpa [#allocation7], 0 }
   0x2   :  { %14 = vsyncpa [#allocation10], 0 }
   0x3   :  { %15 = vsyncpa [#allocation5], 0  ;;  %s3840_s24 = smov [#allocation6]  }
   0x4   :  { %s33_s25 = sshll.u32 %s3840_s24, 4  ;;  %s34_s25 = int_to_ptr.vmem [resolvable:$true] %s33_s25 }
   0x5   :  { %s3720_s26 = scalar_lea.vmem %s34_s25, 32768  ;;  %p3725_p1 = scmp.lt.s32.totalorder %s34_s25, %s34_s25 }
   0x6   :  { %p3721_p0 = scmp.ne.s32.totalorder %s34_s25, %s3720_s26  ;;  %p3726_p2 = scmp.lt.s32.totalorder %s3720_s26, %s3720_s26 }
   0x8   :  { %p3727_p3 = por %p3726_p2, %p3725_p1 }
   0xa   :  { %p3728_p4 = pnand %p3727_p3, %p3721_p0 }
   0xc   :  { %3731 = shalt.err (!%p3728_p4)
}
   0xd   :  { %s3841_s27 = smov 256   ;;  %s3842_s28 = smov 16  }
   0xe   :  { %39 = dma.hbm_to_vmem [thread:$0]  %s3993_s1, 32768, %s34_s25, [#allocation7], %s3841_s27, %s3841_s27, %s3842_s28  }
   0xf   :  { %s3843_s8 = smov [#allocation9]  }
  0x10   :  { %s55_s9 = sshll.u32 %s3843_s8, 4  ;;  %s56_s9 = int_to_ptr.vmem [resolvable:$true] %s55_s9 }
  0x11   :  { %s3740_s10 = scalar_lea.vmem %s56_s9, 8192  ;;  %p3745_p6 = scmp.lt.s32.totalorder %s56_s9, %s56_s9 }
  0x12   :  { %p3741_p5 = scmp.ne.s32.totalorder %s56_s9, %s3740_s10  ;;  %p3746_p7 = scmp.lt.s32.totalorder %s3740_s10, %s3740_s10 }
  0x14   :  { %p3747_p8 = por %p3746_p7, %p3745_p6 }
  0x16   :  { %p3748_p9 = pnand %p3747_p8, %p3741_p5 }
  0x18   :  { %3751 = shalt.err (!%p3748_p9)
}
  0x19   :  { %s3844_s11 = smov 128   ;;  %s3845_s12 = smov 8  }
  0x1a   :  { %61 = dma.hbm_to_vmem [thread:$0]  %s3995_s3, 8192, %s56_s9, [#allocation10], %s3844_s11, %s3844_s11, %s3845_s12  }
  0x1b   :  { %s3846_s15 = smov [#allocation3]  }
  0x1c   :  { %s21_s16 = sshll.u32 %s3846_s15, 4  ;;  %s22_s16 = int_to_ptr.vmem [resolvable:$true] %s21_s16 }
  0x1d   :  { %s3760_s1 = scalar_lea.vmem %s22_s16, 1024  ;;  %p3765_p11 = scmp.lt.s32.totalorder %s22_s16, %s22_s16 }
  0x1e   :  { %p3761_p10 = scmp.ne.s32.totalorder %s22_s16, %s3760_s1  ;;  %p3766_p12 = scmp.lt.s32.totalorder %s3760_s1, %s3760_s1 }
  0x20   :  { %p3767_p13 = por %p3766_p12, %p3765_p11 }
  0x22   :  { %p3768_p0 = pnand %p3767_p13, %p3761_p10 }
  0x24   :  { %3771 = shalt.err (!%p3768_p0)
}
  0x25   :  { %s3847_s17 = smov 512   ;;  %s3848_s18 = smov 32  }
  0x26   :  { %27 = dma.hbm_to_vmem [thread:$0]  %s3992_s0, 1024, %s22_s16, [#allocation4], %s3847_s17, %s3847_s17, %s3848_s18  }
  0x27   :  { %s3849_s21 = smov [#allocation8]   ;;  %s3850_s3 = smov [#allocation11]  }
  0x28   :  { %s46_s22 = sshll.u32 %s3849_s21, 4  ;;  %s69_s23 = sshll.u32 %s3850_s3, 4  ;;  %s47_s22 = int_to_ptr.vmem [resolvable:$true] %s46_s22  ;;  %s70_s23 = int_to_ptr.vmem [resolvable:$true] %s69_s23 }
  0x29   :  { %s3780_s24 = scalar_lea.vmem %s47_s22, 64  ;;  %p3785_p2 = scmp.lt.s32.totalorder %s47_s22, %s47_s22 }
  0x2a   :  { %p3781_p1 = scmp.ne.s32.totalorder %s47_s22, %s3780_s24  ;;  %p3786_p3 = scmp.lt.s32.totalorder %s3780_s24, %s3780_s24 }
  0x2c   :  { %p3787_p4 = por %p3786_p3, %p3785_p2 }
  0x2e   :  { %p3788_p5 = pnand %p3787_p4, %p3781_p1 }
  0x30   :  { %3791 = shalt.err (!%p3788_p5)
}
  0x31   :  { %49 = dma.hbm_to_vmem [thread:$0]  %s3994_s2, 64, %s47_s22, [#allocation7]  }
  0x32   :  { %s3800_s27 = scalar_lea.vmem %s70_s23, 2048  ;;  %p3805_p7 = scmp.lt.s32.totalorder %s70_s23, %s70_s23 }
  0x33   :  { %p3801_p6 = scmp.ne.s32.totalorder %s70_s23, %s3800_s27  ;;  %p3806_p8 = scmp.lt.s32.totalorder %s3800_s27, %s3800_s27 }
  0x35   :  { %p3807_p9 = por %p3806_p8, %p3805_p7 }
  0x37   :  { %p3808_p10 = pnand %p3807_p9, %p3801_p6 }
  0x39   :  { %3811 = shalt.err (!%p3808_p10)
}
  0x3a   :  { %s3851_s0 = smov 64   ;;  %s3852_s28 = smov 4  }
  0x3b   :  { %75 = dma.hbm_to_vmem [thread:$0]  %s3997_s5, 2048, %s70_s23, [#allocation10], %s3851_s0, %s3851_s0, %s3852_s28  }
  0x3c   :  { %3832 = dma.done.wait [#allocation4], 1024  }
  0x3d   :  { %3833 = vsyncadd [#allocation4], 4294966272 }
  0x3e   :  { %3834 = dma.done.wait [#allocation7], 32832  }
  0x3f   :  { %3835 = vsyncadd [#allocation7], 4294934464 }
  0x40   :  { %3836 = dma.done.wait [#allocation10], 10240  }
  0x41   :  { %3837 = vsyncadd [#allocation10], 4294957056  ;;  %v3208_v0 = vld [vmem:[#allocation6 + $0xe4] ss:$16 sps:$4 sm:$0xff]   ;;  %v3212_v2 = vld [vmem:[#allocation6 + $0xe0] ss:$16 sps:$4 sm:$0xff]  }
  0x42   :  { %v3210_v1 = vld [vmem:[#allocation6 + $0x2e4] ss:$16 sps:$4 sm:$0xff]   ;;  %1698 = vmatprep.subr.bf16.mxu0 %v3208_v0  ;;  %v3213_v3 = vld [vmem:[#allocation6 + $0x2e0] ss:$16 sps:$4 sm:$0xff]   ;;  %v115_v50 = vld [vmem:[#allocation3 + $0x8] sm:$0xff]  ;;  %s3853_s9 = smov [#allocation12]  }
  0x43   :  { %1741 = vmatprep.subr.bf16.mxu1 %v3210_v1  ;;  %v3214_v4 = vld [vmem:[#allocation6 + $0xc4] ss:$16 sps:$4 sm:$0xff]   ;;  %1699 = vmatpush1.bf16.msra.mxu0 %v3212_v2  ;;  %v3218_v6 = vld [vmem:[#allocation6 + $0xc0] ss:$16 sps:$4 sm:$0xff]   ;;  %v119_v51 = vld [vmem:[#allocation3 + $0x28] sm:$0xff]  ;;  %s2802_s10 = sshll.u32 %s3853_s9, 4  ;;  %s2803_s10 = int_to_ptr.vmem [resolvable:$true] %s2802_s10 }
  0x44   :  { %1742 = vmatpush1.bf16.msra.mxu1 %v3213_v3  ;;  %v3216_v5 = vld [vmem:[#allocation6 + $0x2c4] ss:$16 sps:$4 sm:$0xff]   ;;  %1700 = vmatprep.subr.bf16.mxu0 %v3214_v4  ;;  %v3219_v7 = vld [vmem:[#allocation6 + $0x2c0] ss:$16 sps:$4 sm:$0xff]   ;;  %v3914_v55 = vcombine.high %v115_v50, %v119_v51  ;;  %p3817_p12 = scmp.lt.s32.totalorder %s2803_s10, %s2803_s10 }
  0x45   :  { %1743 = vmatprep.subr.bf16.mxu1 %v3216_v5  ;;  %v3220_v8 = vld [vmem:[#allocation6 + $0xa4] ss:$16 sps:$4 sm:$0xff]   ;;  %v3224_v10 = vld [vmem:[#allocation6 + $0xa0] ss:$16 sps:$4 sm:$0xff]  }
  0x46   :  { %v3222_v9 = vld [vmem:[#allocation6 + $0x2a4] ss:$16 sps:$4 sm:$0xff]   ;;  %v3225_v11 = vld [vmem:[#allocation6 + $0x2a0] ss:$16 sps:$4 sm:$0xff]   ;;  %1773 = vmatprep.mubr.bf16.mxu1 %v3914_v55 }
  0x47   :  { %1701 = vmatpush1.bf16.msra.mxu0 %v3218_v6  ;;  %v3226_v12 = vld [vmem:[#allocation6 + $0x84] ss:$16 sps:$4 sm:$0xff]   ;;  %v3230_v14 = vld [vmem:[#allocation6 + $0x80] ss:$16 sps:$4 sm:$0xff]  }
  0x48   :  { %1744 = vmatpush1.bf16.msra.mxu1 %v3219_v7  ;;  %1702 = vmatprep.subr.bf16.mxu0 %v3220_v8  ;;  %v3228_v13 = vld [vmem:[#allocation6 + $0x284] ss:$16 sps:$4 sm:$0xff]   ;;  %v3231_v15 = vld [vmem:[#allocation6 + $0x280] ss:$16 sps:$4 sm:$0xff]  }
  0x49   :  { %1745 = vmatprep.subr.bf16.mxu1 %v3222_v9  ;;  %v3232_v16 = vld [vmem:[#allocation6 + $0x64] ss:$16 sps:$4 sm:$0xff]   ;;  %v3236_v18 = vld [vmem:[#allocation6 + $0x60] ss:$16 sps:$4 sm:$0xff]   ;;  %v3920_v9 = vcombine.low %v115_v50, %v119_v51 }
  0x4a   :  { %v3234_v17 = vld [vmem:[#allocation6 + $0x264] ss:$16 sps:$4 sm:$0xff]   ;;  %v3237_v19 = vld [vmem:[#allocation6 + $0x260] ss:$16 sps:$4 sm:$0xff]  }
  0x4b   :  { %1703 = vmatpush1.bf16.msra.mxu0 %v3224_v10  ;;  %v3238_v20 = vld [vmem:[#allocation6 + $0x44] ss:$16 sps:$4 sm:$0xff]   ;;  %v3242_v22 = vld [vmem:[#allocation6 + $0x40] ss:$16 sps:$4 sm:$0xff]  }
  0x4c   :  { %1746 = vmatpush1.bf16.msra.mxu1 %v3225_v11  ;;  %1704 = vmatprep.subr.bf16.mxu0 %v3226_v12  ;;  %v3240_v21 = vld [vmem:[#allocation6 + $0x244] ss:$16 sps:$4 sm:$0xff]   ;;  %v3243_v23 = vld [vmem:[#allocation6 + $0x240] ss:$16 sps:$4 sm:$0xff]  }
  0x4d   :  { %1747 = vmatprep.subr.bf16.mxu1 %v3228_v13  ;;  %v3244_v24 = vld [vmem:[#allocation6 + $0x24] ss:$16 sps:$4 sm:$0xff]   ;;  %v3248_v26 = vld [vmem:[#allocation6 + $0x20] ss:$16 sps:$4 sm:$0xff]  }
  0x4e   :  { %v3246_v25 = vld [vmem:[#allocation6 + $0x224] ss:$16 sps:$4 sm:$0xff]   ;;  %v3249_v27 = vld [vmem:[#allocation6 + $0x220] ss:$16 sps:$4 sm:$0xff]  }
  0x4f   :  { %1705 = vmatpush1.bf16.msra.mxu0 %v3230_v14  ;;  %v3250_v28 = vld [vmem:[#allocation6 + $0x4] ss:$16 sps:$4 sm:$0xff]   ;;  %v3254_v30 = vld [vmem:[#allocation6] ss:$16 sps:$4 sm:$0xff]  }
  0x50   :  { %1748 = vmatpush1.bf16.msra.mxu1 %v3231_v15  ;;  %1706 = vmatprep.subr.bf16.mxu0 %v3232_v16  ;;  %v3252_v29 = vld [vmem:[#allocation6 + $0x204] ss:$16 sps:$4 sm:$0xff]   ;;  %v3255_v31 = vld [vmem:[#allocation6 + $0x200] ss:$16 sps:$4 sm:$0xff]  }
  0x51   :  { %1749 = vmatprep.subr.bf16.mxu1 %v3234_v17  ;;  %v3256_v32 = vld [vmem:[#allocation6 + $0x1e4] ss:$16 sps:$4 sm:$0xff]   ;;  %v3260_v34 = vld [vmem:[#allocation6 + $0x1e0] ss:$16 sps:$4 sm:$0xff]  }
  0x52   :  { %v3258_v33 = vld [vmem:[#allocation6 + $0x3e4] ss:$16 sps:$4 sm:$0xff]   ;;  %v3261_v35 = vld [vmem:[#allocation6 + $0x3e0] ss:$16 sps:$4 sm:$0xff]  }
  0x53   :  { %1707 = vmatpush1.bf16.msra.mxu0 %v3236_v18  ;;  %v3262_v36 = vld [vmem:[#allocation6 + $0x1c4] ss:$16 sps:$4 sm:$0xff]   ;;  %v3266_v38 = vld [vmem:[#allocation6 + $0x1c0] ss:$16 sps:$4 sm:$0xff]  }
  0x54   :  { %1750 = vmatpush1.bf16.msra.mxu1 %v3237_v19  ;;  %1708 = vmatprep.subr.bf16.mxu0 %v3238_v20  ;;  %v3264_v37 = vld [vmem:[#allocation6 + $0x3c4] ss:$16 sps:$4 sm:$0xff]   ;;  %v3267_v39 = vld [vmem:[#allocation6 + $0x3c0] ss:$16 sps:$4 sm:$0xff]  }
  0x55   :  { %1751 = vmatprep.subr.bf16.mxu1 %v3240_v21  ;;  %v3268_v40 = vld [vmem:[#allocation6 + $0x1a4] ss:$16 sps:$4 sm:$0xff]   ;;  %v3272_v42 = vld [vmem:[#allocation6 + $0x1a0] ss:$16 sps:$4 sm:$0xff]  }
  0x56   :  { %v3270_v41 = vld [vmem:[#allocation6 + $0x3a4] ss:$16 sps:$4 sm:$0xff]   ;;  %v3273_v43 = vld [vmem:[#allocation6 + $0x3a0] ss:$16 sps:$4 sm:$0xff]  }
  0x57   :  { %1709 = vmatpush1.bf16.msra.mxu0 %v3242_v22  ;;  %v3274_v44 = vld [vmem:[#allocation6 + $0x184] ss:$16 sps:$4 sm:$0xff]   ;;  %v3278_v46 = vld [vmem:[#allocation6 + $0x180] ss:$16 sps:$4 sm:$0xff]  }
  0x58   :  { %1752 = vmatpush1.bf16.msra.mxu1 %v3243_v23  ;;  %1710 = vmatprep.subr.bf16.mxu0 %v3244_v24  ;;  %v3276_v45 = vld [vmem:[#allocation6 + $0x384] ss:$16 sps:$4 sm:$0xff]   ;;  %v3279_v47 = vld [vmem:[#allocation6 + $0x380] ss:$16 sps:$4 sm:$0xff]  }
  0x59   :  { %1753 = vmatprep.subr.bf16.mxu1 %v3246_v25  ;;  %v114_v48 = vld [vmem:[#allocation3] sm:$0xff] }
  0x5a   :  { %v118_v49 = vld [vmem:[#allocation3 + $0x20] sm:$0xff] }
  0x5b   :  { %1711 = vmatpush1.bf16.msra.mxu0 %v3248_v26  ;;  %v3280_v52 = vld [vmem:[#allocation6 + $0x164] ss:$16 sps:$4 sm:$0xff]   ;;  %v3912_v53 = vcombine.high %v114_v48, %v118_v49  ;;  %v3284_v56 = vld [vmem:[#allocation6 + $0x160] ss:$16 sps:$4 sm:$0xff]   ;;  %v3918_v8 = vcombine.low %v114_v48, %v118_v49 }
  0x5c   :  { %1754 = vmatpush1.bf16.msra.mxu1 %v3249_v27  ;;  %1712 = vmatprep.subr.bf16.mxu0 %v3250_v28  ;;  %v3282_v54 = vld [vmem:[#allocation6 + $0x364] ss:$16 sps:$4 sm:$0xff]   ;;  %v3285_v57 = vld [vmem:[#allocation6 + $0x360] ss:$16 sps:$4 sm:$0xff]  }
  0x5d   :  { %1755 = vmatprep.subr.bf16.mxu1 %v3252_v29  ;;  %1730 = vmatprep.mubr.bf16.mxu0 %v3912_v53  ;;  %v3286_v58 = vld [vmem:[#allocation6 + $0x144] ss:$16 sps:$4 sm:$0xff]   ;;  %v3290_v60 = vld [vmem:[#allocation6 + $0x140] ss:$16 sps:$4 sm:$0xff]  }
  0x5e   :  { %v3288_v59 = vld [vmem:[#allocation6 + $0x344] ss:$16 sps:$4 sm:$0xff]   ;;  %v3291_v61 = vld [vmem:[#allocation6 + $0x340] ss:$16 sps:$4 sm:$0xff]  }
  0x5f   :  { %1713 = vmatpush1.bf16.msra.mxu0 %v3254_v30  ;;  %v3292_v62 = vld [vmem:[#allocation6 + $0x124] ss:$16 sps:$4 sm:$0xff]   ;;  %v3296_v0 = vld [vmem:[#allocation6 + $0x120] ss:$16 sps:$4 sm:$0xff]  }
  0x60   :  { %1756 = vmatpush1.bf16.msra.mxu1 %v3255_v31  ;;  %1714 = vmatprep.subr.bf16.mxu0 %v3256_v32  ;;  %v3294_v63 = vld [vmem:[#allocation6 + $0x324] ss:$16 sps:$4 sm:$0xff]   ;;  %v3297_v1 = vld [vmem:[#allocation6 + $0x320] ss:$16 sps:$4 sm:$0xff]  }
  0x61   :  { %1757 = vmatprep.subr.bf16.mxu1 %v3258_v33  ;;  %v3298_v2 = vld [vmem:[#allocation6 + $0x104] ss:$16 sps:$4 sm:$0xff]   ;;  %v3302_v4 = vld [vmem:[#allocation6 + $0x100] ss:$16 sps:$4 sm:$0xff]  }
  0x62   :  { %v3300_v3 = vld [vmem:[#allocation6 + $0x304] ss:$16 sps:$4 sm:$0xff]   ;;  %v3303_v5 = vld [vmem:[#allocation6 + $0x300] ss:$16 sps:$4 sm:$0xff]  }
  0x63   :  { %1715 = vmatpush2.bf16.msra.mxu0 %v3260_v34  ;;  %v3306_v6 = vld [vmem:[#allocation6 + $0x4e4] ss:$16 sps:$4 sm:$0xff]   ;;  %v3304_v10 = vld [vmem:[#allocation6 + $0x4e0] ss:$16 sps:$4 sm:$0xff]  }
  0x64   :  { %1758 = vmatpush2.bf16.msra.mxu1 %v3261_v35  ;;  %1716 = vmatprep.subr.bf16.mxu0 %v3262_v36  ;;  %v3309_v7 = vld [vmem:[#allocation6 + $0x6e4] ss:$16 sps:$4 sm:$0xff]   ;;  %v3307_v11 = vld [vmem:[#allocation6 + $0x6e0] ss:$16 sps:$4 sm:$0xff]  }
  0x65   :  { %1759 = vmatprep.subr.bf16.mxu1 %v3264_v37  ;;  %v3312_v12 = vld [vmem:[#allocation6 + $0x4c4] ss:$16 sps:$4 sm:$0xff]   ;;  %v3310_v14 = vld [vmem:[#allocation6 + $0x4c0] ss:$16 sps:$4 sm:$0xff]  }
  0x66   :  { %v3315_v13 = vld [vmem:[#allocation6 + $0x6c4] ss:$16 sps:$4 sm:$0xff]   ;;  %v3313_v15 = vld [vmem:[#allocation6 + $0x6c0] ss:$16 sps:$4 sm:$0xff]  }
  0x67   :  { %1717 = vmatpush2.bf16.msra.mxu0 %v3266_v38  ;;  %v3318_v16 = vld [vmem:[#allocation6 + $0x4a4] ss:$16 sps:$4 sm:$0xff]   ;;  %v3316_v18 = vld [vmem:[#allocation6 + $0x4a0] ss:$16 sps:$4 sm:$0xff]   ;;  %v3928_v38 = vld [vmem:[#allocation3 + $0x18] sm:$0xff] }
  0x68   :  { %1760 = vmatpush2.bf16.msra.mxu1 %v3267_v39  ;;  %1718 = vmatprep.subr.bf16.mxu0 %v3268_v40  ;;  %v3321_v17 = vld [vmem:[#allocation6 + $0x6a4] ss:$16 sps:$4 sm:$0xff]   ;;  %v3319_v19 = vld [vmem:[#allocation6 + $0x6a0] ss:$16 sps:$4 sm:$0xff]   ;;  %v3930_v39 = vld [vmem:[#allocation3 + $0x38] sm:$0xff] }
  0x69   :  { %1761 = vmatprep.subr.bf16.mxu1 %v3270_v41  ;;  %v3324_v20 = vld [vmem:[#allocation6 + $0x484] ss:$16 sps:$4 sm:$0xff]   ;;  %v3322_v22 = vld [vmem:[#allocation6 + $0x480] ss:$16 sps:$4 sm:$0xff]  }
  0x6a   :  { %v3327_v21 = vld [vmem:[#allocation6 + $0x684] ss:$16 sps:$4 sm:$0xff]   ;;  %v3325_v23 = vld [vmem:[#allocation6 + $0x680] ss:$16 sps:$4 sm:$0xff]  }
  0x6b   :  { %1719 = vmatpush2.bf16.msra.mxu0 %v3272_v42  ;;  %v3330_v24 = vld [vmem:[#allocation6 + $0x464] ss:$16 sps:$4 sm:$0xff]   ;;  %v3328_v26 = vld [vmem:[#allocation6 + $0x460] ss:$16 sps:$4 sm:$0xff]  }
  0x6c   :  { %1762 = vmatpush2.bf16.msra.mxu1 %v3273_v43  ;;  %1720 = vmatprep.subr.bf16.mxu0 %v3274_v44  ;;  %v3333_v25 = vld [vmem:[#allocation6 + $0x664] ss:$16 sps:$4 sm:$0xff]   ;;  %v3331_v27 = vld [vmem:[#allocation6 + $0x660] ss:$16 sps:$4 sm:$0xff]   ;;  %v3938_v43 = vcombine.high %v3928_v38, %v3930_v39 }
  0x6d   :  { %1763 = vmatprep.subr.bf16.mxu1 %v3276_v45  ;;  %v3336_v28 = vld [vmem:[#allocation6 + $0x444] ss:$16 sps:$4 sm:$0xff]   ;;  %v3334_v30 = vld [vmem:[#allocation6 + $0x440] ss:$16 sps:$4 sm:$0xff]  }
  0x6e   :  { %v3339_v29 = vld [vmem:[#allocation6 + $0x644] ss:$16 sps:$4 sm:$0xff]   ;;  %v3337_v31 = vld [vmem:[#allocation6 + $0x640] ss:$16 sps:$4 sm:$0xff]  }
  0x6f   :  { %1721 = vmatpush2.bf16.msra.mxu0 %v3278_v46  ;;  %v3342_v32 = vld [vmem:[#allocation6 + $0x424] ss:$16 sps:$4 sm:$0xff]   ;;  %v3340_v34 = vld [vmem:[#allocation6 + $0x420] ss:$16 sps:$4 sm:$0xff]  }
  0x70   :  { %1764 = vmatpush2.bf16.msra.mxu1 %v3279_v47  ;;  %1722 = vmatprep.subr.bf16.mxu0 %v3280_v52  ;;  %v3345_v33 = vld [vmem:[#allocation6 + $0x624] ss:$16 sps:$4 sm:$0xff]   ;;  %v3343_v35 = vld [vmem:[#allocation6 + $0x620] ss:$16 sps:$4 sm:$0xff]  }
  0x71   :  { %1765 = vmatprep.subr.bf16.mxu1 %v3282_v54  ;;  %v3924_v36 = vld [vmem:[#allocation3 + $0x10] sm:$0xff] }
  0x72   :  { %v3926_v37 = vld [vmem:[#allocation3 + $0x30] sm:$0xff] }
  0x73   :  { %1723 = vmatpush2.bf16.msra.mxu0 %v3284_v56  ;;  %v3348_v40 = vld [vmem:[#allocation6 + $0x404] ss:$16 sps:$4 sm:$0xff]   ;;  %v3934_v41 = vcombine.high %v3924_v36, %v3926_v37  ;;  %v3346_v44 = vld [vmem:[#allocation6 + $0x400] ss:$16 sps:$4 sm:$0xff]  }
  0x74   :  { %1766 = vmatpush2.bf16.msra.mxu1 %v3285_v57  ;;  %1724 = vmatprep.subr.bf16.mxu0 %v3286_v58  ;;  %v3351_v42 = vld [vmem:[#allocation6 + $0x604] ss:$16 sps:$4 sm:$0xff]   ;;  %v3349_v45 = vld [vmem:[#allocation6 + $0x600] ss:$16 sps:$4 sm:$0xff]  }
  0x75   :  { %1767 = vmatprep.subr.bf16.mxu1 %v3288_v59  ;;  %v3354_v46 = vld [vmem:[#allocation6 + $0x5e4] ss:$16 sps:$4 sm:$0xff]   ;;  %v3352_v48 = vld [vmem:[#allocation6 + $0x5e0] ss:$16 sps:$4 sm:$0xff]  }
  0x76   :  { %v3357_v47 = vld [vmem:[#allocation6 + $0x7e4] ss:$16 sps:$4 sm:$0xff]   ;;  %v3355_v49 = vld [vmem:[#allocation6 + $0x7e0] ss:$16 sps:$4 sm:$0xff]  }
  0x77   :  { %1725 = vmatpush2.bf16.msra.mxu0 %v3290_v60  ;;  %v3360_v50 = vld [vmem:[#allocation6 + $0x5c4] ss:$16 sps:$4 sm:$0xff]   ;;  %v3358_v52 = vld [vmem:[#allocation6 + $0x5c0] ss:$16 sps:$4 sm:$0xff]  }
  0x78   :  { %1768 = vmatpush2.bf16.msra.mxu1 %v3291_v61  ;;  %1726 = vmatprep.subr.bf16.mxu0 %v3292_v62  ;;  %v3363_v51 = vld [vmem:[#allocation6 + $0x7c4] ss:$16 sps:$4 sm:$0xff]   ;;  %v3361_v54 = vld [vmem:[#allocation6 + $0x7c0] ss:$16 sps:$4 sm:$0xff]  }
  0x79   :  { %1769 = vmatprep.subr.bf16.mxu1 %v3294_v63  ;;  %v3366_v56 = vld [vmem:[#allocation6 + $0x5a4] ss:$16 sps:$4 sm:$0xff]   ;;  %v3364_v58 = vld [vmem:[#allocation6 + $0x5a0] ss:$16 sps:$4 sm:$0xff]  }
  0x7a   :  { %v3369_v57 = vld [vmem:[#allocation6 + $0x7a4] ss:$16 sps:$4 sm:$0xff]   ;;  %v3367_v59 = vld [vmem:[#allocation6 + $0x7a0] ss:$16 sps:$4 sm:$0xff]  }
  0x7b   :  { %1727 = vmatpush2.bf16.msra.mxu0 %v3296_v0  ;;  %v3372_v60 = vld [vmem:[#allocation6 + $0x584] ss:$16 sps:$4 sm:$0xff]   ;;  %v3370_v62 = vld [vmem:[#allocation6 + $0x580] ss:$16 sps:$4 sm:$0xff]  }
  0x7c   :  { %1770 = vmatpush2.bf16.msra.mxu1 %v3297_v1  ;;  %1728 = vmatprep.subr.bf16.mxu0 %v3298_v2  ;;  %v3375_v61 = vld [vmem:[#allocation6 + $0x784] ss:$16 sps:$4 sm:$0xff]   ;;  %v3373_v63 = vld [vmem:[#allocation6 + $0x780] ss:$16 sps:$4 sm:$0xff]  }
  0x7d   :  { %1771 = vmatprep.subr.bf16.mxu1 %v3300_v3  ;;  %v3378_v0 = vld [vmem:[#allocation6 + $0x564] ss:$16 sps:$4 sm:$0xff]   ;;  %v3376_v2 = vld [vmem:[#allocation6 + $0x560] ss:$16 sps:$4 sm:$0xff]  }
  0x7e   :  { %v3381_v1 = vld [vmem:[#allocation6 + $0x764] ss:$16 sps:$4 sm:$0xff]   ;;  %v3379_v3 = vld [vmem:[#allocation6 + $0x760] ss:$16 sps:$4 sm:$0xff]  }
  0x7f   :  { %1729 = vmatpush2.bf16.msra.mxu0 %v3302_v4  ;;  %v3384_v4 = vld [vmem:[#allocation6 + $0x544] ss:$16 sps:$4 sm:$0xff]  }
  0x80   :  { %1772 = vmatpush2.bf16.msra.mxu1 %v3303_v5  ;;  %1784 = vmatprep.subr.bf16.mxu0 %v3306_v6  ;;  %v3387_v5 = vld [vmem:[#allocation6 + $0x744] ss:$16 sps:$4 sm:$0xff]   ;;  %v3382_v6 = vld [vmem:[#allocation6 + $0x540] ss:$16 sps:$4 sm:$0xff]  }
  0x81   :  { %1827 = vmatprep.subr.bf16.mxu1 %v3309_v7  ;;  %v3385_v7 = vld [vmem:[#allocation6 + $0x740] ss:$16 sps:$4 sm:$0xff]  }
  0x82   :  { %1731 = vmatmul.mubr.bf16.vlgmr.msra.gmra.mxu0 %v3918_v8 }
  0x83   :  { %1774 = vmatmul.mubr.bf16.vlgmr.msra.gmra.mxu1 %v3920_v9  ;;  %1785 = vmatpush1.bf16.msra.mxu0 %v3304_v10  ;;  %v3390_v10 = vld [vmem:[#allocation6 + $0x524] ss:$16 sps:$4 sm:$0xff]  }
  0x84   :  { %1828 = vmatpush1.bf16.msra.mxu1 %v3307_v11  ;;  %1786 = vmatprep.subr.bf16.mxu0 %v3312_v12  ;;  %v3393_v11 = vld [vmem:[#allocation6 + $0x724] ss:$16 sps:$4 sm:$0xff]   ;;  %v3388_v12 = vld [vmem:[#allocation6 + $0x520] ss:$16 sps:$4 sm:$0xff]  }
  0x85   :  { %1829 = vmatprep.subr.bf16.mxu1 %v3315_v13  ;;  %1816 = vmatprep.mubr.bf16.mxu0 %v3934_v41  ;;  %v3391_v13 = vld [vmem:[#allocation6 + $0x720] ss:$16 sps:$4 sm:$0xff]  }
  0x86   :  { %1859 = vmatprep.mubr.bf16.mxu1 %v3938_v43 }
  0x87   :  { %1787 = vmatpush1.bf16.msra.mxu0 %v3310_v14  ;;  %v3396_v14 = vld [vmem:[#allocation6 + $0x504] ss:$16 sps:$4 sm:$0xff]  }
  0x88   :  { %1830 = vmatpush1.bf16.msra.mxu1 %v3313_v15  ;;  %1788 = vmatprep.subr.bf16.mxu0 %v3318_v16  ;;  %v3399_v15 = vld [vmem:[#allocation6 + $0x704] ss:$16 sps:$4 sm:$0xff]   ;;  %v3394_v16 = vld [vmem:[#allocation6 + $0x500] ss:$16 sps:$4 sm:$0xff]  }
  0x89   :  { %1831 = vmatprep.subr.bf16.mxu1 %v3321_v17  ;;  %v3397_v17 = vld [vmem:[#allocation6 + $0x700] ss:$16 sps:$4 sm:$0xff]  }
  0x8b   :  { %1789 = vmatpush1.bf16.msra.mxu0 %v3316_v18  ;;  %v3402_v18 = vld [vmem:[#allocation6 + $0xec] ss:$16 sps:$4 sm:$0xff]  }
  0x8c   :  { %1832 = vmatpush1.bf16.msra.mxu1 %v3319_v19  ;;  %1790 = vmatprep.subr.bf16.mxu0 %v3324_v20  ;;  %v3405_v19 = vld [vmem:[#allocation6 + $0x2ec] ss:$16 sps:$4 sm:$0xff]   ;;  %v3944_v20 = vcombine.low %v3924_v36, %v3926_v37 }
  0x8d   :  { %1833 = vmatprep.subr.bf16.mxu1 %v3327_v21  ;;  %v3948_v21 = vcombine.low %v3928_v38, %v3930_v39  ;;  %v3426_v36 = vld [vmem:[#allocation6 + $0x6c] ss:$16 sps:$4 sm:$0xff]   ;;  %v3424_v38 = vld [vmem:[#allocation6 + $0x68] ss:$16 sps:$4 sm:$0xff]  }
  0x8e   :  { %v3429_v37 = vld [vmem:[#allocation6 + $0x26c] ss:$16 sps:$4 sm:$0xff]  }
  0x8f   :  { %1791 = vmatpush1.bf16.msra.mxu0 %v3322_v22  ;;  %v3400_v22 = vld [vmem:[#allocation6 + $0xe8] ss:$16 sps:$4 sm:$0xff]   ;;  %v3435_v39 = vld [vmem:[#allocation6 + $0x24c] ss:$16 sps:$4 sm:$0xff]  }
  0x90   :  { %1834 = vmatpush1.bf16.msra.mxu1 %v3325_v23  ;;  %1792 = vmatprep.subr.bf16.mxu0 %v3330_v24  ;;  %v3403_v23 = vld [vmem:[#allocation6 + $0x2e8] ss:$16 sps:$4 sm:$0xff]   ;;  %v3408_v24 = vld [vmem:[#allocation6 + $0xcc] ss:$16 sps:$4 sm:$0xff]  }
  0x91   :  { %1835 = vmatprep.subr.bf16.mxu1 %v3333_v25  ;;  %v3411_v25 = vld [vmem:[#allocation6 + $0x2cc] ss:$16 sps:$4 sm:$0xff]  }
  0x93   :  { %1793 = vmatpush1.bf16.msra.mxu0 %v3328_v26  ;;  %v3406_v26 = vld [vmem:[#allocation6 + $0xc8] ss:$16 sps:$4 sm:$0xff]  }
  0x94   :  { %1836 = vmatpush1.bf16.msra.mxu1 %v3331_v27  ;;  %1794 = vmatprep.subr.bf16.mxu0 %v3336_v28  ;;  %v3409_v27 = vld [vmem:[#allocation6 + $0x2c8] ss:$16 sps:$4 sm:$0xff]   ;;  %v3414_v28 = vld [vmem:[#allocation6 + $0xac] ss:$16 sps:$4 sm:$0xff]  }
  0x95   :  { %1837 = vmatprep.subr.bf16.mxu1 %v3339_v29  ;;  %v3417_v29 = vld [vmem:[#allocation6 + $0x2ac] ss:$16 sps:$4 sm:$0xff]  }
  0x97   :  { %1795 = vmatpush1.bf16.msra.mxu0 %v3334_v30  ;;  %v3412_v30 = vld [vmem:[#allocation6 + $0xa8] ss:$16 sps:$4 sm:$0xff]  }
  0x98   :  { %1838 = vmatpush1.bf16.msra.mxu1 %v3337_v31  ;;  %1796 = vmatprep.subr.bf16.mxu0 %v3342_v32  ;;  %v3415_v31 = vld [vmem:[#allocation6 + $0x2a8] ss:$16 sps:$4 sm:$0xff]   ;;  %v3420_v32 = vld [vmem:[#allocation6 + $0x8c] ss:$16 sps:$4 sm:$0xff]  }
  0x99   :  { %1839 = vmatprep.subr.bf16.mxu1 %v3345_v33  ;;  %v3423_v33 = vld [vmem:[#allocation6 + $0x28c] ss:$16 sps:$4 sm:$0xff]  }
  0x9b   :  { %1797 = vmatpush1.bf16.msra.mxu0 %v3340_v34  ;;  %v3418_v34 = vld [vmem:[#allocation6 + $0x88] ss:$16 sps:$4 sm:$0xff]  }
  0x9c   :  { %1840 = vmatpush1.bf16.msra.mxu1 %v3343_v35  ;;  %1798 = vmatprep.subr.bf16.mxu0 %v3348_v40  ;;  %v3421_v35 = vld [vmem:[#allocation6 + $0x288] ss:$16 sps:$4 sm:$0xff]  }
  0x9d   :  { %1841 = vmatprep.subr.bf16.mxu1 %v3351_v42  ;;  %v3430_v40 = vld [vmem:[#allocation6 + $0x48] ss:$16 sps:$4 sm:$0xff]  }
  0x9e   :  { %v3433_v42 = vld [vmem:[#allocation6 + $0x248] ss:$16 sps:$4 sm:$0xff]  }
  0x9f   :  { %1799 = vmatpush1.bf16.msra.mxu0 %v3346_v44  ;;  %v3438_v44 = vld [vmem:[#allocation6 + $0x2c] ss:$16 sps:$4 sm:$0xff]  }
  0xa0   :  { %1842 = vmatpush1.bf16.msra.mxu1 %v3349_v45  ;;  %1800 = vmatprep.subr.bf16.mxu0 %v3354_v46  ;;  %v3441_v45 = vld [vmem:[#allocation6 + $0x22c] ss:$16 sps:$4 sm:$0xff]   ;;  %v3436_v46 = vld [vmem:[#allocation6 + $0x28] ss:$16 sps:$4 sm:$0xff]  }
  0xa1   :  { %1843 = vmatprep.subr.bf16.mxu1 %v3357_v47  ;;  %v3439_v47 = vld [vmem:[#allocation6 + $0x228] ss:$16 sps:$4 sm:$0xff]  }
  0xa3   :  { %1801 = vmatpush2.bf16.msra.mxu0 %v3352_v48  ;;  %v3444_v48 = vld [vmem:[#allocation6 + $0xc] ss:$16 sps:$4 sm:$0xff]  }
  0xa4   :  { %1844 = vmatpush2.bf16.msra.mxu1 %v3355_v49  ;;  %1802 = vmatprep.subr.bf16.mxu0 %v3360_v50  ;;  %v3447_v49 = vld [vmem:[#allocation6 + $0x20c] ss:$16 sps:$4 sm:$0xff]   ;;  %v3442_v50 = vld [vmem:[#allocation6 + $0x8] ss:$16 sps:$4 sm:$0xff]  }
  0xa5   :  { %1845 = vmatprep.subr.bf16.mxu1 %v3363_v51  ;;  %v3445_v51 = vld [vmem:[#allocation6 + $0x208] ss:$16 sps:$4 sm:$0xff]  }
  0xa7   :  { %1803 = vmatpush2.bf16.msra.mxu0 %v3358_v52  ;;  %v3450_v52 = vld [vmem:[#allocation6 + $0x1ec] ss:$16 sps:$4 sm:$0xff]  }
  0xa8   :  { %1846 = vmatpush2.bf16.msra.mxu1 %v3361_v54  ;;  %1804 = vmatprep.subr.bf16.mxu0 %v3366_v56  ;;  %v3453_v54 = vld [vmem:[#allocation6 + $0x3ec] ss:$16 sps:$4 sm:$0xff]   ;;  %v3448_v56 = vld [vmem:[#allocation6 + $0x1e8] ss:$16 sps:$4 sm:$0xff]  }
  0xa9   :  { %1847 = vmatprep.subr.bf16.mxu1 %v3369_v57  ;;  %v3451_v57 = vld [vmem:[#allocation6 + $0x3e8] ss:$16 sps:$4 sm:$0xff]  }
  0xab   :  { %1805 = vmatpush2.bf16.msra.mxu0 %v3364_v58  ;;  %v3456_v58 = vld [vmem:[#allocation6 + $0x1cc] ss:$16 sps:$4 sm:$0xff]  }
  0xac   :  { %1848 = vmatpush2.bf16.msra.mxu1 %v3367_v59  ;;  %1806 = vmatprep.subr.bf16.mxu0 %v3372_v60  ;;  %v3459_v59 = vld [vmem:[#allocation6 + $0x3cc] ss:$16 sps:$4 sm:$0xff]   ;;  %v3454_v60 = vld [vmem:[#allocation6 + $0x1c8] ss:$16 sps:$4 sm:$0xff]  }
  0xad   :  { %1849 = vmatprep.subr.bf16.mxu1 %v3375_v61  ;;  %v3457_v61 = vld [vmem:[#allocation6 + $0x3c8] ss:$16 sps:$4 sm:$0xff]  }
  0xaf   :  { %1807 = vmatpush2.bf16.msra.mxu0 %v3370_v62  ;;  %v3462_v62 = vld [vmem:[#allocation6 + $0x1ac] ss:$16 sps:$4 sm:$0xff]  }
  0xb0   :  { %1850 = vmatpush2.bf16.msra.mxu1 %v3373_v63  ;;  %1808 = vmatprep.subr.bf16.mxu0 %v3378_v0  ;;  %v3465_v63 = vld [vmem:[#allocation6 + $0x3ac] ss:$16 sps:$4 sm:$0xff]   ;;  %v3460_v0 = vld [vmem:[#allocation6 + $0x1a8] ss:$16 sps:$4 sm:$0xff]  }
  0xb1   :  { %1851 = vmatprep.subr.bf16.mxu1 %v3381_v1  ;;  %v3463_v1 = vld [vmem:[#allocation6 + $0x3a8] ss:$16 sps:$4 sm:$0xff]  }
  0xb3   :  { %1809 = vmatpush2.bf16.msra.mxu0 %v3376_v2  ;;  %v3468_v2 = vld [vmem:[#allocation6 + $0x18c] ss:$16 sps:$4 sm:$0xff]  }
  0xb4   :  { %1852 = vmatpush2.bf16.msra.mxu1 %v3379_v3  ;;  %1810 = vmatprep.subr.bf16.mxu0 %v3384_v4  ;;  %v3471_v3 = vld [vmem:[#allocation6 + $0x38c] ss:$16 sps:$4 sm:$0xff]   ;;  %v3466_v4 = vld [vmem:[#allocation6 + $0x188] ss:$16 sps:$4 sm:$0xff]  }
  0xb5   :  { %1853 = vmatprep.subr.bf16.mxu1 %v3387_v5  ;;  %v3469_v5 = vld [vmem:[#allocation6 + $0x388] ss:$16 sps:$4 sm:$0xff]  }
  0xb7   :  { %1811 = vmatpush2.bf16.msra.mxu0 %v3382_v6  ;;  %v3474_v6 = vld [vmem:[#allocation6 + $0x16c] ss:$16 sps:$4 sm:$0xff]  }
  0xb8   :  { %1854 = vmatpush2.bf16.msra.mxu1 %v3385_v7  ;;  %1812 = vmatprep.subr.bf16.mxu0 %v3390_v10  ;;  %v3477_v7 = vld [vmem:[#allocation6 + $0x36c] ss:$16 sps:$4 sm:$0xff]   ;;  %v3472_v10 = vld [vmem:[#allocation6 + $0x168] ss:$16 sps:$4 sm:$0xff]  }
  0xb9   :  { %1855 = vmatprep.subr.bf16.mxu1 %v3393_v11  ;;  %v3475_v11 = vld [vmem:[#allocation6 + $0x368] ss:$16 sps:$4 sm:$0xff]  }
  0xbb   :  { %1813 = vmatpush2.bf16.msra.mxu0 %v3388_v12  ;;  %v3480_v12 = vld [vmem:[#allocation6 + $0x14c] ss:$16 sps:$4 sm:$0xff]  }
  0xbc   :  { %1856 = vmatpush2.bf16.msra.mxu1 %v3391_v13  ;;  %1814 = vmatprep.subr.bf16.mxu0 %v3396_v14  ;;  %v3483_v13 = vld [vmem:[#allocation6 + $0x34c] ss:$16 sps:$4 sm:$0xff]   ;;  %v3478_v14 = vld [vmem:[#allocation6 + $0x148] ss:$16 sps:$4 sm:$0xff]  }
  0xbd   :  { %1857 = vmatprep.subr.bf16.mxu1 %v3399_v15  ;;  %v3481_v15 = vld [vmem:[#allocation6 + $0x348] ss:$16 sps:$4 sm:$0xff]  }
  0xbf   :  { %1815 = vmatpush2.bf16.msra.mxu0 %v3394_v16  ;;  %v3486_v16 = vld [vmem:[#allocation6 + $0x12c] ss:$16 sps:$4 sm:$0xff]  }
  0xc0   :  { %1858 = vmatpush2.bf16.msra.mxu1 %v3397_v17  ;;  %1870 = vmatprep.subr.bf16.mxu0 %v3402_v18  ;;  %v3489_v17 = vld [vmem:[#allocation6 + $0x32c] ss:$16 sps:$4 sm:$0xff]   ;;  %v3484_v18 = vld [vmem:[#allocation6 + $0x128] ss:$16 sps:$4 sm:$0xff]  }
  0xc1   :  { %1913 = vmatprep.subr.bf16.mxu1 %v3405_v19  ;;  %v3487_v19 = vld [vmem:[#allocation6 + $0x328] ss:$16 sps:$4 sm:$0xff]  }
  0xc2   :  { %1817 = vmatmul.mubr.bf16.vlgmr.msra.gmra.mxu0 %v3944_v20 }
  0xc3   :  { %1860 = vmatmul.mubr.bf16.vlgmr.msra.gmra.mxu1 %v3948_v21  ;;  %1871 = vmatpush1.bf16.msra.mxu0 %v3400_v22  ;;  %v3492_v22 = vld [vmem:[#allocation6 + $0x10c] ss:$16 sps:$4 sm:$0xff]  }
  0xc4   :  { %1914 = vmatpush1.bf16.msra.mxu1 %v3403_v23  ;;  %1872 = vmatprep.subr.bf16.mxu0 %v3408_v24  ;;  %v3495_v23 = vld [vmem:[#allocation6 + $0x30c] ss:$16 sps:$4 sm:$0xff]   ;;  %v3490_v24 = vld [vmem:[#allocation6 + $0x108] ss:$16 sps:$4 sm:$0xff]  }
  0xc5   :  { %1915 = vmatprep.subr.bf16.mxu1 %v3411_v25  ;;  %1902 = vmatprep.mubr.bf16.mxu0 %v3912_v53  ;;  %v3427_v53 = vld [vmem:[#allocation6 + $0x268] ss:$16 sps:$4 sm:$0xff]  }
  0xc6   :  { %1945 = vmatprep.mubr.bf16.mxu1 %v3914_v55  ;;  %v3432_v55 = vld [vmem:[#allocation6 + $0x4c] ss:$16 sps:$4 sm:$0xff]   ;;  %v3493_v25 = vld [vmem:[#allocation6 + $0x308] ss:$16 sps:$4 sm:$0xff]  }
  0xc7   :  { %1873 = vmatpush1.bf16.msra.mxu0 %v3406_v26  ;;  %v3498_v26 = vld [vmem:[#allocation6 + $0x4ec] ss:$16 sps:$4 sm:$0xff]  }
  0xc8   :  { %1916 = vmatpush1.bf16.msra.mxu1 %v3409_v27  ;;  %1874 = vmatprep.subr.bf16.mxu0 %v3414_v28  ;;  %v3501_v27 = vld [vmem:[#allocation6 + $0x6ec] ss:$16 sps:$4 sm:$0xff]   ;;  %v3496_v28 = vld [vmem:[#allocation6 + $0x4e8] ss:$16 sps:$4 sm:$0xff]  }
  0xc9   :  { %1917 = vmatprep.subr.bf16.mxu1 %v3417_v29  ;;  %v3499_v29 = vld [vmem:[#allocation6 + $0x6e8] ss:$16 sps:$4 sm:$0xff]  }
  0xcb   :  { %1875 = vmatpush1.bf16.msra.mxu0 %v3412_v30  ;;  %v3504_v30 = vld [vmem:[#allocation6 + $0x4cc] ss:$16 sps:$4 sm:$0xff]  }
  0xcc   :  { %1918 = vmatpush1.bf16.msra.mxu1 %v3415_v31  ;;  %1876 = vmatprep.subr.bf16.mxu0 %v3420_v32  ;;  %v3507_v31 = vld [vmem:[#allocation6 + $0x6cc] ss:$16 sps:$4 sm:$0xff]   ;;  %v3502_v32 = vld [vmem:[#allocation6 + $0x4c8] ss:$16 sps:$4 sm:$0xff]  }
  0xcd   :  { %1919 = vmatprep.subr.bf16.mxu1 %v3423_v33  ;;  %v3505_v33 = vld [vmem:[#allocation6 + $0x6c8] ss:$16 sps:$4 sm:$0xff]  }
  0xcf   :  { %1877 = vmatpush1.bf16.msra.mxu0 %v3418_v34  ;;  %v3510_v34 = vld [vmem:[#allocation6 + $0x4ac] ss:$16 sps:$4 sm:$0xff]  }
  0xd0   :  { %1920 = vmatpush1.bf16.msra.mxu1 %v3421_v35  ;;  %1878 = vmatprep.subr.bf16.mxu0 %v3426_v36  ;;  %v3513_v35 = vld [vmem:[#allocation6 + $0x6ac] ss:$16 sps:$4 sm:$0xff]   ;;  %v3508_v36 = vld [vmem:[#allocation6 + $0x4a8] ss:$16 sps:$4 sm:$0xff]  }
  0xd1   :  { %1921 = vmatprep.subr.bf16.mxu1 %v3429_v37  ;;  %v3511_v37 = vld [vmem:[#allocation6 + $0x6a8] ss:$16 sps:$4 sm:$0xff]  }
  0xd3   :  { %1879 = vmatpush1.bf16.msra.mxu0 %v3424_v38  ;;  %v3516_v38 = vld [vmem:[#allocation6 + $0x48c] ss:$16 sps:$4 sm:$0xff]  }
  0xd4   :  { %1922 = vmatpush1.bf16.msra.mxu1 %v3427_v53  ;;  %1880 = vmatprep.subr.bf16.mxu0 %v3432_v55  ;;  %v3519_v53 = vld [vmem:[#allocation6 + $0x68c] ss:$16 sps:$4 sm:$0xff]  }
  0xd5   :  { %1923 = vmatprep.subr.bf16.mxu1 %v3435_v39  ;;  %v3522_v55 = vld [vmem:[#allocation6 + $0x46c] ss:$16 sps:$4 sm:$0xff]  }
  0xd6   :  { %v3525_v39 = vld [vmem:[#allocation6 + $0x66c] ss:$16 sps:$4 sm:$0xff]  }
  0xd7   :  { %1881 = vmatpush1.bf16.msra.mxu0 %v3430_v40  ;;  %v3520_v40 = vld [vmem:[#allocation6 + $0x468] ss:$16 sps:$4 sm:$0xff]  }
  0xd8   :  { %1924 = vmatpush1.bf16.msra.mxu1 %v3433_v42  ;;  %1882 = vmatprep.subr.bf16.mxu0 %v3438_v44  ;;  %v3523_v42 = vld [vmem:[#allocation6 + $0x668] ss:$16 sps:$4 sm:$0xff]   ;;  %v3528_v44 = vld [vmem:[#allocation6 + $0x44c] ss:$16 sps:$4 sm:$0xff]  }
  0xd9   :  { %1925 = vmatprep.subr.bf16.mxu1 %v3441_v45  ;;  %v3529_v45 = vld [vmem:[#allocation6 + $0x648] ss:$16 sps:$4 sm:$0xff]  }
  0xdb   :  { %1883 = vmatpush1.bf16.msra.mxu0 %v3436_v46  ;;  %v3534_v46 = vld [vmem:[#allocation6 + $0x42c] ss:$16 sps:$4 sm:$0xff]  }
  0xdc   :  { %1926 = vmatpush1.bf16.msra.mxu1 %v3439_v47  ;;  %1884 = vmatprep.subr.bf16.mxu0 %v3444_v48  ;;  %v3537_v47 = vld [vmem:[#allocation6 + $0x62c] ss:$16 sps:$4 sm:$0xff]   ;;  %v3532_v48 = vld [vmem:[#allocation6 + $0x428] ss:$16 sps:$4 sm:$0xff]  }
  0xdd   :  { %1927 = vmatprep.subr.bf16.mxu1 %v3447_v49  ;;  %v3535_v49 = vld [vmem:[#allocation6 + $0x628] ss:$16 sps:$4 sm:$0xff]  }
  0xdf   :  { %1885 = vmatpush1.bf16.msra.mxu0 %v3442_v50  ;;  %v3540_v50 = vld [vmem:[#allocation6 + $0x40c] ss:$16 sps:$4 sm:$0xff]  }
  0xe0   :  { %1928 = vmatpush1.bf16.msra.mxu1 %v3445_v51  ;;  %1886 = vmatprep.subr.bf16.mxu0 %v3450_v52  ;;  %v3543_v51 = vld [vmem:[#allocation6 + $0x60c] ss:$16 sps:$4 sm:$0xff]   ;;  %v3538_v52 = vld [vmem:[#allocation6 + $0x408] ss:$16 sps:$4 sm:$0xff]  }
  0xe1   :  { %1929 = vmatprep.subr.bf16.mxu1 %v3453_v54  ;;  %v3541_v54 = vld [vmem:[#allocation6 + $0x608] ss:$16 sps:$4 sm:$0xff]  }
  0xe3   :  { %1887 = vmatpush2.bf16.msra.mxu0 %v3448_v56  ;;  %v3546_v56 = vld [vmem:[#allocation6 + $0x5ec] ss:$16 sps:$4 sm:$0xff]  }
  0xe4   :  { %1930 = vmatpush2.bf16.msra.mxu1 %v3451_v57  ;;  %1888 = vmatprep.subr.bf16.mxu0 %v3456_v58  ;;  %v3549_v57 = vld [vmem:[#allocation6 + $0x7ec] ss:$16 sps:$4 sm:$0xff]   ;;  %v3544_v58 = vld [vmem:[#allocation6 + $0x5e8] ss:$16 sps:$4 sm:$0xff]  }
  0xe5   :  { %1931 = vmatprep.subr.bf16.mxu1 %v3459_v59  ;;  %v3547_v59 = vld [vmem:[#allocation6 + $0x7e8] ss:$16 sps:$4 sm:$0xff]  }
  0xe7   :  { %1889 = vmatpush2.bf16.msra.mxu0 %v3454_v60  ;;  %v3552_v60 = vld [vmem:[#allocation6 + $0x5cc] ss:$16 sps:$4 sm:$0xff]  }
  0xe8   :  { %1932 = vmatpush2.bf16.msra.mxu1 %v3457_v61  ;;  %1890 = vmatprep.subr.bf16.mxu0 %v3462_v62  ;;  %v3555_v61 = vld [vmem:[#allocation6 + $0x7cc] ss:$16 sps:$4 sm:$0xff]   ;;  %v3550_v62 = vld [vmem:[#allocation6 + $0x5c8] ss:$16 sps:$4 sm:$0xff]  }
  0xe9   :  { %1933 = vmatprep.subr.bf16.mxu1 %v3465_v63  ;;  %v3553_v63 = vld [vmem:[#allocation6 + $0x7c8] ss:$16 sps:$4 sm:$0xff]  }
  0xeb   :  { %1891 = vmatpush2.bf16.msra.mxu0 %v3460_v0  ;;  %v3558_v0 = vld [vmem:[#allocation6 + $0x5ac] ss:$16 sps:$4 sm:$0xff]  }
  0xec   :  { %1934 = vmatpush2.bf16.msra.mxu1 %v3463_v1  ;;  %1892 = vmatprep.subr.bf16.mxu0 %v3468_v2  ;;  %v3561_v1 = vld [vmem:[#allocation6 + $0x7ac] ss:$16 sps:$4 sm:$0xff]   ;;  %v3556_v2 = vld [vmem:[#allocation6 + $0x5a8] ss:$16 sps:$4 sm:$0xff]  }
  0xed   :  { %1935 = vmatprep.subr.bf16.mxu1 %v3471_v3  ;;  %v3559_v3 = vld [vmem:[#allocation6 + $0x7a8] ss:$16 sps:$4 sm:$0xff]  }
  0xef   :  { %1893 = vmatpush2.bf16.msra.mxu0 %v3466_v4  ;;  %v3564_v4 = vld [vmem:[#allocation6 + $0x58c] ss:$16 sps:$4 sm:$0xff]  }
  0xf0   :  { %1936 = vmatpush2.bf16.msra.mxu1 %v3469_v5  ;;  %1894 = vmatprep.subr.bf16.mxu0 %v3474_v6  ;;  %v3567_v5 = vld [vmem:[#allocation6 + $0x78c] ss:$16 sps:$4 sm:$0xff]   ;;  %v3562_v6 = vld [vmem:[#allocation6 + $0x588] ss:$16 sps:$4 sm:$0xff]  }
  0xf1   :  { %1937 = vmatprep.subr.bf16.mxu1 %v3477_v7  ;;  %v3565_v7 = vld [vmem:[#allocation6 + $0x788] ss:$16 sps:$4 sm:$0xff]  }
  0xf3   :  { %1895 = vmatpush2.bf16.msra.mxu0 %v3472_v10  ;;  %v3570_v10 = vld [vmem:[#allocation6 + $0x56c] ss:$16 sps:$4 sm:$0xff]  }
  0xf4   :  { %1938 = vmatpush2.bf16.msra.mxu1 %v3475_v11  ;;  %1896 = vmatprep.subr.bf16.mxu0 %v3480_v12  ;;  %v3573_v11 = vld [vmem:[#allocation6 + $0x76c] ss:$16 sps:$4 sm:$0xff]   ;;  %v3568_v12 = vld [vmem:[#allocation6 + $0x568] ss:$16 sps:$4 sm:$0xff]  }
  0xf5   :  { %1939 = vmatprep.subr.bf16.mxu1 %v3483_v13  ;;  %v3571_v13 = vld [vmem:[#allocation6 + $0x768] ss:$16 sps:$4 sm:$0xff]  }
  0xf7   :  { %1897 = vmatpush2.bf16.msra.mxu0 %v3478_v14  ;;  %v3576_v14 = vld [vmem:[#allocation6 + $0x54c] ss:$16 sps:$4 sm:$0xff]  }
  0xf8   :  { %1940 = vmatpush2.bf16.msra.mxu1 %v3481_v15  ;;  %1898 = vmatprep.subr.bf16.mxu0 %v3486_v16  ;;  %v3579_v15 = vld [vmem:[#allocation6 + $0x74c] ss:$16 sps:$4 sm:$0xff]   ;;  %v3574_v16 = vld [vmem:[#allocation6 + $0x548] ss:$16 sps:$4 sm:$0xff]  }
  0xf9   :  { %1941 = vmatprep.subr.bf16.mxu1 %v3489_v17  ;;  %v3577_v17 = vld [vmem:[#allocation6 + $0x748] ss:$16 sps:$4 sm:$0xff]  }
  0xfb   :  { %1899 = vmatpush2.bf16.msra.mxu0 %v3484_v18  ;;  %v3582_v18 = vld [vmem:[#allocation6 + $0x52c] ss:$16 sps:$4 sm:$0xff]  }
  0xfc   :  { %1942 = vmatpush2.bf16.msra.mxu1 %v3487_v19  ;;  %1900 = vmatprep.subr.bf16.mxu0 %v3492_v22  ;;  %v3585_v19 = vld [vmem:[#allocation6 + $0x72c] ss:$16 sps:$4 sm:$0xff]   ;;  %v3580_v22 = vld [vmem:[#allocation6 + $0x528] ss:$16 sps:$4 sm:$0xff]  }
  0xfd   :  { %1943 = vmatprep.subr.bf16.mxu1 %v3495_v23  ;;  %v3583_v23 = vld [vmem:[#allocation6 + $0x728] ss:$16 sps:$4 sm:$0xff]  }
  0xff   :  { %1901 = vmatpush2.bf16.msra.mxu0 %v3490_v24  ;;  %v3588_v24 = vld [vmem:[#allocation6 + $0x50c] ss:$16 sps:$4 sm:$0xff]  }
 0x100   :  { %1944 = vmatpush2.bf16.msra.mxu1 %v3493_v25  ;;  %1956 = vmatprep.subr.bf16.mxu0 %v3498_v26  ;;  %v3591_v25 = vld [vmem:[#allocation6 + $0x70c] ss:$16 sps:$4 sm:$0xff]   ;;  %v3586_v26 = vld [vmem:[#allocation6 + $0x508] ss:$16 sps:$4 sm:$0xff]  }
 0x101   :  { %1999 = vmatprep.subr.bf16.mxu1 %v3501_v27  ;;  %v3589_v27 = vld [vmem:[#allocation6 + $0x708] ss:$16 sps:$4 sm:$0xff]  }
 0x102   :  { %1903 = vmatmul.mubr.bf16.vlgmr.msra.gmra.mxu0 %v3918_v8  ;;  %v3514_v8 = vld [vmem:[#allocation6 + $0x488] ss:$16 sps:$4 sm:$0xff]  }
 0x103   :  { %1946 = vmatmul.mubr.bf16.vlgmr.msra.gmra.mxu1 %v3920_v9  ;;  %1957 = vmatpush1.bf16.msra.mxu0 %v3496_v28  ;;  %v3517_v9 = vld [vmem:[#allocation6 + $0x688] ss:$16 sps:$4 sm:$0xff]  }
 0x104   :  { %2000 = vmatpush1.bf16.msra.mxu1 %v3499_v29  ;;  %1958 = vmatprep.subr.bf16.mxu0 %v3504_v30  ;;  %v3594_v28 = vld [vmem:[#allocation9 + $0x74] ss:$8 sps:$4 sm:$0xff]   ;;  %v3592_v29 = vld [vmem:[#allocation9 + $0x70] ss:$8 sps:$4 sm:$0xff]   ;;  %v3597_v30 = vld [vmem:[#allocation9 + $0x64] ss:$8 sps:$4 sm:$0xff]  }
 0x105   :  { %2001 = vmatprep.subr.bf16.mxu1 %v3507_v31  ;;  %1988 = vmatprep.mubr.bf16.mxu0 %v3934_v41  ;;  %v3531_v41 = vld [vmem:[#allocation6 + $0x64c] ss:$16 sps:$4 sm:$0xff]  }
 0x106   :  { %2031 = vmatprep.mubr.bf16.mxu1 %v3938_v43  ;;  %v3526_v43 = vld [vmem:[#allocation6 + $0x448] ss:$16 sps:$4 sm:$0xff]   ;;  %v3595_v31 = vld [vmem:[#allocation9 + $0x60] ss:$8 sps:$4 sm:$0xff]  }
 0x107   :  { %1959 = vmatpush1.bf16.msra.mxu0 %v3502_v32  ;;  %v3600_v32 = vld [vmem:[#allocation9 + $0x54] ss:$8 sps:$4 sm:$0xff]  }
 0x108   :  { %2002 = vmatpush1.bf16.msra.mxu1 %v3505_v33  ;;  %1960 = vmatprep.subr.bf16.mxu0 %v3510_v34  ;;  %v3598_v33 = vld [vmem:[#allocation9 + $0x50] ss:$8 sps:$4 sm:$0xff]   ;;  %v3603_v34 = vld [vmem:[#allocation9 + $0x44] ss:$8 sps:$4 sm:$0xff]  }
 0x109   :  { %2003 = vmatprep.subr.bf16.mxu1 %v3513_v35  ;;  %v3640_v35 = vld [vmem:[#allocation9 + $0x170] ss:$8 sps:$4 sm:$0xff]  }
 0x10b   :  { %1961 = vmatpush1.bf16.msra.mxu0 %v3508_v36  ;;  %v3642_v36 = vld [vmem:[#allocation9 + $0x174] ss:$8 sps:$4 sm:$0xff]  }
 0x10c   :  { %2004 = vmatpush1.bf16.msra.mxu1 %v3511_v37  ;;  %1962 = vmatprep.subr.bf16.mxu0 %v3516_v38  ;;  %v3645_v37 = vld [vmem:[#allocation9 + $0x164] ss:$8 sps:$4 sm:$0xff]   ;;  %v3601_v38 = vld [vmem:[#allocation9 + $0x40] ss:$8 sps:$4 sm:$0xff]  }
 0x10d   :  { %2005 = vmatprep.subr.bf16.mxu1 %v3519_v53  ;;  %v3606_v53 = vld [vmem:[#allocation9 + $0x34] ss:$8 sps:$4 sm:$0xff]  }
 0x10f   :  { %1963 = vmatpush1.bf16.msra.mxu0 %v3514_v8  ;;  %v3604_v8 = vld [vmem:[#allocation9 + $0x30] ss:$8 sps:$4 sm:$0xff]  }
 0x110   :  { %2006 = vmatpush1.bf16.msra.mxu1 %v3517_v9  ;;  %1964 = vmatprep.subr.bf16.mxu0 %v3522_v55  ;;  %v3609_v9 = vld [vmem:[#allocation9 + $0x24] ss:$8 sps:$4 sm:$0xff]   ;;  %v3646_v55 = vld [vmem:[#allocation9 + $0x150] ss:$8 sps:$4 sm:$0xff]  }
 0x111   :  { %2007 = vmatprep.subr.bf16.mxu1 %v3525_v39  ;;  %v3651_v39 = vld [vmem:[#allocation9 + $0x144] ss:$8 sps:$4 sm:$0xff]  }
 0x113   :  { %1965 = vmatpush1.bf16.msra.mxu0 %v3520_v40  ;;  %v3607_v40 = vld [vmem:[#allocation9 + $0x20] ss:$8 sps:$4 sm:$0xff]  }
 0x114   :  { %2008 = vmatpush1.bf16.msra.mxu1 %v3523_v42  ;;  %1966 = vmatprep.subr.bf16.mxu0 %v3528_v44  ;;  %v3612_v42 = vld [vmem:[#allocation9 + $0x14] ss:$8 sps:$4 sm:$0xff]   ;;  %v3649_v44 = vld [vmem:[#allocation9 + $0x140] ss:$8 sps:$4 sm:$0xff]  }
 0x115   :  { %2009 = vmatprep.subr.bf16.mxu1 %v3531_v41  ;;  %v3654_v41 = vld [vmem:[#allocation9 + $0x134] ss:$8 sps:$4 sm:$0xff]  }
 0x117   :  { %1967 = vmatpush1.bf16.msra.mxu0 %v3526_v43  ;;  %v3610_v43 = vld [vmem:[#allocation9 + $0x10] ss:$8 sps:$4 sm:$0xff]  }
 0x118   :  { %2010 = vmatpush1.bf16.msra.mxu1 %v3529_v45  ;;  %1968 = vmatprep.subr.bf16.mxu0 %v3534_v46  ;;  %v3615_v45 = vld [vmem:[#allocation9 + $0x4] ss:$8 sps:$4 sm:$0xff]   ;;  %v3652_v46 = vld [vmem:[#allocation9 + $0x130] ss:$8 sps:$4 sm:$0xff]  }
 0x119   :  { %2011 = vmatprep.subr.bf16.mxu1 %v3537_v47  ;;  %v3657_v47 = vld [vmem:[#allocation9 + $0x124] ss:$8 sps:$4 sm:$0xff]  }
 0x11b   :  { %1969 = vmatpush1.bf16.msra.mxu0 %v3532_v48  ;;  %v3613_v48 = vld [vmem:[#allocation9] ss:$8 sps:$4 sm:$0xff]  }
 0x11c   :  { %2012 = vmatpush1.bf16.msra.mxu1 %v3535_v49  ;;  %1970 = vmatprep.subr.bf16.mxu0 %v3540_v50  ;;  %v3618_v49 = vld [vmem:[#allocation9 + $0xf4] ss:$8 sps:$4 sm:$0xff]   ;;  %v3655_v50 = vld [vmem:[#allocation9 + $0x120] ss:$8 sps:$4 sm:$0xff]  }
 0x11d   :  { %2013 = vmatprep.subr.bf16.mxu1 %v3543_v51  ;;  %v3660_v51 = vld [vmem:[#allocation9 + $0x114] ss:$8 sps:$4 sm:$0xff]  }
 0x11f   :  { %1971 = vmatpush1.bf16.msra.mxu0 %v3538_v52  ;;  %v3616_v52 = vld [vmem:[#allocation9 + $0xf0] ss:$8 sps:$4 sm:$0xff]  }
 0x120   :  { %2014 = vmatpush1.bf16.msra.mxu1 %v3541_v54  ;;  %1972 = vmatprep.subr.bf16.mxu0 %v3546_v56  ;;  %v3621_v54 = vld [vmem:[#allocation9 + $0xe4] ss:$8 sps:$4 sm:$0xff]   ;;  %v3658_v56 = vld [vmem:[#allocation9 + $0x110] ss:$8 sps:$4 sm:$0xff]  }
 0x121   :  { %2015 = vmatprep.subr.bf16.mxu1 %v3549_v57  ;;  %v3663_v57 = vld [vmem:[#allocation9 + $0x104] ss:$8 sps:$4 sm:$0xff]  }
 0x123   :  { %1973 = vmatpush2.bf16.msra.mxu0 %v3544_v58  ;;  %v3619_v58 = vld [vmem:[#allocation9 + $0xe0] ss:$8 sps:$4 sm:$0xff]  }
 0x124   :  { %2016 = vmatpush2.bf16.msra.mxu1 %v3547_v59  ;;  %1974 = vmatprep.subr.bf16.mxu0 %v3552_v60  ;;  %v3624_v59 = vld [vmem:[#allocation9 + $0xd4] ss:$8 sps:$4 sm:$0xff]   ;;  %v3661_v60 = vld [vmem:[#allocation9 + $0x100] ss:$8 sps:$4 sm:$0xff]  }
 0x125   :  { %2017 = vmatprep.subr.bf16.mxu1 %v3555_v61  ;;  %v3666_v61 = vld [vmem:[#allocation9 + $0x1f4] ss:$8 sps:$4 sm:$0xff]  }
 0x127   :  { %1975 = vmatpush2.bf16.msra.mxu0 %v3550_v62  ;;  %v3622_v62 = vld [vmem:[#allocation9 + $0xd0] ss:$8 sps:$4 sm:$0xff]  }
 0x128   :  { %2018 = vmatpush2.bf16.msra.mxu1 %v3553_v63  ;;  %1976 = vmatprep.subr.bf16.mxu0 %v3558_v0  ;;  %v3627_v63 = vld [vmem:[#allocation9 + $0xc4] ss:$8 sps:$4 sm:$0xff]   ;;  %v3664_v0 = vld [vmem:[#allocation9 + $0x1f0] ss:$8 sps:$4 sm:$0xff]  }
 0x129   :  { %2019 = vmatprep.subr.bf16.mxu1 %v3561_v1  ;;  %v3669_v1 = vld [vmem:[#allocation9 + $0x1e4] ss:$8 sps:$4 sm:$0xff]  }
 0x12b   :  { %1977 = vmatpush2.bf16.msra.mxu0 %v3556_v2  ;;  %v3625_v2 = vld [vmem:[#allocation9 + $0xc0] ss:$8 sps:$4 sm:$0xff]  }
 0x12c   :  { %2020 = vmatpush2.bf16.msra.mxu1 %v3559_v3  ;;  %1978 = vmatprep.subr.bf16.mxu0 %v3564_v4  ;;  %v3630_v3 = vld [vmem:[#allocation9 + $0xb4] ss:$8 sps:$4 sm:$0xff]   ;;  %v3667_v4 = vld [vmem:[#allocation9 + $0x1e0] ss:$8 sps:$4 sm:$0xff]  }
 0x12d   :  { %2021 = vmatprep.subr.bf16.mxu1 %v3567_v5  ;;  %v3672_v5 = vld [vmem:[#allocation9 + $0x1d4] ss:$8 sps:$4 sm:$0xff]  }
 0x12f   :  { %1979 = vmatpush2.bf16.msra.mxu0 %v3562_v6  ;;  %v3628_v6 = vld [vmem:[#allocation9 + $0xb0] ss:$8 sps:$4 sm:$0xff]  }
 0x130   :  { %2022 = vmatpush2.bf16.msra.mxu1 %v3565_v7  ;;  %1980 = vmatprep.subr.bf16.mxu0 %v3570_v10  ;;  %v3633_v7 = vld [vmem:[#allocation9 + $0xa4] ss:$8 sps:$4 sm:$0xff]   ;;  %v3670_v10 = vld [vmem:[#allocation9 + $0x1d0] ss:$8 sps:$4 sm:$0xff]  }
 0x131   :  { %2023 = vmatprep.subr.bf16.mxu1 %v3573_v11  ;;  %v3675_v11 = vld [vmem:[#allocation9 + $0x1c4] ss:$8 sps:$4 sm:$0xff]  }
 0x133   :  { %1981 = vmatpush2.bf16.msra.mxu0 %v3568_v12  ;;  %v3631_v12 = vld [vmem:[#allocation9 + $0xa0] ss:$8 sps:$4 sm:$0xff]  }
 0x134   :  { %2024 = vmatpush2.bf16.msra.mxu1 %v3571_v13  ;;  %1982 = vmatprep.subr.bf16.mxu0 %v3576_v14 }
 0x135   :  { %2025 = vmatprep.subr.bf16.mxu1 %v3579_v15  ;;  %v3636_v15 = vld [vmem:[#allocation9 + $0x94] ss:$8 sps:$4 sm:$0xff]  }
 0x137   :  { %1983 = vmatpush2.bf16.msra.mxu0 %v3574_v16  ;;  %v3673_v16 = vld [vmem:[#allocation9 + $0x1c0] ss:$8 sps:$4 sm:$0xff]  }
 0x138   :  { %2026 = vmatpush2.bf16.msra.mxu1 %v3577_v17  ;;  %1984 = vmatprep.subr.bf16.mxu0 %v3582_v18  ;;  %v3634_v17 = vld [vmem:[#allocation9 + $0x90] ss:$8 sps:$4 sm:$0xff]  }
 0x139   :  { %2027 = vmatprep.subr.bf16.mxu1 %v3585_v19 }
 0x13b   :  { %1985 = vmatpush2.bf16.msra.mxu0 %v3580_v22  ;;  %v3639_v22 = vld [vmem:[#allocation9 + $0x84] ss:$8 sps:$4 sm:$0xff]  }
 0x13c   :  { %2028 = vmatpush2.bf16.msra.mxu1 %v3583_v23  ;;  %1986 = vmatprep.subr.bf16.mxu0 %v3588_v24  ;;  %v3637_v23 = vld [vmem:[#allocation9 + $0x80] ss:$8 sps:$4 sm:$0xff]  }
 0x13d   :  { %2029 = vmatprep.subr.bf16.mxu1 %v3591_v25 }
 0x13f   :  { %1987 = vmatpush2.bf16.msra.mxu0 %v3586_v26  ;;  %v2071_v26 = vlaneseq }
 0x140   :  { %2030 = vmatpush2.bf16.msra.mxu1 %v3589_v27  ;;  %2507 = vmatprep.subr.bf16.mxu0 %v3594_v28 }
 0x141   :  { %2550 = vmatprep.subr.bf16.mxu1 %v3642_v36  ;;  %v3676_v36 = vld [vmem:[#allocation9 + $0x1b0] ss:$8 sps:$4 sm:$0xff]  }
 0x142   :  { %1989 = vmatmul.mubr.bf16.vlgmr.msra.gmra.mxu0 %v3944_v20  ;;  %v3643_v20 = vld [vmem:[#allocation9 + $0x160] ss:$8 sps:$4 sm:$0xff]   ;;  %v1732_v13 = vpop.f32.mrf.mxu0 }
 0x143   :  { %2032 = vmatmul.mubr.bf16.vlgmr.msra.gmra.mxu1 %v3948_v21  ;;  %2508 = vmatpush1.bf16.msra.mxu0 %v3592_v29  ;;  %v3648_v21 = vld [vmem:[#allocation9 + $0x154] ss:$8 sps:$4 sm:$0xff]   ;;  %v1775_v14 = vpop.f32.mrf.mxu1  ;;  %v3960_v29 = vshrl.u32 %v2071_v26, 7 }
 0x144   :  { %2509 = vmatprep.subr.bf16.mxu0 %v3597_v30  ;;  %2551 = vmatpush1.bf16.msra.mxu1 %v3640_v35  ;;  %v1734_v18 = vpop.f32.mrf.mxu0  ;;  %v1776_v30 = vadd.f32 %v1775_v14, %v1732_v13  ;;  %v3694_v13 = vld [vmem:[#allocation11 + $0x60] sm:$0xff]  }
 0x145   :  { %2552 = vmatprep.subr.bf16.mxu1 %v3645_v37  ;;  %v1777_v19 = vpop.f32.mrf.mxu1  ;;  %v2077_v35 = vsub.s32 1, %v3960_v29  ;;  %v3695_v14 = vld [vmem:[#allocation11 + $0x20] sm:$0xff]  }
 0x146   :  { %v1736_v24 = vpop.f32.mrf.mxu0 }
 0x147   :  { %2510 = vmatpush1.bf16.msra.mxu0 %v3595_v31  ;;  %v1779_v25 = vpop.f32.mrf.mxu1 }
 0x148   :  { %2511 = vmatprep.subr.bf16.mxu0 %v3600_v32  ;;  %2553 = vmatpush1.bf16.msra.mxu1 %v3643_v20  ;;  %v1738_v27 = vpop.f32.mrf.mxu0 }
 0x149   :  { %2554 = vmatprep.subr.bf16.mxu1 %v3648_v21  ;;  %v1781_v28 = vpop.f32.mrf.mxu1  ;;  %v1780_v21 = vadd.f32 %v1779_v25, %v1736_v24 }
 0x14b   :  { %2512 = vmatpush1.bf16.msra.mxu0 %v3598_v33  ;;  %v3678_v33 = vld [vmem:[#allocation9 + $0x1b4] ss:$8 sps:$4 sm:$0xff]  }
 0x14c   :  { %2513 = vmatprep.subr.bf16.mxu0 %v3603_v34  ;;  %2555 = vmatpush1.bf16.msra.mxu1 %v3646_v55  ;;  %v1778_v34 = vadd.f32 %v1777_v19, %v1734_v18 }
 0x14d   :  { %2556 = vmatprep.subr.bf16.mxu1 %v3651_v39 }
 0x14f   :  { %2514 = vmatpush1.bf16.msra.mxu0 %v3601_v38  ;;  %v2073_v38 = vsub.s32 0, %v3960_v29 }
 0x150   :  { %2515 = vmatprep.subr.bf16.mxu0 %v3606_v53  ;;  %2557 = vmatpush1.bf16.msra.mxu1 %v3649_v44 }
 0x151   :  { %2558 = vmatprep.subr.bf16.mxu1 %v3654_v41 }
 0x153   :  { %2516 = vmatpush1.bf16.msra.mxu0 %v3604_v8  ;;  %v3964_v8 = vld [vmem:[#allocation8] sm:$0xf] }
 0x154   :  { %2517 = vmatprep.subr.bf16.mxu0 %v3609_v9  ;;  %2559 = vmatpush1.bf16.msra.mxu1 %v3652_v46  ;;  %v2078_v41 = vrot.slane %v3964_v8, %v2077_v35 }
 0x155   :  { %2560 = vmatprep.subr.bf16.mxu1 %v3657_v47  ;;  %v2074_v47 = vrot.slane %v3964_v8, %v2073_v38 }
 0x157   :  { %2518 = vmatpush1.bf16.msra.mxu0 %v3607_v40  ;;  %v3681_v40 = vld [vmem:[#allocation9 + $0x1a4] ss:$8 sps:$4 sm:$0xff]  }
 0x158   :  { %2519 = vmatprep.subr.bf16.mxu0 %v3612_v42  ;;  %2561 = vmatpush1.bf16.msra.mxu1 %v3655_v50  ;;  %v1782_v42 = vadd.f32 %v1781_v28, %v1738_v27 }
 0x159   :  { %2562 = vmatprep.subr.bf16.mxu1 %v3660_v51 }
 0x15b   :  { %2520 = vmatpush1.bf16.msra.mxu0 %v3610_v43 }
 0x15c   :  { %2521 = vmatprep.subr.bf16.mxu0 %v3615_v45  ;;  %2563 = vmatpush1.bf16.msra.mxu1 %v3658_v56  ;;  %v3679_v45 = vld [vmem:[#allocation9 + $0x1a0] ss:$8 sps:$4 sm:$0xff]  }
 0x15d   :  { %2564 = vmatprep.subr.bf16.mxu1 %v3663_v57 }
 0x15f   :  { %2522 = vmatpush1.bf16.msra.mxu0 %v3613_v48 }
 0x160   :  { %2523 = vmatprep.subr.bf16.mxu0 %v3618_v49  ;;  %2565 = vmatpush1.bf16.msra.mxu1 %v3661_v60 }
 0x161   :  { %2566 = vmatprep.subr.bf16.mxu1 %v3666_v61 }
 0x163   :  { %2524 = vmatpush2.bf16.msra.mxu0 %v3616_v52  ;;  %v3684_v52 = vld [vmem:[#allocation9 + $0x194] ss:$8 sps:$4 sm:$0xff]  }
 0x164   :  { %2525 = vmatprep.subr.bf16.mxu0 %v3621_v54  ;;  %2567 = vmatpush2.bf16.msra.mxu1 %v3664_v0 }
 0x165   :  { %2568 = vmatprep.subr.bf16.mxu1 %v3669_v1  ;;  %v3685_v1 = vld [vmem:[#allocation9 + $0x180] ss:$8 sps:$4 sm:$0xff]  }
 0x167   :  { %2526 = vmatpush2.bf16.msra.mxu0 %v3619_v58  ;;  %v3682_v58 = vld [vmem:[#allocation9 + $0x190] ss:$8 sps:$4 sm:$0xff]  }
 0x168   :  { %2527 = vmatprep.subr.bf16.mxu0 %v3624_v59  ;;  %2569 = vmatpush2.bf16.msra.mxu1 %v3667_v4 }
 0x169   :  { %2570 = vmatprep.subr.bf16.mxu1 %v3672_v5  ;;  %v3688_v5 = vld [vmem:[#allocation11 + $0x78] sm:$0xff]  }
 0x16b   :  { %2528 = vmatpush2.bf16.msra.mxu0 %v3622_v62  ;;  %v3687_v62 = vld [vmem:[#allocation9 + $0x184] ss:$8 sps:$4 sm:$0xff]  }
 0x16c   :  { %2529 = vmatprep.subr.bf16.mxu0 %v3627_v63  ;;  %2571 = vmatpush2.bf16.msra.mxu1 %v3670_v10  ;;  %v3691_v10 = vld [vmem:[#allocation11 + $0x30] sm:$0xff]  }
 0x16d   :  { %2572 = vmatprep.subr.bf16.mxu1 %v3675_v11  ;;  %v3692_v11 = vld [vmem:[#allocation11 + $0x68] sm:$0xff]  }
 0x16f   :  { %2530 = vmatpush2.bf16.msra.mxu0 %v3625_v2 }
 0x170   :  { %2531 = vmatprep.subr.bf16.mxu0 %v3630_v3  ;;  %2573 = vmatpush2.bf16.msra.mxu1 %v3673_v16  ;;  %v3697_v16 = vld [vmem:[#allocation11 + $0x18] sm:$0xff]  }
 0x171   :  { %2574 = vmatprep.subr.bf16.mxu1 %v3678_v33 }
 0x173   :  { %2532 = vmatpush2.bf16.msra.mxu0 %v3628_v6  ;;  %v3689_v6 = vld [vmem:[#allocation11 + $0x38] sm:$0xff]  }
 0x174   :  { %2533 = vmatprep.subr.bf16.mxu0 %v3633_v7  ;;  %2575 = vmatpush2.bf16.msra.mxu1 %v3676_v36  ;;  %v3690_v7 = vld [vmem:[#allocation11 + $0x70] sm:$0xff]  }
 0x175   :  { %2576 = vmatprep.subr.bf16.mxu1 %v3681_v40 }
 0x177   :  { %2534 = vmatpush2.bf16.msra.mxu0 %v3631_v12  ;;  %v3693_v12 = vld [vmem:[#allocation11 + $0x28] sm:$0xff]  }
 0x178   :  { %2535 = vmatprep.subr.bf16.mxu0 %v3636_v15  ;;  %2577 = vmatpush2.bf16.msra.mxu1 %v3679_v45  ;;  %v3696_v15 = vld [vmem:[#allocation11 + $0x58] sm:$0xff]  }
 0x179   :  { %2578 = vmatprep.subr.bf16.mxu1 %v3684_v52 }
 0x17b   :  { %2536 = vmatpush2.bf16.msra.mxu0 %v3634_v17 }
 0x17c   :  { %2537 = vmatprep.subr.bf16.mxu0 %v3639_v22  ;;  %2579 = vmatpush2.bf16.msra.mxu1 %v3682_v58 }
 0x17d   :  { %2580 = vmatprep.subr.bf16.mxu1 %v3687_v62  ;;  %v3699_v62 = vld [vmem:[#allocation11 + $0x10] sm:$0xff]  }
 0x17f   :  { %2538 = vmatpush2.bf16.msra.mxu0 %v3637_v23 }
 0x180   :  { %2581 = vmatpush2.bf16.msra.mxu1 %v3685_v1  ;;  %3172 = vmatprep.subr.bf16.mxu0 %v3688_v5  ;;  %v3703_v1 = vld [vmem:[#allocation11] sm:$0xff]  }
 0x182   :  { %v1818_v31 = vpop.f32.mrf.mxu0 }
 0x183   :  { %v1861_v32 = vpop.f32.mrf.mxu1  ;;  %v1819_v37 = vadd.f32 %v1818_v31, %v1776_v30 }
 0x184   :  { %v1820_v53 = vpop.f32.mrf.mxu0 }
 0x185   :  { %v1863_v20 = vpop.f32.mrf.mxu1  ;;  %v1821_v9 = vadd.f32 %v1820_v53, %v1778_v34  ;;  %v1862_v46 = vadd.f32 %v1861_v32, %v1819_v37  ;;  %v2085_v32 = vsub.s32 3, %v3960_v29  ;;  %v2081_v34 = vsub.s32 2, %v3960_v29 }
 0x186   :  { %v1822_v55 = vpop.f32.mrf.mxu0 }
 0x187   :  { %v1865_v39 = vpop.f32.mrf.mxu1  ;;  %v1864_v44 = vadd.f32 %v1863_v20, %v1821_v9  ;;  %v1823_v43 = vadd.f32 %v1822_v55, %v1780_v21  ;;  %v2091_v59 = vadd.f32 %v2074_v47, %v1862_v46  ;;  %v2086_v40 = vrot.slane %v3964_v8, %v2085_v32 }
 0x188   :  { %v1824_v48 = vpop.f32.mrf.mxu0 }
 0x189   :  { %v1866_v49 = vadd.f32 %v1865_v39, %v1823_v43  ;;  %v1825_v50 = vadd.f32 %v1824_v48, %v1782_v42  ;;  %v1867_v51 = vpop.f32.mrf.mxu1  ;;  %v2092_v54 = vadd.f32 %v2078_v41, %v1864_v44  ;;  %v2099_v2 = vmax.f32 %v2091_v59, 0.0 }
 0x18b   :  { %v2095_v56 = vadd.f32 %v2074_v47, %v1866_v49  ;;  %v1868_v57 = vadd.f32 %v1867_v51, %v1825_v50  ;;  %v2100_v63 = vmax.f32 %v2092_v54, 0.0 }
 0x18d   :  { %v2096_v60 = vadd.f32 %v2078_v41, %v1868_v57  ;;  %v2103_v61 = vmax.f32 %v2095_v56, 0.0  ;;  %v2082_v41 = vrot.slane %v3964_v8, %v2081_v34  ;;  %v3700_v8 = vld [vmem:[#allocation11 + $0x48] sm:$0xff]  }
 0x18f   :  { %v2104_v0 = vmax.f32 %v2096_v60, 0.0  ;;  %v2107_v4 = vpack.c.bf16 %v2103_v61, %v2099_v2  ;;  %v3698_v61 = vld [vmem:[#allocation11 + $0x50] sm:$0xff]  }
 0x191   :  { %v2108_v3 = vpack.c.bf16 %v2104_v0, %v2100_v63  ;;  %v3701_v63 = vld [vmem:[#allocation11 + $0x8] sm:$0xff]   ;;  %v3702_v0 = vld [vmem:[#allocation11 + $0x40] sm:$0xff]  }
 0x193   :  { %2539 = vmatprep.mubr.bf16.mxu0 %v2108_v3 }
 0x194   :  { %2540 = vmatmul.mubr.bf16.vlgmr.msra.gmra.mxu0 %v2107_v4  ;;  %v2175_v4 = vld [vmem:[%s3996_s4] sm:$0x3] }
 0x195   :  { %3173 = vmatpush3.bf16.msra.mxu0 %v3689_v6  ;;  %v2184_v6 = vrot.slane %v2175_v4, %v2077_v35 }
 0x196   :  { %3174 = vmatprep.subr.bf16.mxu0 %v3690_v7  ;;  %v2180_v7 = vrot.slane %v2175_v4, %v2073_v38 }
 0x199   :  { %3175 = vmatpush3.bf16.msra.mxu0 %v3691_v10 }
 0x19a   :  { %3176 = vmatprep.subr.bf16.mxu0 %v3692_v11 }
 0x19d   :  { %3177 = vmatpush3.bf16.msra.mxu0 %v3693_v12 }
 0x19e   :  { %3178 = vmatprep.subr.bf16.mxu0 %v3694_v13 }
 0x1a1   :  { %3179 = vmatpush3.bf16.msra.mxu0 %v3695_v14 }
 0x1a2   :  { %3180 = vmatprep.subr.bf16.mxu0 %v3696_v15 }
 0x1a5   :  { %3181 = vmatpush3.bf16.msra.mxu0 %v3697_v16 }
 0x1a6   :  { %3182 = vmatprep.subr.bf16.mxu0 %v3698_v61 }
 0x1a9   :  { %3183 = vmatpush3.bf16.msra.mxu0 %v3699_v62 }
 0x1aa   :  { %3184 = vmatprep.subr.bf16.mxu0 %v3700_v8 }
 0x1ad   :  { %3185 = vmatpush3.bf16.msra.mxu0 %v3701_v63 }
 0x1ae   :  { %3186 = vmatprep.subr.bf16.mxu0 %v3702_v0 }
 0x1b1   :  { %3187 = vmatpush3.bf16.msra.mxu0 %v3703_v1 }
 0x1c2   :  { %v1904_v17 = vpop.f32.mrf.mxu0 }
 0x1c3   :  { %v1947_v18 = vpop.f32.mrf.mxu1 }
 0x1c4   :  { %v1906_v19 = vpop.f32.mrf.mxu0  ;;  %v1948_v27 = vadd.f32 %v1947_v18, %v1904_v17 }
 0x1c5   :  { %v1949_v22 = vpop.f32.mrf.mxu1 }
 0x1c6   :  { %v1908_v23 = vpop.f32.mrf.mxu0  ;;  %v1950_v31 = vadd.f32 %v1949_v22, %v1906_v19 }
 0x1c7   :  { %v1951_v24 = vpop.f32.mrf.mxu1 }
 0x1c8   :  { %v1910_v25 = vpop.f32.mrf.mxu0  ;;  %v1952_v53 = vadd.f32 %v1951_v24, %v1908_v23 }
 0x1c9   :  { %v1953_v26 = vpop.f32.mrf.mxu1 }
 0x1ca   :  { %v1954_v55 = vadd.f32 %v1953_v26, %v1910_v25 }
 0x202   :  { %v1990_v28 = vpop.f32.mrf.mxu0 }
 0x203   :  { %v2033_v30 = vpop.f32.mrf.mxu1  ;;  %v1991_v33 = vadd.f32 %v1990_v28, %v1948_v27 }
 0x204   :  { %v1992_v36 = vpop.f32.mrf.mxu0 }
 0x205   :  { %v2035_v37 = vpop.f32.mrf.mxu1  ;;  %v1993_v20 = vadd.f32 %v1992_v36, %v1950_v31  ;;  %v2034_v44 = vadd.f32 %v2033_v30, %v1991_v33  ;;  %v3144_v30 = vld [vmem:[%s3998_s6] ss:$0 sm:$0xff]  ;;  %s3812_s6 = scalar_lea.vmem %s2803_s10, 128 }
 0x206   :  { %v1994_v21 = vpop.f32.mrf.mxu0  ;;  %p3813_p11 = scmp.ne.s32.totalorder %s2803_s10, %s3812_s6  ;;  %p3818_p13 = scmp.lt.s32.totalorder %s3812_s6, %s3812_s6 }
 0x207   :  { %v2037_v9 = vpop.f32.mrf.mxu1  ;;  %v2036_v39 = vadd.f32 %v2035_v37, %v1993_v20  ;;  %v1995_v42 = vadd.f32 %v1994_v21, %v1952_v53  ;;  %v2093_v51 = vadd.f32 %v2082_v41, %v2034_v44 }
 0x208   :  { %v1996_v43 = vpop.f32.mrf.mxu0  ;;  %p3819_p0 = por %p3818_p13, %p3817_p12 }
 0x209   :  { %v2038_v45 = vadd.f32 %v2037_v9, %v1995_v42  ;;  %v1997_v46 = vadd.f32 %v1996_v43, %v1954_v55  ;;  %v2039_v47 = vpop.f32.mrf.mxu1  ;;  %v2094_v48 = vadd.f32 %v2086_v40, %v2036_v39  ;;  %v2101_v58 = vmax.f32 %v2093_v51, 0.0 }
 0x20a   :  { %p3820_p1 = pnand %p3819_p0, %p3813_p11 }
 0x20b   :  { %v2097_v49 = vadd.f32 %v2082_v41, %v2038_v45  ;;  %v2040_v50 = vadd.f32 %v2039_v47, %v1997_v46  ;;  %v2102_v56 = vmax.f32 %v2094_v48, 0.0 }
 0x20d   :  { %v2098_v52 = vadd.f32 %v2086_v40, %v2040_v50  ;;  %v2105_v54 = vmax.f32 %v2097_v49, 0.0 }
 0x20f   :  { %v2106_v57 = vmax.f32 %v2098_v52, 0.0  ;;  %v2109_v60 = vpack.c.bf16 %v2105_v54, %v2101_v58 }
 0x211   :  { %v2110_v59 = vpack.c.bf16 %v2106_v57, %v2102_v56 }
 0x213   :  { %2582 = vmatprep.mubr.bf16.mxu1 %v2110_v59 }
 0x214   :  { %2583 = vmatmul.mubr.bf16.vlgmr.msra.gmra.mxu1 %v2109_v60 }
 0x254   :  { %v2541_v2 = vpop.f32.mrf.mxu0 }
 0x255   :  { %v2542_v15 = vadd.f32 %v2541_v2, %v2180_v7 }
 0x256   :  { %v2543_v3 = vpop.f32.mrf.mxu0 }
 0x257   :  { %v2544_v13 = vadd.f32 %v2543_v3, %v2184_v6 }
 0x258   :  { %v2545_v5 = vpop.f32.mrf.mxu0 }
 0x259   :  { %v2546_v14 = vadd.f32 %v2545_v5, %v2180_v7 }
 0x25a   :  { %v2547_v11 = vpop.f32.mrf.mxu0 }
 0x25b   :  { %v2548_v17 = vadd.f32 %v2547_v11, %v2184_v6 }
 0x2d4   :  { %v2584_v10 = vpop.f32.mrf.mxu1 }
 0x2d5   :  { %v2585_v22 = vadd.f32 %v2584_v10, %v2542_v15 }
 0x2d6   :  { %v2586_v12 = vpop.f32.mrf.mxu1 }
 0x2d7   :  { %v2587_v18 = vadd.f32 %v2586_v12, %v2544_v13  ;;  %v2593_v35 = vmax.f32 %v2585_v22, 0.0 }
 0x2d8   :  { %v2588_v16 = vpop.f32.mrf.mxu1 }
 0x2d9   :  { %v2589_v19 = vadd.f32 %v2588_v16, %v2546_v14  ;;  %v2594_v26 = vmax.f32 %v2587_v18, 0.0 }
 0x2da   :  { %v2590_v23 = vpop.f32.mrf.mxu1 }
 0x2db   :  { %v2591_v24 = vadd.f32 %v2590_v23, %v2548_v17  ;;  %v2595_v25 = vmax.f32 %v2589_v19, 0.0 }
 0x2dd   :  { %v2596_v27 = vmax.f32 %v2591_v24, 0.0  ;;  %v2597_v29 = vpack.c.bf16 %v2595_v25, %v2593_v35 }
 0x2df   :  { %v2598_v28 = vpack.c.bf16 %v2596_v27, %v2594_v26 }
 0x2e1   :  { %2766 = vmatprep.mubr.bf16.mxu0 %v2598_v28 }
 0x2e2   :  { %2767 = vmatmul.mubr.bf16.vlgmr.msra.gmra.mxu0 %v2597_v29 }
 0x3a2   :  { %v3188_v38 = vpop.f32.mrf.mxu0 }
 0x3a4   :  { %v3189_v31 = vpop.f32.mrf.mxu0 }
 0x3a5   :  { %v3190_v32 = vadd.f32 %v3189_v31, %v3188_v38 }
 0x3a6   :  { %v3191_v33 = vpop.f32.mrf.mxu0 }
 0x3a7   :  { %v2769_v34 = vadd.f32 %v3190_v32, %v3144_v30 }
 0x3a8   :  { %v3192_v36 = vpop.f32.mrf.mxu0 }
 0x3a9   :  { %v3161_v37 = vmul.f32 -1.442695, %v2769_v34  ;;  %v3193_v53 = vadd.f32 %v3192_v36, %v3191_v33 }
 0x3ab   :  { %3704 = vpow2.f32 %v3161_v37  ;;  %v2772_v20 = vadd.f32 %v3193_v53, %v3144_v30 }
 0x3ad   :  { %v3162_v21 = vmul.f32 -1.442695, %v2772_v20 }
 0x3af   :  { %3706 = vpow2.f32 %v3162_v21 }
 0x3b8   :  { %v3705_v9 = vpop.eup %3704 }
 0x3b9   :  { %v2781_v55 = vadd.f32 1.0, %v3705_v9 }
 0x3bb   :  { %3708 = vrcp.f32 %v2781_v55 }
 0x3bc   :  { %v3707_v39 = vpop.eup %3706 }
 0x3bd   :  { %v2782_v40 = vadd.f32 1.0, %v3707_v39 }
 0x3bf   :  { %3710 = vrcp.f32 %v2782_v40 }
 0x3c8   :  { %v3709_v42 = vpop.eup %3708 }
 0x3cc   :  { %v3711_v44 = vpop.eup %3710 }
 0x3cd   :  { %v3170_v41 = vpack.c.bf16 %v3711_v44, %v3709_v42 }
 0x3cf   :  { %3171 = vst [vmem:[#allocation12] sm:$0xff] %v3170_v41  }
 0x3d0   :  { %3823 = shalt.err (!%p3820_p1)
}
 0x3d1   :  { %2808 = dma.vmem_to_hbm [thread:$0]  %s2803_s10, 128, %s3999_s7, [#allocation5], %s3851_s0, %s3851_s0, %s3852_s28  }
 0x3d2   :  { %3838 = dma.done.wait [#allocation5], 128  }
 0x3d3   :  { %3839 = vsyncadd [#allocation5], 4294967168 }
 0x3d4   :  { %2812 = vsyncpa [#allocation4], 1 }
 0x3d5   :  { %2813 = vsyncpa [#allocation7], 1 }
 0x3d6   :  { %2814 = vsyncpa [#allocation10], 1 }
 0x3d7   :  { %2815 = vsyncpa [#allocation5], 1 }

// kernel: tpu_custom_call.1
= control target key start
LH: loop header
LB: loop body
LE: loop exit
PB: predicated region body
PF: predicated region fallthrough
CT: control target
= control target key end

     0   :  { %12 = vsyncpa [#allocation4], 0  ;;  %s3992_s0 = inlined_call_operand.hbm [shape: bf16[16,1024], index: 0, kind: input, shape index: {}]   ;;  %s3993_s1 = inlined_call_operand.hbm [shape: bf16[1024,512], index: 1, kind: input, shape index: {}]   ;;  %s3994_s2 = inlined_call_operand.hbm [shape: f32[1,512], index: 2, kind: input, shape index: {}]   ;;  %s3995_s3 = inlined_call_operand.hbm [shape: bf16[512,256], index: 3, kind: input, shape index: {}]   ;;  %s3996_s4 = inlined_call_operand.vmem [shape: f32[1,256], index: 4, kind: input, shape index: {}]   ;;  %s3997_s5 = inlined_call_operand.hbm [shape: bf16[256,128], index: 5, kind: input, shape index: {}]   ;;  %s3998_s6 = inlined_call_operand.vmem [shape: f32[1,128], index: 6, kind: input, shape index: {}]   ;;  %s3999_s7 = inlined_call_operand.hbm [shape: bf16[16,128], index: 7, kind: output, shape index: {}]  }
   0x1   :  { %13 = vsyncpa [#allocation7], 0 }
   0x2   :  { %14 = vsyncpa [#allocation10], 0 }
   0x3   :  { %15 = vsyncpa [#allocation5], 0  ;;  %s3840_s24 = smov [#allocation6]  }
   0x4   :  { %s33_s25 = sshll.u32 %s3840_s24, 4  ;;  %s34_s25 = int_to_ptr.vmem [resolvable:$true] %s33_s25 }
   0x5   :  { %s3720_s26 = scalar_lea.vmem %s34_s25, 32768  ;;  %p3725_p1 = scmp.lt.s32.totalorder %s34_s25, %s34_s25 }
   0x6   :  { %p3721_p0 = scmp.ne.s32.totalorder %s34_s25, %s3720_s26  ;;  %p3726_p2 = scmp.lt.s32.totalorder %s3720_s26, %s3720_s26 }
   0x8   :  { %p3727_p3 = por %p3726_p2, %p3725_p1 }
   0xa   :  { %p3728_p4 = pnand %p3727_p3, %p3721_p0 }
   0xc   :  { %3731 = shalt.err (!%p3728_p4)
}
   0xd   :  { %s3841_s27 = smov 256   ;;  %s3842_s28 = smov 16  }
   0xe   :  { %39 = dma.hbm_to_vmem [thread:$0]  %s3993_s1, 32768, %s34_s25, [#allocation7], %s3841_s27, %s3841_s27, %s3842_s28  }
   0xf   :  { %s3843_s8 = smov [#allocation9]  }
  0x10   :  { %s55_s9 = sshll.u32 %s3843_s8, 4  ;;  %s56_s9 = int_to_ptr.vmem [resolvable:$true] %s55_s9 }
  0x11   :  { %s3740_s10 = scalar_lea.vmem %s56_s9, 8192  ;;  %p3745_p6 = scmp.lt.s32.totalorder %s56_s9, %s56_s9 }
  0x12   :  { %p3741_p5 = scmp.ne.s32.totalorder %s56_s9, %s3740_s10  ;;  %p3746_p7 = scmp.lt.s32.totalorder %s3740_s10, %s3740_s10 }
  0x14   :  { %p3747_p8 = por %p3746_p7, %p3745_p6 }
  0x16   :  { %p3748_p9 = pnand %p3747_p8, %p3741_p5 }
  0x18   :  { %3751 = shalt.err (!%p3748_p9)
}
  0x19   :  { %s3844_s11 = smov 128   ;;  %s3845_s12 = smov 8  }
  0x1a   :  { %61 = dma.hbm_to_vmem [thread:$0]  %s3995_s3, 8192, %s56_s9, [#allocation10], %s3844_s11, %s3844_s11, %s3845_s12  }
  0x1b   :  { %s3846_s15 = smov [#allocation3]  }
  0x1c   :  { %s21_s16 = sshll.u32 %s3846_s15, 4  ;;  %s22_s16 = int_to_ptr.vmem [resolvable:$true] %s21_s16 }
  0x1d   :  { %s3760_s1 = scalar_lea.vmem %s22_s16, 1024  ;;  %p3765_p11 = scmp.lt.s32.totalorder %s22_s16, %s22_s16 }
  0x1e   :  { %p3761_p10 = scmp.ne.s32.totalorder %s22_s16, %s3760_s1  ;;  %p3766_p12 = scmp.lt.s32.totalorder %s3760_s1, %s3760_s1 }
  0x20   :  { %p3767_p13 = por %p3766_p12, %p3765_p11 }
  0x22   :  { %p3768_p0 = pnand %p3767_p13, %p3761_p10 }
  0x24   :  { %3771 = shalt.err (!%p3768_p0)
}
  0x25   :  { %s3847_s17 = smov 512   ;;  %s3848_s18 = smov 32  }
  0x26   :  { %27 = dma.hbm_to_vmem [thread:$0]  %s3992_s0, 1024, %s22_s16, [#allocation4], %s3847_s17, %s3847_s17, %s3848_s18  }
  0x27   :  { %s3849_s21 = smov [#allocation8]   ;;  %s3850_s3 = smov [#allocation11]  }
  0x28   :  { %s46_s22 = sshll.u32 %s3849_s21, 4  ;;  %s69_s23 = sshll.u32 %s3850_s3, 4  ;;  %s47_s22 = int_to_ptr.vmem [resolvable:$true] %s46_s22  ;;  %s70_s23 = int_to_ptr.vmem [resolvable:$true] %s69_s23 }
  0x29   :  { %s3780_s24 = scalar_lea.vmem %s47_s22, 64  ;;  %p3785_p2 = scmp.lt.s32.totalorder %s47_s22, %s47_s22 }
  0x2a   :  { %p3781_p1 = scmp.ne.s32.totalorder %s47_s22, %s3780_s24  ;;  %p3786_p3 = scmp.lt.s32.totalorder %s3780_s24, %s3780_s24 }
  0x2c   :  { %p3787_p4 = por %p3786_p3, %p3785_p2 }
  0x2e   :  { %p3788_p5 = pnand %p3787_p4, %p3781_p1 }
  0x30   :  { %3791 = shalt.err (!%p3788_p5)
}
  0x31   :  { %49 = dma.hbm_to_vmem [thread:$0]  %s3994_s2, 64, %s47_s22, [#allocation7]  }
  0x32   :  { %s3800_s27 = scalar_lea.vmem %s70_s23, 2048  ;;  %p3805_p7 = scmp.lt.s32.totalorder %s70_s23, %s70_s23 }
  0x33   :  { %p3801_p6 = scmp.ne.s32.totalorder %s70_s23, %s3800_s27  ;;  %p3806_p8 = scmp.lt.s32.totalorder %s3800_s27, %s3800_s27 }
  0x35   :  { %p3807_p9 = por %p3806_p8, %p3805_p7 }
  0x37   :  { %p3808_p10 = pnand %p3807_p9, %p3801_p6 }
  0x39   :  { %3811 = shalt.err (!%p3808_p10)
}
  0x3a   :  { %s3851_s0 = smov 64   ;;  %s3852_s28 = smov 4  }
  0x3b   :  { %75 = dma.hbm_to_vmem [thread:$0]  %s3997_s5, 2048, %s70_s23, [#allocation10], %s3851_s0, %s3851_s0, %s3852_s28  }
  0x3c   :  { %3832 = dma.done.wait [#allocation4], 1024  }
  0x3d   :  { %3833 = vsyncadd [#allocation4], 4294966272 }
  0x3e   :  { %3834 = dma.done.wait [#allocation7], 32832  }
  0x3f   :  { %3835 = vsyncadd [#allocation7], 4294934464 }
  0x40   :  { %3836 = dma.done.wait [#allocation10], 10240  }
  0x41   :  { %3837 = vsyncadd [#allocation10], 4294957056  ;;  %v3208_v0 = vld [vmem:[#allocation6 + $0xe4] ss:$16 sps:$4 sm:$0xff]   ;;  %v3212_v2 = vld [vmem:[#allocation6 + $0xe0] ss:$16 sps:$4 sm:$0xff]  }
  0x42   :  { %v3210_v1 = vld [vmem:[#allocation6 + $0x2e4] ss:$16 sps:$4 sm:$0xff]   ;;  %1698 = vmatprep.subr.bf16.mxu0 %v3208_v0  ;;  %v3213_v3 = vld [vmem:[#allocation6 + $0x2e0] ss:$16 sps:$4 sm:$0xff]   ;;  %v115_v50 = vld [vmem:[#allocation3 + $0x8] sm:$0xff]  ;;  %s3853_s9 = smov [#allocation12]  }
  0x43   :  { %1741 = vmatprep.subr.bf16.mxu1 %v3210_v1  ;;  %v3214_v4 = vld [vmem:[#allocation6 + $0xc4] ss:$16 sps:$4 sm:$0xff]   ;;  %1699 = vmatpush1.bf16.msra.mxu0 %v3212_v2  ;;  %v3218_v6 = vld [vmem:[#allocation6 + $0xc0] ss:$16 sps:$4 sm:$0xff]   ;;  %v119_v51 = vld [vmem:[#allocation3 + $0x28] sm:$0xff]  ;;  %s2802_s10 = sshll.u32 %s3853_s9, 4  ;;  %s2803_s10 = int_to_ptr.vmem [resolvable:$true] %s2802_s10 }
  0x44   :  { %1742 = vmatpush1.bf16.msra.mxu1 %v3213_v3  ;;  %v3216_v5 = vld [vmem:[#allocation6 + $0x2c4] ss:$16 sps:$4 sm:$0xff]   ;;  %1700 = vmatprep.subr.bf16.mxu0 %v3214_v4  ;;  %v3219_v7 = vld [vmem:[#allocation6 + $0x2c0] ss:$16 sps:$4 sm:$0xff]   ;;  %v3914_v55 = vcombine.high %v115_v50, %v119_v51  ;;  %p3817_p12 = scmp.lt.s32.totalorder %s2803_s10, %s2803_s10 }
  0x45   :  { %1743 = vmatprep.subr.bf16.mxu1 %v3216_v5  ;;  %v3220_v8 = vld [vmem:[#allocation6 + $0xa4] ss:$16 sps:$4 sm:$0xff]   ;;  %v3224_v10 = vld [vmem:[#allocation6 + $0xa0] ss:$16 sps:$4 sm:$0xff]  }
  0x46   :  { %v3222_v9 = vld [vmem:[#allocation6 + $0x2a4] ss:$16 sps:$4 sm:$0xff]   ;;  %v3225_v11 = vld [vmem:[#allocation6 + $0x2a0] ss:$16 sps:$4 sm:$0xff]   ;;  %1773 = vmatprep.mubr.bf16.mxu1 %v3914_v55 }
  0x47   :  { %1701 = vmatpush1.bf16.msra.mxu0 %v3218_v6  ;;  %v3226_v12 = vld [vmem:[#allocation6 + $0x84] ss:$16 sps:$4 sm:$0xff]   ;;  %v3230_v14 = vld [vmem:[#allocation6 + $0x80] ss:$16 sps:$4 sm:$0xff]  }
  0x48   :  { %1744 = vmatpush1.bf16.msra.mxu1 %v3219_v7  ;;  %1702 = vmatprep.subr.bf16.mxu0 %v3220_v8  ;;  %v3228_v13 = vld [vmem:[#allocation6 + $0x284] ss:$16 sps:$4 sm:$0xff]   ;;  %v3231_v15 = vld [vmem:[#allocation6 + $0x280] ss:$16 sps:$4 sm:$0xff]  }
  0x49   :  { %1745 = vmatprep.subr.bf16.mxu1 %v3222_v9  ;;  %v3232_v16 = vld [vmem:[#allocation6 + $0x64] ss:$16 sps:$4 sm:$0xff]   ;;  %v3236_v18 = vld [vmem:[#allocation6 + $0x60] ss:$16 sps:$4 sm:$0xff]   ;;  %v3920_v9 = vcombine.low %v115_v50, %v119_v51 }
  0x4a   :  { %v3234_v17 = vld [vmem:[#allocation6 + $0x264] ss:$16 sps:$4 sm:$0xff]   ;;  %v3237_v19 = vld [vmem:[#allocation6 + $0x260] ss:$16 sps:$4 sm:$0xff]  }
  0x4b   :  { %1703 = vmatpush1.bf16.msra.mxu0 %v3224_v10  ;;  %v3238_v20 = vld [vmem:[#allocation6 + $0x44] ss:$16 sps:$4 sm:$0xff]   ;;  %v3242_v22 = vld [vmem:[#allocation6 + $0x40] ss:$16 sps:$4 sm:$0xff]  }
  0x4c   :  { %1746 = vmatpush1.bf16.msra.mxu1 %v3225_v11  ;;  %1704 = vmatprep.subr.bf16.mxu0 %v3226_v12  ;;  %v3240_v21 = vld [vmem:[#allocation6 + $0x244] ss:$16 sps:$4 sm:$0xff]   ;;  %v3243_v23 = vld [vmem:[#allocation6 + $0x240] ss:$16 sps:$4 sm:$0xff]  }
  0x4d   :  { %1747 = vmatprep.subr.bf16.mxu1 %v3228_v13  ;;  %v3244_v24 = vld [vmem:[#allocation6 + $0x24] ss:$16 sps:$4 sm:$0xff]   ;;  %v3248_v26 = vld [vmem:[#allocation6 + $0x20] ss:$16 sps:$4 sm:$0xff]  }
  0x4e   :  { %v3246_v25 = vld [vmem:[#allocation6 + $0x224] ss:$16 sps:$4 sm:$0xff]   ;;  %v3249_v27 = vld [vmem:[#allocation6 + $0x220] ss:$16 sps:$4 sm:$0xff]  }
  0x4f   :  { %1705 = vmatpush1.bf16.msra.mxu0 %v3230_v14  ;;  %v3250_v28 = vld [vmem:[#allocation6 + $0x4] ss:$16 sps:$4 sm:$0xff]   ;;  %v3254_v30 = vld [vmem:[#allocation6] ss:$16 sps:$4 sm:$0xff]  }
  0x50   :  { %1748 = vmatpush1.bf16.msra.mxu1 %v3231_v15  ;;  %1706 = vmatprep.subr.bf16.mxu0 %v3232_v16  ;;  %v3252_v29 = vld [vmem:[#allocation6 + $0x204] ss:$16 sps:$4 sm:$0xff]   ;;  %v3255_v31 = vld [vmem:[#allocation6 + $0x200] ss:$16 sps:$4 sm:$0xff]  }
  0x51   :  { %1749 = vmatprep.subr.bf16.mxu1 %v3234_v17  ;;  %v3256_v32 = vld [vmem:[#allocation6 + $0x1e4] ss:$16 sps:$4 sm:$0xff]   ;;  %v3260_v34 = vld [vmem:[#allocation6 + $0x1e0] ss:$16 sps:$4 sm:$0xff]  }
  0x52   :  { %v3258_v33 = vld [vmem:[#allocation6 + $0x3e4] ss:$16 sps:$4 sm:$0xff]   ;;  %v3261_v35 = vld [vmem:[#allocation6 + $0x3e0] ss:$16 sps:$4 sm:$0xff]  }
  0x53   :  { %1707 = vmatpush1.bf16.msra.mxu0 %v3236_v18  ;;  %v3262_v36 = vld [vmem:[#allocation6 + $0x1c4] ss:$16 sps:$4 sm:$0xff]   ;;  %v3266_v38 = vld [vmem:[#allocation6 + $0x1c0] ss:$16 sps:$4 sm:$0xff]  }
  0x54   :  { %1750 = vmatpush1.bf16.msra.mxu1 %v3237_v19  ;;  %1708 = vmatprep.subr.bf16.mxu0 %v3238_v20  ;;  %v3264_v37 = vld [vmem:[#allocation6 + $0x3c4] ss:$16 sps:$4 sm:$0xff]   ;;  %v3267_v39 = vld [vmem:[#allocation6 + $0x3c0] ss:$16 sps:$4 sm:$0xff]  }
  0x55   :  { %1751 = vmatprep.subr.bf16.mxu1 %v3240_v21  ;;  %v3268_v40 = vld [vmem:[#allocation6 + $0x1a4] ss:$16 sps:$4 sm:$0xff]   ;;  %v3272_v42 = vld [vmem:[#allocation6 + $0x1a0] ss:$16 sps:$4 sm:$0xff]  }
  0x56   :  { %v3270_v41 = vld [vmem:[#allocation6 + $0x3a4] ss:$16 sps:$4 sm:$0xff]   ;;  %v3273_v43 = vld [vmem:[#allocation6 + $0x3a0] ss:$16 sps:$4 sm:$0xff]  }
  0x57   :  { %1709 = vmatpush1.bf16.msra.mxu0 %v3242_v22  ;;  %v3274_v44 = vld [vmem:[#allocation6 + $0x184] ss:$16 sps:$4 sm:$0xff]   ;;  %v3278_v46 = vld [vmem:[#allocation6 + $0x180] ss:$16 sps:$4 sm:$0xff]  }
  0x58   :  { %1752 = vmatpush1.bf16.msra.mxu1 %v3243_v23  ;;  %1710 = vmatprep.subr.bf16.mxu0 %v3244_v24  ;;  %v3276_v45 = vld [vmem:[#allocation6 + $0x384] ss:$16 sps:$4 sm:$0xff]   ;;  %v3279_v47 = vld [vmem:[#allocation6 + $0x380] ss:$16 sps:$4 sm:$0xff]  }
  0x59   :  { %1753 = vmatprep.subr.bf16.mxu1 %v3246_v25  ;;  %v114_v48 = vld [vmem:[#allocation3] sm:$0xff] }
  0x5a   :  { %v118_v49 = vld [vmem:[#allocation3 + $0x20] sm:$0xff] }
  0x5b   :  { %1711 = vmatpush1.bf16.msra.mxu0 %v3248_v26  ;;  %v3280_v52 = vld [vmem:[#allocation6 + $0x164] ss:$16 sps:$4 sm:$0xff]   ;;  %v3912_v53 = vcombine.high %v114_v48, %v118_v49  ;;  %v3284_v56 = vld [vmem:[#allocation6 + $0x160] ss:$16 sps:$4 sm:$0xff]   ;;  %v3918_v8 = vcombine.low %v114_v48, %v118_v49 }
  0x5c   :  { %1754 = vmatpush1.bf16.msra.mxu1 %v3249_v27  ;;  %1712 = vmatprep.subr.bf16.mxu0 %v3250_v28  ;;  %v3282_v54 = vld [vmem:[#allocation6 + $0x364] ss:$16 sps:$4 sm:$0xff]   ;;  %v3285_v57 = vld [vmem:[#allocation6 + $0x360] ss:$16 sps:$4 sm:$0xff]  }
  0x5d   :  { %1755 = vmatprep.subr.bf16.mxu1 %v3252_v29  ;;  %1730 = vmatprep.mubr.bf16.mxu0 %v3912_v53  ;;  %v3286_v58 = vld [vmem:[#allocation6 + $0x144] ss:$16 sps:$4 sm:$0xff]   ;;  %v3290_v60 = vld [vmem:[#allocation6 + $0x140] ss:$16 sps:$4 sm:$0xff]  }
  0x5e   :  { %v3288_v59 = vld [vmem:[#allocation6 + $0x344] ss:$16 sps:$4 sm:$0xff]   ;;  %v3291_v61 = vld [vmem:[#allocation6 + $0x340] ss:$16 sps:$4 sm:$0xff]  }
  0x5f   :  { %1713 = vmatpush1.bf16.msra.mxu0 %v3254_v30  ;;  %v3292_v62 = vld [vmem:[#allocation6 + $0x124] ss:$16 sps:$4 sm:$0xff]   ;;  %v3296_v0 = vld [vmem:[#allocation6 + $0x120] ss:$16 sps:$4 sm:$0xff]  }
  0x60   :  { %1756 = vmatpush1.bf16.msra.mxu1 %v3255_v31  ;;  %1714 = vmatprep.subr.bf16.mxu0 %v3256_v32  ;;  %v3294_v63 = vld [vmem:[#allocation6 + $0x324] ss:$16 sps:$4 sm:$0xff]   ;;  %v3297_v1 = vld [vmem:[#allocation6 + $0x320] ss:$16 sps:$4 sm:$0xff]  }
  0x61   :  { %1757 = vmatprep.subr.bf16.mxu1 %v3258_v33  ;;  %v3298_v2 = vld [vmem:[#allocation6 + $0x104] ss:$16 sps:$4 sm:$0xff]   ;;  %v3302_v4 = vld [vmem:[#allocation6 + $0x100] ss:$16 sps:$4 sm:$0xff]  }
  0x62   :  { %v3300_v3 = vld [vmem:[#allocation6 + $0x304] ss:$16 sps:$4 sm:$0xff]   ;;  %v3303_v5 = vld [vmem:[#allocation6 + $0x300] ss:$16 sps:$4 sm:$0xff]  }
  0x63   :  { %1715 = vmatpush2.bf16.msra.mxu0 %v3260_v34  ;;  %v3306_v6 = vld [vmem:[#allocation6 + $0x4e4] ss:$16 sps:$4 sm:$0xff]   ;;  %v3304_v10 = vld [vmem:[#allocation6 + $0x4e0] ss:$16 sps:$4 sm:$0xff]  }
  0x64   :  { %1758 = vmatpush2.bf16.msra.mxu1 %v3261_v35  ;;  %1716 = vmatprep.subr.bf16.mxu0 %v3262_v36  ;;  %v3309_v7 = vld [vmem:[#allocation6 + $0x6e4] ss:$16 sps:$4 sm:$0xff]   ;;  %v3307_v11 = vld [vmem:[#allocation6 + $0x6e0] ss:$16 sps:$4 sm:$0xff]  }
  0x65   :  { %1759 = vmatprep.subr.bf16.mxu1 %v3264_v37  ;;  %v3312_v12 = vld [vmem:[#allocation6 + $0x4c4] ss:$16 sps:$4 sm:$0xff]   ;;  %v3310_v14 = vld [vmem:[#allocation6 + $0x4c0] ss:$16 sps:$4 sm:$0xff]  }
  0x66   :  { %v3315_v13 = vld [vmem:[#allocation6 + $0x6c4] ss:$16 sps:$4 sm:$0xff]   ;;  %v3313_v15 = vld [vmem:[#allocation6 + $0x6c0] ss:$16 sps:$4 sm:$0xff]  }
  0x67   :  { %1717 = vmatpush2.bf16.msra.mxu0 %v3266_v38  ;;  %v3318_v16 = vld [vmem:[#allocation6 + $0x4a4] ss:$16 sps:$4 sm:$0xff]   ;;  %v3316_v18 = vld [vmem:[#allocation6 + $0x4a0] ss:$16 sps:$4 sm:$0xff]   ;;  %v3928_v38 = vld [vmem:[#allocation3 + $0x18] sm:$0xff] }
  0x68   :  { %1760 = vmatpush2.bf16.msra.mxu1 %v3267_v39  ;;  %1718 = vmatprep.subr.bf16.mxu0 %v3268_v40  ;;  %v3321_v17 = vld [vmem:[#allocation6 + $0x6a4] ss:$16 sps:$4 sm:$0xff]   ;;  %v3319_v19 = vld [vmem:[#allocation6 + $0x6a0] ss:$16 sps:$4 sm:$0xff]   ;;  %v3930_v39 = vld [vmem:[#allocation3 + $0x38] sm:$0xff] }
  0x69   :  { %1761 = vmatprep.subr.bf16.mxu1 %v3270_v41  ;;  %v3324_v20 = vld [vmem:[#allocation6 + $0x484] ss:$16 sps:$4 sm:$0xff]   ;;  %v3322_v22 = vld [vmem:[#allocation6 + $0x480] ss:$16 sps:$4 sm:$0xff]  }
  0x6a   :  { %v3327_v21 = vld [vmem:[#allocation6 + $0x684] ss:$16 sps:$4 sm:$0xff]   ;;  %v3325_v23 = vld [vmem:[#allocation6 + $0x680] ss:$16 sps:$4 sm:$0xff]  }
  0x6b   :  { %1719 = vmatpush2.bf16.msra.mxu0 %v3272_v42  ;;  %v3330_v24 = vld [vmem:[#allocation6 + $0x464] ss:$16 sps:$4 sm:$0xff]   ;;  %v3328_v26 = vld [vmem:[#allocation6 + $0x460] ss:$16 sps:$4 sm:$0xff]  }
  0x6c   :  { %1762 = vmatpush2.bf16.msra.mxu1 %v3273_v43  ;;  %1720 = vmatprep.subr.bf16.mxu0 %v3274_v44  ;;  %v3333_v25 = vld [vmem:[#allocation6 + $0x664] ss:$16 sps:$4 sm:$0xff]   ;;  %v3331_v27 = vld [vmem:[#allocation6 + $0x660] ss:$16 sps:$4 sm:$0xff]   ;;  %v3938_v43 = vcombine.high %v3928_v38, %v3930_v39 }
  0x6d   :  { %1763 = vmatprep.subr.bf16.mxu1 %v3276_v45  ;;  %v3336_v28 = vld [vmem:[#allocation6 + $0x444] ss:$16 sps:$4 sm:$0xff]   ;;  %v3334_v30 = vld [vmem:[#allocation6 + $0x440] ss:$16 sps:$4 sm:$0xff]  }
  0x6e   :  { %v3339_v29 = vld [vmem:[#allocation6 + $0x644] ss:$16 sps:$4 sm:$0xff]   ;;  %v3337_v31 = vld [vmem:[#allocation6 + $0x640] ss:$16 sps:$4 sm:$0xff]  }
  0x6f   :  { %1721 = vmatpush2.bf16.msra.mxu0 %v3278_v46  ;;  %v3342_v32 = vld [vmem:[#allocation6 + $0x424] ss:$16 sps:$4 sm:$0xff]   ;;  %v3340_v34 = vld [vmem:[#allocation6 + $0x420] ss:$16 sps:$4 sm:$0xff]  }
  0x70   :  { %1764 = vmatpush2.bf16.msra.mxu1 %v3279_v47  ;;  %1722 = vmatprep.subr.bf16.mxu0 %v3280_v52  ;;  %v3345_v33 = vld [vmem:[#allocation6 + $0x624] ss:$16 sps:$4 sm:$0xff]   ;;  %v3343_v35 = vld [vmem:[#allocation6 + $0x620] ss:$16 sps:$4 sm:$0xff]  }
  0x71   :  { %1765 = vmatprep.subr.bf16.mxu1 %v3282_v54  ;;  %v3924_v36 = vld [vmem:[#allocation3 + $0x10] sm:$0xff] }
  0x72   :  { %v3926_v37 = vld [vmem:[#allocation3 + $0x30] sm:$0xff] }
  0x73   :  { %1723 = vmatpush2.bf16.msra.mxu0 %v3284_v56  ;;  %v3348_v40 = vld [vmem:[#allocation6 + $0x404] ss:$16 sps:$4 sm:$0xff]   ;;  %v3934_v41 = vcombine.high %v3924_v36, %v3926_v37  ;;  %v3346_v44 = vld [vmem:[#allocation6 + $0x400] ss:$16 sps:$4 sm:$0xff]  }
  0x74   :  { %1766 = vmatpush2.bf16.msra.mxu1 %v3285_v57  ;;  %1724 = vmatprep.subr.bf16.mxu0 %v3286_v58  ;;  %v3351_v42 = vld [vmem:[#allocation6 + $0x604] ss:$16 sps:$4 sm:$0xff]   ;;  %v3349_v45 = vld [vmem:[#allocation6 + $0x600] ss:$16 sps:$4 sm:$0xff]  }
  0x75   :  { %1767 = vmatprep.subr.bf16.mxu1 %v3288_v59  ;;  %v3354_v46 = vld [vmem:[#allocation6 + $0x5e4] ss:$16 sps:$4 sm:$0xff]   ;;  %v3352_v48 = vld [vmem:[#allocation6 + $0x5e0] ss:$16 sps:$4 sm:$0xff]  }
  0x76   :  { %v3357_v47 = vld [vmem:[#allocation6 + $0x7e4] ss:$16 sps:$4 sm:$0xff]   ;;  %v3355_v49 = vld [vmem:[#allocation6 + $0x7e0] ss:$16 sps:$4 sm:$0xff]  }
  0x77   :  { %1725 = vmatpush2.bf16.msra.mxu0 %v3290_v60  ;;  %v3360_v50 = vld [vmem:[#allocation6 + $0x5c4] ss:$16 sps:$4 sm:$0xff]   ;;  %v3358_v52 = vld [vmem:[#allocation6 + $0x5c0] ss:$16 sps:$4 sm:$0xff]  }
  0x78   :  { %1768 = vmatpush2.bf16.msra.mxu1 %v3291_v61  ;;  %1726 = vmatprep.subr.bf16.mxu0 %v3292_v62  ;;  %v3363_v51 = vld [vmem:[#allocation6 + $0x7c4] ss:$16 sps:$4 sm:$0xff]   ;;  %v3361_v54 = vld [vmem:[#allocation6 + $0x7c0] ss:$16 sps:$4 sm:$0xff]  }
  0x79   :  { %1769 = vmatprep.subr.bf16.mxu1 %v3294_v63  ;;  %v3366_v56 = vld [vmem:[#allocation6 + $0x5a4] ss:$16 sps:$4 sm:$0xff]   ;;  %v3364_v58 = vld [vmem:[#allocation6 + $0x5a0] ss:$16 sps:$4 sm:$0xff]  }
  0x7a   :  { %v3369_v57 = vld [vmem:[#allocation6 + $0x7a4] ss:$16 sps:$4 sm:$0xff]   ;;  %v3367_v59 = vld [vmem:[#allocation6 + $0x7a0] ss:$16 sps:$4 sm:$0xff]  }
  0x7b   :  { %1727 = vmatpush2.bf16.msra.mxu0 %v3296_v0  ;;  %v3372_v60 = vld [vmem:[#allocation6 + $0x584] ss:$16 sps:$4 sm:$0xff]   ;;  %v3370_v62 = vld [vmem:[#allocation6 + $0x580] ss:$16 sps:$4 sm:$0xff]  }
  0x7c   :  { %1770 = vmatpush2.bf16.msra.mxu1 %v3297_v1  ;;  %1728 = vmatprep.subr.bf16.mxu0 %v3298_v2  ;;  %v3375_v61 = vld [vmem:[#allocation6 + $0x784] ss:$16 sps:$4 sm:$0xff]   ;;  %v3373_v63 = vld [vmem:[#allocation6 + $0x780] ss:$16 sps:$4 sm:$0xff]  }
  0x7d   :  { %1771 = vmatprep.subr.bf16.mxu1 %v3300_v3  ;;  %v3378_v0 = vld [vmem:[#allocation6 + $0x564] ss:$16 sps:$4 sm:$0xff]   ;;  %v3376_v2 = vld [vmem:[#allocation6 + $0x560] ss:$16 sps:$4 sm:$0xff]  }
  0x7e   :  { %v3381_v1 = vld [vmem:[#allocation6 + $0x764] ss:$16 sps:$4 sm:$0xff]   ;;  %v3379_v3 = vld [vmem:[#allocation6 + $0x760] ss:$16 sps:$4 sm:$0xff]  }
  0x7f   :  { %1729 = vmatpush2.bf16.msra.mxu0 %v3302_v4  ;;  %v3384_v4 = vld [vmem:[#allocation6 + $0x544] ss:$16 sps:$4 sm:$0xff]  }
  0x80   :  { %1772 = vmatpush2.bf16.msra.mxu1 %v3303_v5  ;;  %1784 = vmatprep.subr.bf16.mxu0 %v3306_v6  ;;  %v3387_v5 = vld [vmem:[#allocation6 + $0x744] ss:$16 sps:$4 sm:$0xff]   ;;  %v3382_v6 = vld [vmem:[#allocation6 + $0x540] ss:$16 sps:$4 sm:$0xff]  }
  0x81   :  { %1827 = vmatprep.subr.bf16.mxu1 %v3309_v7  ;;  %v3385_v7 = vld [vmem:[#allocation6 + $0x740] ss:$16 sps:$4 sm:$0xff]  }
  0x82   :  { %1731 = vmatmul.mubr.bf16.vlgmr.msra.gmra.mxu0 %v3918_v8 }
  0x83   :  { %1774 = vmatmul.mubr.bf16.vlgmr.msra.gmra.mxu1 %v3920_v9  ;;  %1785 = vmatpush1.bf16.msra.mxu0 %v3304_v10  ;;  %v3390_v10 = vld [vmem:[#allocation6 + $0x524] ss:$16 sps:$4 sm:$0xff]  }
  0x84   :  { %1828 = vmatpush1.bf16.msra.mxu1 %v3307_v11  ;;  %1786 = vmatprep.subr.bf16.mxu0 %v3312_v12  ;;  %v3393_v11 = vld [vmem:[#allocation6 + $0x724] ss:$16 sps:$4 sm:$0xff]   ;;  %v3388_v12 = vld [vmem:[#allocation6 + $0x520] ss:$16 sps:$4 sm:$0xff]  }
  0x85   :  { %1829 = vmatprep.subr.bf16.mxu1 %v3315_v13  ;;  %1816 = vmatprep.mubr.bf16.mxu0 %v3934_v41  ;;  %v3391_v13 = vld [vmem:[#allocation6 + $0x720] ss:$16 sps:$4 sm:$0xff]  }
  0x86   :  { %1859 = vmatprep.mubr.bf16.mxu1 %v3938_v43 }
  0x87   :  { %1787 = vmatpush1.bf16.msra.mxu0 %v3310_v14  ;;  %v3396_v14 = vld [vmem:[#allocation6 + $0x504] ss:$16 sps:$4 sm:$0xff]  }
  0x88   :  { %1830 = vmatpush1.bf16.msra.mxu1 %v3313_v15  ;;  %1788 = vmatprep.subr.bf16.mxu0 %v3318_v16  ;;  %v3399_v15 = vld [vmem:[#allocation6 + $0x704] ss:$16 sps:$4 sm:$0xff]   ;;  %v3394_v16 = vld [vmem:[#allocation6 + $0x500] ss:$16 sps:$4 sm:$0xff]  }
  0x89   :  { %1831 = vmatprep.subr.bf16.mxu1 %v3321_v17  ;;  %v3397_v17 = vld [vmem:[#allocation6 + $0x700] ss:$16 sps:$4 sm:$0xff]  }
  0x8b   :  { %1789 = vmatpush1.bf16.msra.mxu0 %v3316_v18  ;;  %v3402_v18 = vld [vmem:[#allocation6 + $0xec] ss:$16 sps:$4 sm:$0xff]  }
  0x8c   :  { %1832 = vmatpush1.bf16.msra.mxu1 %v3319_v19  ;;  %1790 = vmatprep.subr.bf16.mxu0 %v3324_v20  ;;  %v3405_v19 = vld [vmem:[#allocation6 + $0x2ec] ss:$16 sps:$4 sm:$0xff]   ;;  %v3944_v20 = vcombine.low %v3924_v36, %v3926_v37 }
  0x8d   :  { %1833 = vmatprep.subr.bf16.mxu1 %v3327_v21  ;;  %v3948_v21 = vcombine.low %v3928_v38, %v3930_v39  ;;  %v3426_v36 = vld [vmem:[#allocation6 + $0x6c] ss:$16 sps:$4 sm:$0xff]   ;;  %v3424_v38 = vld [vmem:[#allocation6 + $0x68] ss:$16 sps:$4 sm:$0xff]  }
  0x8e   :  { %v3429_v37 = vld [vmem:[#allocation6 + $0x26c] ss:$16 sps:$4 sm:$0xff]  }
  0x8f   :  { %1791 = vmatpush1.bf16.msra.mxu0 %v3322_v22  ;;  %v3400_v22 = vld [vmem:[#allocation6 + $0xe8] ss:$16 sps:$4 sm:$0xff]   ;;  %v3435_v39 = vld [vmem:[#allocation6 + $0x24c] ss:$16 sps:$4 sm:$0xff]  }
  0x90   :  { %1834 = vmatpush1.bf16.msra.mxu1 %v3325_v23  ;;  %1792 = vmatprep.subr.bf16.mxu0 %v3330_v24  ;;  %v3403_v23 = vld [vmem:[#allocation6 + $0x2e8] ss:$16 sps:$4 sm:$0xff]   ;;  %v3408_v24 = vld [vmem:[#allocation6 + $0xcc] ss:$16 sps:$4 sm:$0xff]  }
  0x91   :  { %1835 = vmatprep.subr.bf16.mxu1 %v3333_v25  ;;  %v3411_v25 = vld [vmem:[#allocation6 + $0x2cc] ss:$16 sps:$4 sm:$0xff]  }
  0x93   :  { %1793 = vmatpush1.bf16.msra.mxu0 %v3328_v26  ;;  %v3406_v26 = vld [vmem:[#allocation6 + $0xc8] ss:$16 sps:$4 sm:$0xff]  }
  0x94   :  { %1836 = vmatpush1.bf16.msra.mxu1 %v3331_v27  ;;  %1794 = vmatprep.subr.bf16.mxu0 %v3336_v28  ;;  %v3409_v27 = vld [vmem:[#allocation6 + $0x2c8] ss:$16 sps:$4 sm:$0xff]   ;;  %v3414_v28 = vld [vmem:[#allocation6 + $0xac] ss:$16 sps:$4 sm:$0xff]  }
  0x95   :  { %1837 = vmatprep.subr.bf16.mxu1 %v3339_v29  ;;  %v3417_v29 = vld [vmem:[#allocation6 + $0x2ac] ss:$16 sps:$4 sm:$0xff]  }
  0x97   :  { %1795 = vmatpush1.bf16.msra.mxu0 %v3334_v30  ;;  %v3412_v30 = vld [vmem:[#allocation6 + $0xa8] ss:$16 sps:$4 sm:$0xff]  }
  0x98   :  { %1838 = vmatpush1.bf16.msra.mxu1 %v3337_v31  ;;  %1796 = vmatprep.subr.bf16.mxu0 %v3342_v32  ;;  %v3415_v31 = vld [vmem:[#allocation6 + $0x2a8] ss:$16 sps:$4 sm:$0xff]   ;;  %v3420_v32 = vld [vmem:[#allocation6 + $0x8c] ss:$16 sps:$4 sm:$0xff]  }
  0x99   :  { %1839 = vmatprep.subr.bf16.mxu1 %v3345_v33  ;;  %v3423_v33 = vld [vmem:[#allocation6 + $0x28c] ss:$16 sps:$4 sm:$0xff]  }
  0x9b   :  { %1797 = vmatpush1.bf16.msra.mxu0 %v3340_v34  ;;  %v3418_v34 = vld [vmem:[#allocation6 + $0x88] ss:$16 sps:$4 sm:$0xff]  }
  0x9c   :  { %1840 = vmatpush1.bf16.msra.mxu1 %v3343_v35  ;;  %1798 = vmatprep.subr.bf16.mxu0 %v3348_v40  ;;  %v3421_v35 = vld [vmem:[#allocation6 + $0x288] ss:$16 sps:$4 sm:$0xff]  }
  0x9d   :  { %1841 = vmatprep.subr.bf16.mxu1 %v3351_v42  ;;  %v3430_v40 = vld [vmem:[#allocation6 + $0x48] ss:$16 sps:$4 sm:$0xff]  }
  0x9e   :  { %v3433_v42 = vld [vmem:[#allocation6 + $0x248] ss:$16 sps:$4 sm:$0xff]  }
  0x9f   :  { %1799 = vmatpush1.bf16.msra.mxu0 %v3346_v44  ;;  %v3438_v44 = vld [vmem:[#allocation6 + $0x2c] ss:$16 sps:$4 sm:$0xff]  }
  0xa0   :  { %1842 = vmatpush1.bf16.msra.mxu1 %v3349_v45  ;;  %1800 = vmatprep.subr.bf16.mxu0 %v3354_v46  ;;  %v3441_v45 = vld [vmem:[#allocation6 + $0x22c] ss:$16 sps:$4 sm:$0xff]   ;;  %v3436_v46 = vld [vmem:[#allocation6 + $0x28] ss:$16 sps:$4 sm:$0xff]  }
  0xa1   :  { %1843 = vmatprep.subr.bf16.mxu1 %v3357_v47  ;;  %v3439_v47 = vld [vmem:[#allocation6 + $0x228] ss:$16 sps:$4 sm:$0xff]  }
  0xa3   :  { %1801 = vmatpush2.bf16.msra.mxu0 %v3352_v48  ;;  %v3444_v48 = vld [vmem:[#allocation6 + $0xc] ss:$16 sps:$4 sm:$0xff]  }
  0xa4   :  { %1844 = vmatpush2.bf16.msra.mxu1 %v3355_v49  ;;  %1802 = vmatprep.subr.bf16.mxu0 %v3360_v50  ;;  %v3447_v49 = vld [vmem:[#allocation6 + $0x20c] ss:$16 sps:$4 sm:$0xff]   ;;  %v3442_v50 = vld [vmem:[#allocation6 + $0x8] ss:$16 sps:$4 sm:$0xff]  }
  0xa5   :  { %1845 = vmatprep.subr.bf16.mxu1 %v3363_v51  ;;  %v3445_v51 = vld [vmem:[#allocation6 + $0x208] ss:$16 sps:$4 sm:$0xff]  }
  0xa7   :  { %1803 = vmatpush2.bf16.msra.mxu0 %v3358_v52  ;;  %v3450_v52 = vld [vmem:[#allocation6 + $0x1ec] ss:$16 sps:$4 sm:$0xff]  }
  0xa8   :  { %1846 = vmatpush2.bf16.msra.mxu1 %v3361_v54  ;;  %1804 = vmatprep.subr.bf16.mxu0 %v3366_v56  ;;  %v3453_v54 = vld [vmem:[#allocation6 + $0x3ec] ss:$16 sps:$4 sm:$0xff]   ;;  %v3448_v56 = vld [vmem:[#allocation6 + $0x1e8] ss:$16 sps:$4 sm:$0xff]  }
  0xa9   :  { %1847 = vmatprep.subr.bf16.mxu1 %v3369_v57  ;;  %v3451_v57 = vld [vmem:[#allocation6 + $0x3e8] ss:$16 sps:$4 sm:$0xff]  }
  0xab   :  { %1805 = vmatpush2.bf16.msra.mxu0 %v3364_v58  ;;  %v3456_v58 = vld [vmem:[#allocation6 + $0x1cc] ss:$16 sps:$4 sm:$0xff]  }
  0xac   :  { %1848 = vmatpush2.bf16.msra.mxu1 %v3367_v59  ;;  %1806 = vmatprep.subr.bf16.mxu0 %v3372_v60  ;;  %v3459_v59 = vld [vmem:[#allocation6 + $0x3cc] ss:$16 sps:$4 sm:$0xff]   ;;  %v3454_v60 = vld [vmem:[#allocation6 + $0x1c8] ss:$16 sps:$4 sm:$0xff]  }
  0xad   :  { %1849 = vmatprep.subr.bf16.mxu1 %v3375_v61  ;;  %v3457_v61 = vld [vmem:[#allocation6 + $0x3c8] ss:$16 sps:$4 sm:$0xff]  }
  0xaf   :  { %1807 = vmatpush2.bf16.msra.mxu0 %v3370_v62  ;;  %v3462_v62 = vld [vmem:[#allocation6 + $0x1ac] ss:$16 sps:$4 sm:$0xff]  }
  0xb0   :  { %1850 = vmatpush2.bf16.msra.mxu1 %v3373_v63  ;;  %1808 = vmatprep.subr.bf16.mxu0 %v3378_v0  ;;  %v3465_v63 = vld [vmem:[#allocation6 + $0x3ac] ss:$16 sps:$4 sm:$0xff]   ;;  %v3460_v0 = vld [vmem:[#allocation6 + $0x1a8] ss:$16 sps:$4 sm:$0xff]  }
  0xb1   :  { %1851 = vmatprep.subr.bf16.mxu1 %v3381_v1  ;;  %v3463_v1 = vld [vmem:[#allocation6 + $0x3a8] ss:$16 sps:$4 sm:$0xff]  }
  0xb3   :  { %1809 = vmatpush2.bf16.msra.mxu0 %v3376_v2  ;;  %v3468_v2 = vld [vmem:[#allocation6 + $0x18c] ss:$16 sps:$4 sm:$0xff]  }
  0xb4   :  { %1852 = vmatpush2.bf16.msra.mxu1 %v3379_v3  ;;  %1810 = vmatprep.subr.bf16.mxu0 %v3384_v4  ;;  %v3471_v3 = vld [vmem:[#allocation6 + $0x38c] ss:$16 sps:$4 sm:$0xff]   ;;  %v3466_v4 = vld [vmem:[#allocation6 + $0x188] ss:$16 sps:$4 sm:$0xff]  }
  0xb5   :  { %1853 = vmatprep.subr.bf16.mxu1 %v3387_v5  ;;  %v3469_v5 = vld [vmem:[#allocation6 + $0x388] ss:$16 sps:$4 sm:$0xff]  }
  0xb7   :  { %1811 = vmatpush2.bf16.msra.mxu0 %v3382_v6  ;;  %v3474_v6 = vld [vmem:[#allocation6 + $0x16c] ss:$16 sps:$4 sm:$0xff]  }
  0xb8   :  { %1854 = vmatpush2.bf16.msra.mxu1 %v3385_v7  ;;  %1812 = vmatprep.subr.bf16.mxu0 %v3390_v10  ;;  %v3477_v7 = vld [vmem:[#allocation6 + $0x36c] ss:$16 sps:$4 sm:$0xff]   ;;  %v3472_v10 = vld [vmem:[#allocation6 + $0x168] ss:$16 sps:$4 sm:$0xff]  }
  0xb9   :  { %1855 = vmatprep.subr.bf16.mxu1 %v3393_v11  ;;  %v3475_v11 = vld [vmem:[#allocation6 + $0x368] ss:$16 sps:$4 sm:$0xff]  }
  0xbb   :  { %1813 = vmatpush2.bf16.msra.mxu0 %v3388_v12  ;;  %v3480_v12 = vld [vmem:[#allocation6 + $0x14c] ss:$16 sps:$4 sm:$0xff]  }
  0xbc   :  { %1856 = vmatpush2.bf16.msra.mxu1 %v3391_v13  ;;  %1814 = vmatprep.subr.bf16.mxu0 %v3396_v14  ;;  %v3483_v13 = vld [vmem:[#allocation6 + $0x34c] ss:$16 sps:$4 sm:$0xff]   ;;  %v3478_v14 = vld [vmem:[#allocation6 + $0x148] ss:$16 sps:$4 sm:$0xff]  }
  0xbd   :  { %1857 = vmatprep.subr.bf16.mxu1 %v3399_v15  ;;  %v3481_v15 = vld [vmem:[#allocation6 + $0x348] ss:$16 sps:$4 sm:$0xff]  }
  0xbf   :  { %1815 = vmatpush2.bf16.msra.mxu0 %v3394_v16  ;;  %v3486_v16 = vld [vmem:[#allocation6 + $0x12c] ss:$16 sps:$4 sm:$0xff]  }
  0xc0   :  { %1858 = vmatpush2.bf16.msra.mxu1 %v3397_v17  ;;  %1870 = vmatprep.subr.bf16.mxu0 %v3402_v18  ;;  %v3489_v17 = vld [vmem:[#allocation6 + $0x32c] ss:$16 sps:$4 sm:$0xff]   ;;  %v3484_v18 = vld [vmem:[#allocation6 + $0x128] ss:$16 sps:$4 sm:$0xff]  }
  0xc1   :  { %1913 = vmatprep.subr.bf16.mxu1 %v3405_v19  ;;  %v3487_v19 = vld [vmem:[#allocation6 + $0x328] ss:$16 sps:$4 sm:$0xff]  }
  0xc2   :  { %1817 = vmatmul.mubr.bf16.vlgmr.msra.gmra.mxu0 %v3944_v20 }
  0xc3   :  { %1860 = vmatmul.mubr.bf16.vlgmr.msra.gmra.mxu1 %v3948_v21  ;;  %1871 = vmatpush1.bf16.msra.mxu0 %v3400_v22  ;;  %v3492_v22 = vld [vmem:[#allocation6 + $0x10c] ss:$16 sps:$4 sm:$0xff]  }
  0xc4   :  { %1914 = vmatpush1.bf16.msra.mxu1 %v3403_v23  ;;  %1872 = vmatprep.subr.bf16.mxu0 %v3408_v24  ;;  %v3495_v23 = vld [vmem:[#allocation6 + $0x30c] ss:$16 sps:$4 sm:$0xff]   ;;  %v3490_v24 = vld [vmem:[#allocation6 + $0x108] ss:$16 sps:$4 sm:$0xff]  }
  0xc5   :  { %1915 = vmatprep.subr.bf16.mxu1 %v3411_v25  ;;  %1902 = vmatprep.mubr.bf16.mxu0 %v3912_v53  ;;  %v3427_v53 = vld [vmem:[#allocation6 + $0x268] ss:$16 sps:$4 sm:$0xff]  }
  0xc6   :  { %1945 = vmatprep.mubr.bf16.mxu1 %v3914_v55  ;;  %v3432_v55 = vld [vmem:[#allocation6 + $0x4c] ss:$16 sps:$4 sm:$0xff]   ;;  %v3493_v25 = vld [vmem:[#allocation6 + $0x308] ss:$16 sps:$4 sm:$0xff]  }
  0xc7   :  { %1873 = vmatpush1.bf16.msra.mxu0 %v3406_v26  ;;  %v3498_v26 = vld [vmem:[#allocation6 + $0x4ec] ss:$16 sps:$4 sm:$0xff]  }
  0xc8   :  { %1916 = vmatpush1.bf16.msra.mxu1 %v3409_v27  ;;  %1874 = vmatprep.subr.bf16.mxu0 %v3414_v28  ;;  %v3501_v27 = vld [vmem:[#allocation6 + $0x6ec] ss:$16 sps:$4 sm:$0xff]   ;;  %v3496_v28 = vld [vmem:[#allocation6 + $0x4e8] ss:$16 sps:$4 sm:$0xff]  }
  0xc9   :  { %1917 = vmatprep.subr.bf16.mxu1 %v3417_v29  ;;  %v3499_v29 = vld [vmem:[#allocation6 + $0x6e8] ss:$16 sps:$4 sm:$0xff]  }
  0xcb   :  { %1875 = vmatpush1.bf16.msra.mxu0 %v3412_v30  ;;  %v3504_v30 = vld [vmem:[#allocation6 + $0x4cc] ss:$16 sps:$4 sm:$0xff]  }
  0xcc   :  { %1918 = vmatpush1.bf16.msra.mxu1 %v3415_v31  ;;  %1876 = vmatprep.subr.bf16.mxu0 %v3420_v32  ;;  %v3507_v31 = vld [vmem:[#allocation6 + $0x6cc] ss:$16 sps:$4 sm:$0xff]   ;;  %v3502_v32 = vld [vmem:[#allocation6 + $0x4c8] ss:$16 sps:$4 sm:$0xff]  }
  0xcd   :  { %1919 = vmatprep.subr.bf16.mxu1 %v3423_v33  ;;  %v3505_v33 = vld [vmem:[#allocation6 + $0x6c8] ss:$16 sps:$4 sm:$0xff]  }
  0xcf   :  { %1877 = vmatpush1.bf16.msra.mxu0 %v3418_v34  ;;  %v3510_v34 = vld [vmem:[#allocation6 + $0x4ac] ss:$16 sps:$4 sm:$0xff]  }
  0xd0   :  { %1920 = vmatpush1.bf16.msra.mxu1 %v3421_v35  ;;  %1878 = vmatprep.subr.bf16.mxu0 %v3426_v36  ;;  %v3513_v35 = vld [vmem:[#allocation6 + $0x6ac] ss:$16 sps:$4 sm:$0xff]   ;;  %v3508_v36 = vld [vmem:[#allocation6 + $0x4a8] ss:$16 sps:$4 sm:$0xff]  }
  0xd1   :  { %1921 = vmatprep.subr.bf16.mxu1 %v3429_v37  ;;  %v3511_v37 = vld [vmem:[#allocation6 + $0x6a8] ss:$16 sps:$4 sm:$0xff]  }
  0xd3   :  { %1879 = vmatpush1.bf16.msra.mxu0 %v3424_v38  ;;  %v3516_v38 = vld [vmem:[#allocation6 + $0x48c] ss:$16 sps:$4 sm:$0xff]  }
  0xd4   :  { %1922 = vmatpush1.bf16.msra.mxu1 %v3427_v53  ;;  %1880 = vmatprep.subr.bf16.mxu0 %v3432_v55  ;;  %v3519_v53 = vld [vmem:[#allocation6 + $0x68c] ss:$16 sps:$4 sm:$0xff]  }
  0xd5   :  { %1923 = vmatprep.subr.bf16.mxu1 %v3435_v39  ;;  %v3522_v55 = vld [vmem:[#allocation6 + $0x46c] ss:$16 sps:$4 sm:$0xff]  }
  0xd6   :  { %v3525_v39 = vld [vmem:[#allocation6 + $0x66c] ss:$16 sps:$4 sm:$0xff]  }
  0xd7   :  { %1881 = vmatpush1.bf16.msra.mxu0 %v3430_v40  ;;  %v3520_v40 = vld [vmem:[#allocation6 + $0x468] ss:$16 sps:$4 sm:$0xff]  }
  0xd8   :  { %1924 = vmatpush1.bf16.msra.mxu1 %v3433_v42  ;;  %1882 = vmatprep.subr.bf16.mxu0 %v3438_v44  ;;  %v3523_v42 = vld [vmem:[#allocation6 + $0x668] ss:$16 sps:$4 sm:$0xff]   ;;  %v3528_v44 = vld [vmem:[#allocation6 + $0x44c] ss:$16 sps:$4 sm:$0xff]  }
  0xd9   :  { %1925 = vmatprep.subr.bf16.mxu1 %v3441_v45  ;;  %v3529_v45 = vld [vmem:[#allocation6 + $0x648] ss:$16 sps:$4 sm:$0xff]  }
  0xdb   :  { %1883 = vmatpush1.bf16.msra.mxu0 %v3436_v46  ;;  %v3534_v46 = vld [vmem:[#allocation6 + $0x42c] ss:$16 sps:$4 sm:$0xff]  }
  0xdc   :  { %1926 = vmatpush1.bf16.msra.mxu1 %v3439_v47  ;;  %1884 = vmatprep.subr.bf16.mxu0 %v3444_v48  ;;  %v3537_v47 = vld [vmem:[#allocation6 + $0x62c] ss:$16 sps:$4 sm:$0xff]   ;;  %v3532_v48 = vld [vmem:[#allocation6 + $0x428] ss:$16 sps:$4 sm:$0xff]  }
  0xdd   :  { %1927 = vmatprep.subr.bf16.mxu1 %v3447_v49  ;;  %v3535_v49 = vld [vmem:[#allocation6 + $0x628] ss:$16 sps:$4 sm:$0xff]  }
  0xdf   :  { %1885 = vmatpush1.bf16.msra.mxu0 %v3442_v50  ;;  %v3540_v50 = vld [vmem:[#allocation6 + $0x40c] ss:$16 sps:$4 sm:$0xff]  }
  0xe0   :  { %1928 = vmatpush1.bf16.msra.mxu1 %v3445_v51  ;;  %1886 = vmatprep.subr.bf16.mxu0 %v3450_v52  ;;  %v3543_v51 = vld [vmem:[#allocation6 + $0x60c] ss:$16 sps:$4 sm:$0xff]   ;;  %v3538_v52 = vld [vmem:[#allocation6 + $0x408] ss:$16 sps:$4 sm:$0xff]  }
  0xe1   :  { %1929 = vmatprep.subr.bf16.mxu1 %v3453_v54  ;;  %v3541_v54 = vld [vmem:[#allocation6 + $0x608] ss:$16 sps:$4 sm:$0xff]  }
  0xe3   :  { %1887 = vmatpush2.bf16.msra.mxu0 %v3448_v56  ;;  %v3546_v56 = vld [vmem:[#allocation6 + $0x5ec] ss:$16 sps:$4 sm:$0xff]  }
  0xe4   :  { %1930 = vmatpush2.bf16.msra.mxu1 %v3451_v57  ;;  %1888 = vmatprep.subr.bf16.mxu0 %v3456_v58  ;;  %v3549_v57 = vld [vmem:[#allocation6 + $0x7ec] ss:$16 sps:$4 sm:$0xff]   ;;  %v3544_v58 = vld [vmem:[#allocation6 + $0x5e8] ss:$16 sps:$4 sm:$0xff]  }
  0xe5   :  { %1931 = vmatprep.subr.bf16.mxu1 %v3459_v59  ;;  %v3547_v59 = vld [vmem:[#allocation6 + $0x7e8] ss:$16 sps:$4 sm:$0xff]  }
  0xe7   :  { %1889 = vmatpush2.bf16.msra.mxu0 %v3454_v60  ;;  %v3552_v60 = vld [vmem:[#allocation6 + $0x5cc] ss:$16 sps:$4 sm:$0xff]  }
  0xe8   :  { %1932 = vmatpush2.bf16.msra.mxu1 %v3457_v61  ;;  %1890 = vmatprep.subr.bf16.mxu0 %v3462_v62  ;;  %v3555_v61 = vld [vmem:[#allocation6 + $0x7cc] ss:$16 sps:$4 sm:$0xff]   ;;  %v3550_v62 = vld [vmem:[#allocation6 + $0x5c8] ss:$16 sps:$4 sm:$0xff]  }
  0xe9   :  { %1933 = vmatprep.subr.bf16.mxu1 %v3465_v63  ;;  %v3553_v63 = vld [vmem:[#allocation6 + $0x7c8] ss:$16 sps:$4 sm:$0xff]  }
  0xeb   :  { %1891 = vmatpush2.bf16.msra.mxu0 %v3460_v0  ;;  %v3558_v0 = vld [vmem:[#allocation6 + $0x5ac] ss:$16 sps:$4 sm:$0xff]  }
  0xec   :  { %1934 = vmatpush2.bf16.msra.mxu1 %v3463_v1  ;;  %1892 = vmatprep.subr.bf16.mxu0 %v3468_v2  ;;  %v3561_v1 = vld [vmem:[#allocation6 + $0x7ac] ss:$16 sps:$4 sm:$0xff]   ;;  %v3556_v2 = vld [vmem:[#allocation6 + $0x5a8] ss:$16 sps:$4 sm:$0xff]  }
  0xed   :  { %1935 = vmatprep.subr.bf16.mxu1 %v3471_v3  ;;  %v3559_v3 = vld [vmem:[#allocation6 + $0x7a8] ss:$16 sps:$4 sm:$0xff]  }
  0xef   :  { %1893 = vmatpush2.bf16.msra.mxu0 %v3466_v4  ;;  %v3564_v4 = vld [vmem:[#allocation6 + $0x58c] ss:$16 sps:$4 sm:$0xff]  }
  0xf0   :  { %1936 = vmatpush2.bf16.msra.mxu1 %v3469_v5  ;;  %1894 = vmatprep.subr.bf16.mxu0 %v3474_v6  ;;  %v3567_v5 = vld [vmem:[#allocation6 + $0x78c] ss:$16 sps:$4 sm:$0xff]   ;;  %v3562_v6 = vld [vmem:[#allocation6 + $0x588] ss:$16 sps:$4 sm:$0xff]  }
  0xf1   :  { %1937 = vmatprep.subr.bf16.mxu1 %v3477_v7  ;;  %v3565_v7 = vld [vmem:[#allocation6 + $0x788] ss:$16 sps:$4 sm:$0xff]  }
  0xf3   :  { %1895 = vmatpush2.bf16.msra.mxu0 %v3472_v10  ;;  %v3570_v10 = vld [vmem:[#allocation6 + $0x56c] ss:$16 sps:$4 sm:$0xff]  }
  0xf4   :  { %1938 = vmatpush2.bf16.msra.mxu1 %v3475_v11  ;;  %1896 = vmatprep.subr.bf16.mxu0 %v3480_v12  ;;  %v3573_v11 = vld [vmem:[#allocation6 + $0x76c] ss:$16 sps:$4 sm:$0xff]   ;;  %v3568_v12 = vld [vmem:[#allocation6 + $0x568] ss:$16 sps:$4 sm:$0xff]  }
  0xf5   :  { %1939 = vmatprep.subr.bf16.mxu1 %v3483_v13  ;;  %v3571_v13 = vld [vmem:[#allocation6 + $0x768] ss:$16 sps:$4 sm:$0xff]  }
  0xf7   :  { %1897 = vmatpush2.bf16.msra.mxu0 %v3478_v14  ;;  %v3576_v14 = vld [vmem:[#allocation6 + $0x54c] ss:$16 sps:$4 sm:$0xff]  }
  0xf8   :  { %1940 = vmatpush2.bf16.msra.mxu1 %v3481_v15  ;;  %1898 = vmatprep.subr.bf16.mxu0 %v3486_v16  ;;  %v3579_v15 = vld [vmem:[#allocation6 + $0x74c] ss:$16 sps:$4 sm:$0xff]   ;;  %v3574_v16 = vld [vmem:[#allocation6 + $0x548] ss:$16 sps:$4 sm:$0xff]  }
  0xf9   :  { %1941 = vmatprep.subr.bf16.mxu1 %v3489_v17  ;;  %v3577_v17 = vld [vmem:[#allocation6 + $0x748] ss:$16 sps:$4 sm:$0xff]  }
  0xfb   :  { %1899 = vmatpush2.bf16.msra.mxu0 %v3484_v18  ;;  %v3582_v18 = vld [vmem:[#allocation6 + $0x52c] ss:$16 sps:$4 sm:$0xff]  }
  0xfc   :  { %1942 = vmatpush2.bf16.msra.mxu1 %v3487_v19  ;;  %1900 = vmatprep.subr.bf16.mxu0 %v3492_v22  ;;  %v3585_v19 = vld [vmem:[#allocation6 + $0x72c] ss:$16 sps:$4 sm:$0xff]   ;;  %v3580_v22 = vld [vmem:[#allocation6 + $0x528] ss:$16 sps:$4 sm:$0xff]  }
  0xfd   :  { %1943 = vmatprep.subr.bf16.mxu1 %v3495_v23  ;;  %v3583_v23 = vld [vmem:[#allocation6 + $0x728] ss:$16 sps:$4 sm:$0xff]  }
  0xff   :  { %1901 = vmatpush2.bf16.msra.mxu0 %v3490_v24  ;;  %v3588_v24 = vld [vmem:[#allocation6 + $0x50c] ss:$16 sps:$4 sm:$0xff]  }
 0x100   :  { %1944 = vmatpush2.bf16.msra.mxu1 %v3493_v25  ;;  %1956 = vmatprep.subr.bf16.mxu0 %v3498_v26  ;;  %v3591_v25 = vld [vmem:[#allocation6 + $0x70c] ss:$16 sps:$4 sm:$0xff]   ;;  %v3586_v26 = vld [vmem:[#allocation6 + $0x508] ss:$16 sps:$4 sm:$0xff]  }
 0x101   :  { %1999 = vmatprep.subr.bf16.mxu1 %v3501_v27  ;;  %v3589_v27 = vld [vmem:[#allocation6 + $0x708] ss:$16 sps:$4 sm:$0xff]  }
 0x102   :  { %1903 = vmatmul.mubr.bf16.vlgmr.msra.gmra.mxu0 %v3918_v8  ;;  %v3514_v8 = vld [vmem:[#allocation6 + $0x488] ss:$16 sps:$4 sm:$0xff]  }
 0x103   :  { %1946 = vmatmul.mubr.bf16.vlgmr.msra.gmra.mxu1 %v3920_v9  ;;  %1957 = vmatpush1.bf16.msra.mxu0 %v3496_v28  ;;  %v3517_v9 = vld [vmem:[#allocation6 + $0x688] ss:$16 sps:$4 sm:$0xff]  }
 0x104   :  { %2000 = vmatpush1.bf16.msra.mxu1 %v3499_v29  ;;  %1958 = vmatprep.subr.bf16.mxu0 %v3504_v30  ;;  %v3594_v28 = vld [vmem:[#allocation9 + $0x74] ss:$8 sps:$4 sm:$0xff]   ;;  %v3592_v29 = vld [vmem:[#allocation9 + $0x70] ss:$8 sps:$4 sm:$0xff]   ;;  %v3597_v30 = vld [vmem:[#allocation9 + $0x64] ss:$8 sps:$4 sm:$0xff]  }
 0x105   :  { %2001 = vmatprep.subr.bf16.mxu1 %v3507_v31  ;;  %1988 = vmatprep.mubr.bf16.mxu0 %v3934_v41  ;;  %v3531_v41 = vld [vmem:[#allocation6 + $0x64c] ss:$16 sps:$4 sm:$0xff]  }
 0x106   :  { %2031 = vmatprep.mubr.bf16.mxu1 %v3938_v43  ;;  %v3526_v43 = vld [vmem:[#allocation6 + $0x448] ss:$16 sps:$4 sm:$0xff]   ;;  %v3595_v31 = vld [vmem:[#allocation9 + $0x60] ss:$8 sps:$4 sm:$0xff]  }
 0x107   :  { %1959 = vmatpush1.bf16.msra.mxu0 %v3502_v32  ;;  %v3600_v32 = vld [vmem:[#allocation9 + $0x54] ss:$8 sps:$4 sm:$0xff]  }
 0x108   :  { %2002 = vmatpush1.bf16.msra.mxu1 %v3505_v33  ;;  %1960 = vmatprep.subr.bf16.mxu0 %v3510_v34  ;;  %v3598_v33 = vld [vmem:[#allocation9 + $0x50] ss:$8 sps:$4 sm:$0xff]   ;;  %v3603_v34 = vld [vmem:[#allocation9 + $0x44] ss:$8 sps:$4 sm:$0xff]  }
 0x109   :  { %2003 = vmatprep.subr.bf16.mxu1 %v3513_v35  ;;  %v3640_v35 = vld [vmem:[#allocation9 + $0x170] ss:$8 sps:$4 sm:$0xff]  }
 0x10b   :  { %1961 = vmatpush1.bf16.msra.mxu0 %v3508_v36  ;;  %v3642_v36 = vld [vmem:[#allocation9 + $0x174] ss:$8 sps:$4 sm:$0xff]  }
 0x10c   :  { %2004 = vmatpush1.bf16.msra.mxu1 %v3511_v37  ;;  %1962 = vmatprep.subr.bf16.mxu0 %v3516_v38  ;;  %v3645_v37 = vld [vmem:[#allocation9 + $0x164] ss:$8 sps:$4 sm:$0xff]   ;;  %v3601_v38 = vld [vmem:[#allocation9 + $0x40] ss:$8 sps:$4 sm:$0xff]  }
 0x10d   :  { %2005 = vmatprep.subr.bf16.mxu1 %v3519_v53  ;;  %v3606_v53 = vld [vmem:[#allocation9 + $0x34] ss:$8 sps:$4 sm:$0xff]  }
 0x10f   :  { %1963 = vmatpush1.bf16.msra.mxu0 %v3514_v8  ;;  %v3604_v8 = vld [vmem:[#allocation9 + $0x30] ss:$8 sps:$4 sm:$0xff]  }
 0x110   :  { %2006 = vmatpush1.bf16.msra.mxu1 %v3517_v9  ;;  %1964 = vmatprep.subr.bf16.mxu0 %v3522_v55  ;;  %v3609_v9 = vld [vmem:[#allocation9 + $0x24] ss:$8 sps:$4 sm:$0xff]   ;;  %v3646_v55 = vld [vmem:[#allocation9 + $0x150] ss:$8 sps:$4 sm:$0xff]  }
 0x111   :  { %2007 = vmatprep.subr.bf16.mxu1 %v3525_v39  ;;  %v3651_v39 = vld [vmem:[#allocation9 + $0x144] ss:$8 sps:$4 sm:$0xff]  }
 0x113   :  { %1965 = vmatpush1.bf16.msra.mxu0 %v3520_v40  ;;  %v3607_v40 = vld [vmem:[#allocation9 + $0x20] ss:$8 sps:$4 sm:$0xff]  }
 0x114   :  { %2008 = vmatpush1.bf16.msra.mxu1 %v3523_v42  ;;  %1966 = vmatprep.subr.bf16.mxu0 %v3528_v44  ;;  %v3612_v42 = vld [vmem:[#allocation9 + $0x14] ss:$8 sps:$4 sm:$0xff]   ;;  %v3649_v44 = vld [vmem:[#allocation9 + $0x140] ss:$8 sps:$4 sm:$0xff]  }
 0x115   :  { %2009 = vmatprep.subr.bf16.mxu1 %v3531_v41  ;;  %v3654_v41 = vld [vmem:[#allocation9 + $0x134] ss:$8 sps:$4 sm:$0xff]  }
 0x117   :  { %1967 = vmatpush1.bf16.msra.mxu0 %v3526_v43  ;;  %v3610_v43 = vld [vmem:[#allocation9 + $0x10] ss:$8 sps:$4 sm:$0xff]  }
 0x118   :  { %2010 = vmatpush1.bf16.msra.mxu1 %v3529_v45  ;;  %1968 = vmatprep.subr.bf16.mxu0 %v3534_v46  ;;  %v3615_v45 = vld [vmem:[#allocation9 + $0x4] ss:$8 sps:$4 sm:$0xff]   ;;  %v3652_v46 = vld [vmem:[#allocation9 + $0x130] ss:$8 sps:$4 sm:$0xff]  }
 0x119   :  { %2011 = vmatprep.subr.bf16.mxu1 %v3537_v47  ;;  %v3657_v47 = vld [vmem:[#allocation9 + $0x124] ss:$8 sps:$4 sm:$0xff]  }
 0x11b   :  { %1969 = vmatpush1.bf16.msra.mxu0 %v3532_v48  ;;  %v3613_v48 = vld [vmem:[#allocation9] ss:$8 sps:$4 sm:$0xff]  }
 0x11c   :  { %2012 = vmatpush1.bf16.msra.mxu1 %v3535_v49  ;;  %1970 = vmatprep.subr.bf16.mxu0 %v3540_v50  ;;  %v3618_v49 = vld [vmem:[#allocation9 + $0xf4] ss:$8 sps:$4 sm:$0xff]   ;;  %v3655_v50 = vld [vmem:[#allocation9 + $0x120] ss:$8 sps:$4 sm:$0xff]  }
 0x11d   :  { %2013 = vmatprep.subr.bf16.mxu1 %v3543_v51  ;;  %v3660_v51 = vld [vmem:[#allocation9 + $0x114] ss:$8 sps:$4 sm:$0xff]  }
 0x11f   :  { %1971 = vmatpush1.bf16.msra.mxu0 %v3538_v52  ;;  %v3616_v52 = vld [vmem:[#allocation9 + $0xf0] ss:$8 sps:$4 sm:$0xff]  }
 0x120   :  { %2014 = vmatpush1.bf16.msra.mxu1 %v3541_v54  ;;  %1972 = vmatprep.subr.bf16.mxu0 %v3546_v56  ;;  %v3621_v54 = vld [vmem:[#allocation9 + $0xe4] ss:$8 sps:$4 sm:$0xff]   ;;  %v3658_v56 = vld [vmem:[#allocation9 + $0x110] ss:$8 sps:$4 sm:$0xff]  }
 0x121   :  { %2015 = vmatprep.subr.bf16.mxu1 %v3549_v57  ;;  %v3663_v57 = vld [vmem:[#allocation9 + $0x104] ss:$8 sps:$4 sm:$0xff]  }
 0x123   :  { %1973 = vmatpush2.bf16.msra.mxu0 %v3544_v58  ;;  %v3619_v58 = vld [vmem:[#allocation9 + $0xe0] ss:$8 sps:$4 sm:$0xff]  }
 0x124   :  { %2016 = vmatpush2.bf16.msra.mxu1 %v3547_v59  ;;  %1974 = vmatprep.subr.bf16.mxu0 %v3552_v60  ;;  %v3624_v59 = vld [vmem:[#allocation9 + $0xd4] ss:$8 sps:$4 sm:$0xff]   ;;  %v3661_v60 = vld [vmem:[#allocation9 + $0x100] ss:$8 sps:$4 sm:$0xff]  }
 0x125   :  { %2017 = vmatprep.subr.bf16.mxu1 %v3555_v61  ;;  %v3666_v61 = vld [vmem:[#allocation9 + $0x1f4] ss:$8 sps:$4 sm:$0xff]  }
 0x127   :  { %1975 = vmatpush2.bf16.msra.mxu0 %v3550_v62  ;;  %v3622_v62 = vld [vmem:[#allocation9 + $0xd0] ss:$8 sps:$4 sm:$0xff]  }
 0x128   :  { %2018 = vmatpush2.bf16.msra.mxu1 %v3553_v63  ;;  %1976 = vmatprep.subr.bf16.mxu0 %v3558_v0  ;;  %v3627_v63 = vld [vmem:[#allocation9 + $0xc4] ss:$8 sps:$4 sm:$0xff]   ;;  %v3664_v0 = vld [vmem:[#allocation9 + $0x1f0] ss:$8 sps:$4 sm:$0xff]  }
 0x129   :  { %2019 = vmatprep.subr.bf16.mxu1 %v3561_v1  ;;  %v3669_v1 = vld [vmem:[#allocation9 + $0x1e4] ss:$8 sps:$4 sm:$0xff]  }
 0x12b   :  { %1977 = vmatpush2.bf16.msra.mxu0 %v3556_v2  ;;  %v3625_v2 = vld [vmem:[#allocation9 + $0xc0] ss:$8 sps:$4 sm:$0xff]  }
 0x12c   :  { %2020 = vmatpush2.bf16.msra.mxu1 %v3559_v3  ;;  %1978 = vmatprep.subr.bf16.mxu0 %v3564_v4  ;;  %v3630_v3 = vld [vmem:[#allocation9 + $0xb4] ss:$8 sps:$4 sm:$0xff]   ;;  %v3667_v4 = vld [vmem:[#allocation9 + $0x1e0] ss:$8 sps:$4 sm:$0xff]  }
 0x12d   :  { %2021 = vmatprep.subr.bf16.mxu1 %v3567_v5  ;;  %v3672_v5 = vld [vmem:[#allocation9 + $0x1d4] ss:$8 sps:$4 sm:$0xff]  }
 0x12f   :  { %1979 = vmatpush2.bf16.msra.mxu0 %v3562_v6  ;;  %v3628_v6 = vld [vmem:[#allocation9 + $0xb0] ss:$8 sps:$4 sm:$0xff]  }
 0x130   :  { %2022 = vmatpush2.bf16.msra.mxu1 %v3565_v7  ;;  %1980 = vmatprep.subr.bf16.mxu0 %v3570_v10  ;;  %v3633_v7 = vld [vmem:[#allocation9 + $0xa4] ss:$8 sps:$4 sm:$0xff]   ;;  %v3670_v10 = vld [vmem:[#allocation9 + $0x1d0] ss:$8 sps:$4 sm:$0xff]  }
 0x131   :  { %2023 = vmatprep.subr.bf16.mxu1 %v3573_v11  ;;  %v3675_v11 = vld [vmem:[#allocation9 + $0x1c4] ss:$8 sps:$4 sm:$0xff]  }
 0x133   :  { %1981 = vmatpush2.bf16.msra.mxu0 %v3568_v12  ;;  %v3631_v12 = vld [vmem:[#allocation9 + $0xa0] ss:$8 sps:$4 sm:$0xff]  }
 0x134   :  { %2024 = vmatpush2.bf16.msra.mxu1 %v3571_v13  ;;  %1982 = vmatprep.subr.bf16.mxu0 %v3576_v14 }
 0x135   :  { %2025 = vmatprep.subr.bf16.mxu1 %v3579_v15  ;;  %v3636_v15 = vld [vmem:[#allocation9 + $0x94] ss:$8 sps:$4 sm:$0xff]  }
 0x137   :  { %1983 = vmatpush2.bf16.msra.mxu0 %v3574_v16  ;;  %v3673_v16 = vld [vmem:[#allocation9 + $0x1c0] ss:$8 sps:$4 sm:$0xff]  }
 0x138   :  { %2026 = vmatpush2.bf16.msra.mxu1 %v3577_v17  ;;  %1984 = vmatprep.subr.bf16.mxu0 %v3582_v18  ;;  %v3634_v17 = vld [vmem:[#allocation9 + $0x90] ss:$8 sps:$4 sm:$0xff]  }
 0x139   :  { %2027 = vmatprep.subr.bf16.mxu1 %v3585_v19 }
 0x13b   :  { %1985 = vmatpush2.bf16.msra.mxu0 %v3580_v22  ;;  %v3639_v22 = vld [vmem:[#allocation9 + $0x84] ss:$8 sps:$4 sm:$0xff]  }
 0x13c   :  { %2028 = vmatpush2.bf16.msra.mxu1 %v3583_v23  ;;  %1986 = vmatprep.subr.bf16.mxu0 %v3588_v24  ;;  %v3637_v23 = vld [vmem:[#allocation9 + $0x80] ss:$8 sps:$4 sm:$0xff]  }
 0x13d   :  { %2029 = vmatprep.subr.bf16.mxu1 %v3591_v25 }
 0x13f   :  { %1987 = vmatpush2.bf16.msra.mxu0 %v3586_v26  ;;  %v2071_v26 = vlaneseq }
 0x140   :  { %2030 = vmatpush2.bf16.msra.mxu1 %v3589_v27  ;;  %2507 = vmatprep.subr.bf16.mxu0 %v3594_v28 }
 0x141   :  { %2550 = vmatprep.subr.bf16.mxu1 %v3642_v36  ;;  %v3676_v36 = vld [vmem:[#allocation9 + $0x1b0] ss:$8 sps:$4 sm:$0xff]  }
 0x142   :  { %1989 = vmatmul.mubr.bf16.vlgmr.msra.gmra.mxu0 %v3944_v20  ;;  %v3643_v20 = vld [vmem:[#allocation9 + $0x160] ss:$8 sps:$4 sm:$0xff]   ;;  %v1732_v13 = vpop.f32.mrf.mxu0 }
 0x143   :  { %2032 = vmatmul.mubr.bf16.vlgmr.msra.gmra.mxu1 %v3948_v21  ;;  %2508 = vmatpush1.bf16.msra.mxu0 %v3592_v29  ;;  %v3648_v21 = vld [vmem:[#allocation9 + $0x154] ss:$8 sps:$4 sm:$0xff]   ;;  %v1775_v14 = vpop.f32.mrf.mxu1  ;;  %v3960_v29 = vshrl.u32 %v2071_v26, 7 }
 0x144   :  { %2509 = vmatprep.subr.bf16.mxu0 %v3597_v30  ;;  %2551 = vmatpush1.bf16.msra.mxu1 %v3640_v35  ;;  %v1734_v18 = vpop.f32.mrf.mxu0  ;;  %v1776_v30 = vadd.f32 %v1775_v14, %v1732_v13  ;;  %v3694_v13 = vld [vmem:[#allocation11 + $0x60] sm:$0xff]  }
 0x145   :  { %2552 = vmatprep.subr.bf16.mxu1 %v3645_v37  ;;  %v1777_v19 = vpop.f32.mrf.mxu1  ;;  %v2077_v35 = vsub.s32 1, %v3960_v29  ;;  %v3695_v14 = vld [vmem:[#allocation11 + $0x20] sm:$0xff]  }
 0x146   :  { %v1736_v24 = vpop.f32.mrf.mxu0 }
 0x147   :  { %2510 = vmatpush1.bf16.msra.mxu0 %v3595_v31  ;;  %v1779_v25 = vpop.f32.mrf.mxu1 }
 0x148   :  { %2511 = vmatprep.subr.bf16.mxu0 %v3600_v32  ;;  %2553 = vmatpush1.bf16.msra.mxu1 %v3643_v20  ;;  %v1738_v27 = vpop.f32.mrf.mxu0 }
 0x149   :  { %2554 = vmatprep.subr.bf16.mxu1 %v3648_v21  ;;  %v1781_v28 = vpop.f32.mrf.mxu1  ;;  %v1780_v21 = vadd.f32 %v1779_v25, %v1736_v24 }
 0x14b   :  { %2512 = vmatpush1.bf16.msra.mxu0 %v3598_v33  ;;  %v3678_v33 = vld [vmem:[#allocation9 + $0x1b4] ss:$8 sps:$4 sm:$0xff]  }
 0x14c   :  { %2513 = vmatprep.subr.bf16.mxu0 %v3603_v34  ;;  %2555 = vmatpush1.bf16.msra.mxu1 %v3646_v55  ;;  %v1778_v34 = vadd.f32 %v1777_v19, %v1734_v18 }
 0x14d   :  { %2556 = vmatprep.subr.bf16.mxu1 %v3651_v39 }
 0x14f   :  { %2514 = vmatpush1.bf16.msra.mxu0 %v3601_v38  ;;  %v2073_v38 = vsub.s32 0, %v3960_v29 }
 0x150   :  { %2515 = vmatprep.subr.bf16.mxu0 %v3606_v53  ;;  %2557 = vmatpush1.bf16.msra.mxu1 %v3649_v44 }
 0x151   :  { %2558 = vmatprep.subr.bf16.mxu1 %v3654_v41 }
 0x153   :  { %2516 = vmatpush1.bf16.msra.mxu0 %v3604_v8  ;;  %v3964_v8 = vld [vmem:[#allocation8] sm:$0xf] }
 0x154   :  { %2517 = vmatprep.subr.bf16.mxu0 %v3609_v9  ;;  %2559 = vmatpush1.bf16.msra.mxu1 %v3652_v46  ;;  %v2078_v41 = vrot.slane %v3964_v8, %v2077_v35 }
 0x155   :  { %2560 = vmatprep.subr.bf16.mxu1 %v3657_v47  ;;  %v2074_v47 = vrot.slane %v3964_v8, %v2073_v38 }
 0x157   :  { %2518 = vmatpush1.bf16.msra.mxu0 %v3607_v40  ;;  %v3681_v40 = vld [vmem:[#allocation9 + $0x1a4] ss:$8 sps:$4 sm:$0xff]  }
 0x158   :  { %2519 = vmatprep.subr.bf16.mxu0 %v3612_v42  ;;  %2561 = vmatpush1.bf16.msra.mxu1 %v3655_v50  ;;  %v1782_v42 = vadd.f32 %v1781_v28, %v1738_v27 }
 0x159   :  { %2562 = vmatprep.subr.bf16.mxu1 %v3660_v51 }
 0x15b   :  { %2520 = vmatpush1.bf16.msra.mxu0 %v3610_v43 }
 0x15c   :  { %2521 = vmatprep.subr.bf16.mxu0 %v3615_v45  ;;  %2563 = vmatpush1.bf16.msra.mxu1 %v3658_v56  ;;  %v3679_v45 = vld [vmem:[#allocation9 + $0x1a0] ss:$8 sps:$4 sm:$0xff]  }
 0x15d   :  { %2564 = vmatprep.subr.bf16.mxu1 %v3663_v57 }
 0x15f   :  { %2522 = vmatpush1.bf16.msra.mxu0 %v3613_v48 }
 0x160   :  { %2523 = vmatprep.subr.bf16.mxu0 %v3618_v49  ;;  %2565 = vmatpush1.bf16.msra.mxu1 %v3661_v60 }
 0x161   :  { %2566 = vmatprep.subr.bf16.mxu1 %v3666_v61 }
 0x163   :  { %2524 = vmatpush2.bf16.msra.mxu0 %v3616_v52  ;;  %v3684_v52 = vld [vmem:[#allocation9 + $0x194] ss:$8 sps:$4 sm:$0xff]  }
 0x164   :  { %2525 = vmatprep.subr.bf16.mxu0 %v3621_v54  ;;  %2567 = vmatpush2.bf16.msra.mxu1 %v3664_v0 }
 0x165   :  { %2568 = vmatprep.subr.bf16.mxu1 %v3669_v1  ;;  %v3685_v1 = vld [vmem:[#allocation9 + $0x180] ss:$8 sps:$4 sm:$0xff]  }
 0x167   :  { %2526 = vmatpush2.bf16.msra.mxu0 %v3619_v58  ;;  %v3682_v58 = vld [vmem:[#allocation9 + $0x190] ss:$8 sps:$4 sm:$0xff]  }
 0x168   :  { %2527 = vmatprep.subr.bf16.mxu0 %v3624_v59  ;;  %2569 = vmatpush2.bf16.msra.mxu1 %v3667_v4 }
 0x169   :  { %2570 = vmatprep.subr.bf16.mxu1 %v3672_v5  ;;  %v3688_v5 = vld [vmem:[#allocation11 + $0x78] sm:$0xff]  }
 0x16b   :  { %2528 = vmatpush2.bf16.msra.mxu0 %v3622_v62  ;;  %v3687_v62 = vld [vmem:[#allocation9 + $0x184] ss:$8 sps:$4 sm:$0xff]  }
 0x16c   :  { %2529 = vmatprep.subr.bf16.mxu0 %v3627_v63  ;;  %2571 = vmatpush2.bf16.msra.mxu1 %v3670_v10  ;;  %v3691_v10 = vld [vmem:[#allocation11 + $0x30] sm:$0xff]  }
 0x16d   :  { %2572 = vmatprep.subr.bf16.mxu1 %v3675_v11  ;;  %v3692_v11 = vld [vmem:[#allocation11 + $0x68] sm:$0xff]  }
 0x16f   :  { %2530 = vmatpush2.bf16.msra.mxu0 %v3625_v2 }
 0x170   :  { %2531 = vmatprep.subr.bf16.mxu0 %v3630_v3  ;;  %2573 = vmatpush2.bf16.msra.mxu1 %v3673_v16  ;;  %v3697_v16 = vld [vmem:[#allocation11 + $0x18] sm:$0xff]  }
 0x171   :  { %2574 = vmatprep.subr.bf16.mxu1 %v3678_v33 }
 0x173   :  { %2532 = vmatpush2.bf16.msra.mxu0 %v3628_v6  ;;  %v3689_v6 = vld [vmem:[#allocation11 + $0x38] sm:$0xff]  }
 0x174   :  { %2533 = vmatprep.subr.bf16.mxu0 %v3633_v7  ;;  %2575 = vmatpush2.bf16.msra.mxu1 %v3676_v36  ;;  %v3690_v7 = vld [vmem:[#allocation11 + $0x70] sm:$0xff]  }
 0x175   :  { %2576 = vmatprep.subr.bf16.mxu1 %v3681_v40 }
 0x177   :  { %2534 = vmatpush2.bf16.msra.mxu0 %v3631_v12  ;;  %v3693_v12 = vld [vmem:[#allocation11 + $0x28] sm:$0xff]  }
 0x178   :  { %2535 = vmatprep.subr.bf16.mxu0 %v3636_v15  ;;  %2577 = vmatpush2.bf16.msra.mxu1 %v3679_v45  ;;  %v3696_v15 = vld [vmem:[#allocation11 + $0x58] sm:$0xff]  }
 0x179   :  { %2578 = vmatprep.subr.bf16.mxu1 %v3684_v52 }
 0x17b   :  { %2536 = vmatpush2.bf16.msra.mxu0 %v3634_v17 }
 0x17c   :  { %2537 = vmatprep.subr.bf16.mxu0 %v3639_v22  ;;  %2579 = vmatpush2.bf16.msra.mxu1 %v3682_v58 }
 0x17d   :  { %2580 = vmatprep.subr.bf16.mxu1 %v3687_v62  ;;  %v3699_v62 = vld [vmem:[#allocation11 + $0x10] sm:$0xff]  }
 0x17f   :  { %2538 = vmatpush2.bf16.msra.mxu0 %v3637_v23 }
 0x180   :  { %2581 = vmatpush2.bf16.msra.mxu1 %v3685_v1  ;;  %3172 = vmatprep.subr.bf16.mxu0 %v3688_v5  ;;  %v3703_v1 = vld [vmem:[#allocation11] sm:$0xff]  }
 0x182   :  { %v1818_v31 = vpop.f32.mrf.mxu0 }
 0x183   :  { %v1861_v32 = vpop.f32.mrf.mxu1  ;;  %v1819_v37 = vadd.f32 %v1818_v31, %v1776_v30 }
 0x184   :  { %v1820_v53 = vpop.f32.mrf.mxu0 }
 0x185   :  { %v1863_v20 = vpop.f32.mrf.mxu1  ;;  %v1821_v9 = vadd.f32 %v1820_v53, %v1778_v34  ;;  %v1862_v46 = vadd.f32 %v1861_v32, %v1819_v37  ;;  %v2085_v32 = vsub.s32 3, %v3960_v29  ;;  %v2081_v34 = vsub.s32 2, %v3960_v29 }
 0x186   :  { %v1822_v55 = vpop.f32.mrf.mxu0 }
 0x187   :  { %v1865_v39 = vpop.f32.mrf.mxu1  ;;  %v1864_v44 = vadd.f32 %v1863_v20, %v1821_v9  ;;  %v1823_v43 = vadd.f32 %v1822_v55, %v1780_v21  ;;  %v2091_v59 = vadd.f32 %v2074_v47, %v1862_v46  ;;  %v2086_v40 = vrot.slane %v3964_v8, %v2085_v32 }
 0x188   :  { %v1824_v48 = vpop.f32.mrf.mxu0 }
 0x189   :  { %v1866_v49 = vadd.f32 %v1865_v39, %v1823_v43  ;;  %v1825_v50 = vadd.f32 %v1824_v48, %v1782_v42  ;;  %v1867_v51 = vpop.f32.mrf.mxu1  ;;  %v2092_v54 = vadd.f32 %v2078_v41, %v1864_v44  ;;  %v2099_v2 = vmax.f32 %v2091_v59, 0.0 }
 0x18b   :  { %v2095_v56 = vadd.f32 %v2074_v47, %v1866_v49  ;;  %v1868_v57 = vadd.f32 %v1867_v51, %v1825_v50  ;;  %v2100_v63 = vmax.f32 %v2092_v54, 0.0 }
 0x18d   :  { %v2096_v60 = vadd.f32 %v2078_v41, %v1868_v57  ;;  %v2103_v61 = vmax.f32 %v2095_v56, 0.0  ;;  %v2082_v41 = vrot.slane %v3964_v8, %v2081_v34  ;;  %v3700_v8 = vld [vmem:[#allocation11 + $0x48] sm:$0xff]  }
 0x18f   :  { %v2104_v0 = vmax.f32 %v2096_v60, 0.0  ;;  %v2107_v4 = vpack.c.bf16 %v2103_v61, %v2099_v2  ;;  %v3698_v61 = vld [vmem:[#allocation11 + $0x50] sm:$0xff]  }
 0x191   :  { %v2108_v3 = vpack.c.bf16 %v2104_v0, %v2100_v63  ;;  %v3701_v63 = vld [vmem:[#allocation11 + $0x8] sm:$0xff]   ;;  %v3702_v0 = vld [vmem:[#allocation11 + $0x40] sm:$0xff]  }
 0x193   :  { %2539 = vmatprep.mubr.bf16.mxu0 %v2108_v3 }
 0x194   :  { %2540 = vmatmul.mubr.bf16.vlgmr.msra.gmra.mxu0 %v2107_v4  ;;  %v2175_v4 = vld [vmem:[%s3996_s4] sm:$0x3] }
 0x195   :  { %3173 = vmatpush3.bf16.msra.mxu0 %v3689_v6  ;;  %v2184_v6 = vrot.slane %v2175_v4, %v2077_v35 }
 0x196   :  { %3174 = vmatprep.subr.bf16.mxu0 %v3690_v7  ;;  %v2180_v7 = vrot.slane %v2175_v4, %v2073_v38 }
 0x199   :  { %3175 = vmatpush3.bf16.msra.mxu0 %v3691_v10 }
 0x19a   :  { %3176 = vmatprep.subr.bf16.mxu0 %v3692_v11 }
 0x19d   :  { %3177 = vmatpush3.bf16.msra.mxu0 %v3693_v12 }
 0x19e   :  { %3178 = vmatprep.subr.bf16.mxu0 %v3694_v13 }
 0x1a1   :  { %3179 = vmatpush3.bf16.msra.mxu0 %v3695_v14 }
 0x1a2   :  { %3180 = vmatprep.subr.bf16.mxu0 %v3696_v15 }
 0x1a5   :  { %3181 = vmatpush3.bf16.msra.mxu0 %v3697_v16 }
 0x1a6   :  { %3182 = vmatprep.subr.bf16.mxu0 %v3698_v61 }
 0x1a9   :  { %3183 = vmatpush3.bf16.msra.mxu0 %v3699_v62 }
 0x1aa   :  { %3184 = vmatprep.subr.bf16.mxu0 %v3700_v8 }
 0x1ad   :  { %3185 = vmatpush3.bf16.msra.mxu0 %v3701_v63 }
 0x1ae   :  { %3186 = vmatprep.subr.bf16.mxu0 %v3702_v0 }
 0x1b1   :  { %3187 = vmatpush3.bf16.msra.mxu0 %v3703_v1 }
 0x1c2   :  { %v1904_v17 = vpop.f32.mrf.mxu0 }
 0x1c3   :  { %v1947_v18 = vpop.f32.mrf.mxu1 }
 0x1c4   :  { %v1906_v19 = vpop.f32.mrf.mxu0  ;;  %v1948_v27 = vadd.f32 %v1947_v18, %v1904_v17 }
 0x1c5   :  { %v1949_v22 = vpop.f32.mrf.mxu1 }
 0x1c6   :  { %v1908_v23 = vpop.f32.mrf.mxu0  ;;  %v1950_v31 = vadd.f32 %v1949_v22, %v1906_v19 }
 0x1c7   :  { %v1951_v24 = vpop.f32.mrf.mxu1 }
 0x1c8   :  { %v1910_v25 = vpop.f32.mrf.mxu0  ;;  %v1952_v53 = vadd.f32 %v1951_v24, %v1908_v23 }
 0x1c9   :  { %v1953_v26 = vpop.f32.mrf.mxu1 }
 0x1ca   :  { %v1954_v55 = vadd.f32 %v1953_v26, %v1910_v25 }
 0x202   :  { %v1990_v28 = vpop.f32.mrf.mxu0 }
 0x203   :  { %v2033_v30 = vpop.f32.mrf.mxu1  ;;  %v1991_v33 = vadd.f32 %v1990_v28, %v1948_v27 }
 0x204   :  { %v1992_v36 = vpop.f32.mrf.mxu0 }
 0x205   :  { %v2035_v37 = vpop.f32.mrf.mxu1  ;;  %v1993_v20 = vadd.f32 %v1992_v36, %v1950_v31  ;;  %v2034_v44 = vadd.f32 %v2033_v30, %v1991_v33  ;;  %v3144_v30 = vld [vmem:[%s3998_s6] ss:$0 sm:$0xff]  ;;  %s3812_s6 = scalar_lea.vmem %s2803_s10, 128 }
 0x206   :  { %v1994_v21 = vpop.f32.mrf.mxu0  ;;  %p3813_p11 = scmp.ne.s32.totalorder %s2803_s10, %s3812_s6  ;;  %p3818_p13 = scmp.lt.s32.totalorder %s3812_s6, %s3812_s6 }
 0x207   :  { %v2037_v9 = vpop.f32.mrf.mxu1  ;;  %v2036_v39 = vadd.f32 %v2035_v37, %v1993_v20  ;;  %v1995_v42 = vadd.f32 %v1994_v21, %v1952_v53  ;;  %v2093_v51 = vadd.f32 %v2082_v41, %v2034_v44 }
 0x208   :  { %v1996_v43 = vpop.f32.mrf.mxu0  ;;  %p3819_p0 = por %p3818_p13, %p3817_p12 }
 0x209   :  { %v2038_v45 = vadd.f32 %v2037_v9, %v1995_v42  ;;  %v1997_v46 = vadd.f32 %v1996_v43, %v1954_v55  ;;  %v2039_v47 = vpop.f32.mrf.mxu1  ;;  %v2094_v48 = vadd.f32 %v2086_v40, %v2036_v39  ;;  %v2101_v58 = vmax.f32 %v2093_v51, 0.0 }
 0x20a   :  { %p3820_p1 = pnand %p3819_p0, %p3813_p11 }
 0x20b   :  { %v2097_v49 = vadd.f32 %v2082_v41, %v2038_v45  ;;  %v2040_v50 = vadd.f32 %v2039_v47, %v1997_v46  ;;  %v2102_v56 = vmax.f32 %v2094_v48, 0.0 }
 0x20d   :  { %v2098_v52 = vadd.f32 %v2086_v40, %v2040_v50  ;;  %v2105_v54 = vmax.f32 %v2097_v49, 0.0 }
 0x20f   :  { %v2106_v57 = vmax.f32 %v2098_v52, 0.0  ;;  %v2109_v60 = vpack.c.bf16 %v2105_v54, %v2101_v58 }
 0x211   :  { %v2110_v59 = vpack.c.bf16 %v2106_v57, %v2102_v56 }
 0x213   :  { %2582 = vmatprep.mubr.bf16.mxu1 %v2110_v59 }
 0x214   :  { %2583 = vmatmul.mubr.bf16.vlgmr.msra.gmra.mxu1 %v2109_v60 }
 0x254   :  { %v2541_v2 = vpop.f32.mrf.mxu0 }
 0x255   :  { %v2542_v15 = vadd.f32 %v2541_v2, %v2180_v7 }
 0x256   :  { %v2543_v3 = vpop.f32.mrf.mxu0 }
 0x257   :  { %v2544_v13 = vadd.f32 %v2543_v3, %v2184_v6 }
 0x258   :  { %v2545_v5 = vpop.f32.mrf.mxu0 }
 0x259   :  { %v2546_v14 = vadd.f32 %v2545_v5, %v2180_v7 }
 0x25a   :  { %v2547_v11 = vpop.f32.mrf.mxu0 }
 0x25b   :  { %v2548_v17 = vadd.f32 %v2547_v11, %v2184_v6 }
 0x2d4   :  { %v2584_v10 = vpop.f32.mrf.mxu1 }
 0x2d5   :  { %v2585_v22 = vadd.f32 %v2584_v10, %v2542_v15 }
 0x2d6   :  { %v2586_v12 = vpop.f32.mrf.mxu1 }
 0x2d7   :  { %v2587_v18 = vadd.f32 %v2586_v12, %v2544_v13  ;;  %v2593_v35 = vmax.f32 %v2585_v22, 0.0 }
 0x2d8   :  { %v2588_v16 = vpop.f32.mrf.mxu1 }
 0x2d9   :  { %v2589_v19 = vadd.f32 %v2588_v16, %v2546_v14  ;;  %v2594_v26 = vmax.f32 %v2587_v18, 0.0 }
 0x2da   :  { %v2590_v23 = vpop.f32.mrf.mxu1 }
 0x2db   :  { %v2591_v24 = vadd.f32 %v2590_v23, %v2548_v17  ;;  %v2595_v25 = vmax.f32 %v2589_v19, 0.0 }
 0x2dd   :  { %v2596_v27 = vmax.f32 %v2591_v24, 0.0  ;;  %v2597_v29 = vpack.c.bf16 %v2595_v25, %v2593_v35 }
 0x2df   :  { %v2598_v28 = vpack.c.bf16 %v2596_v27, %v2594_v26 }
 0x2e1   :  { %2766 = vmatprep.mubr.bf16.mxu0 %v2598_v28 }
 0x2e2   :  { %2767 = vmatmul.mubr.bf16.vlgmr.msra.gmra.mxu0 %v2597_v29 }
 0x3a2   :  { %v3188_v38 = vpop.f32.mrf.mxu0 }
 0x3a4   :  { %v3189_v31 = vpop.f32.mrf.mxu0 }
 0x3a5   :  { %v3190_v32 = vadd.f32 %v3189_v31, %v3188_v38 }
 0x3a6   :  { %v3191_v33 = vpop.f32.mrf.mxu0 }
 0x3a7   :  { %v2769_v34 = vadd.f32 %v3190_v32, %v3144_v30 }
 0x3a8   :  { %v3192_v36 = vpop.f32.mrf.mxu0 }
 0x3a9   :  { %v3161_v37 = vmul.f32 -1.442695, %v2769_v34  ;;  %v3193_v53 = vadd.f32 %v3192_v36, %v3191_v33 }
 0x3ab   :  { %3704 = vpow2.f32 %v3161_v37  ;;  %v2772_v20 = vadd.f32 %v3193_v53, %v3144_v30 }
 0x3ad   :  { %v3162_v21 = vmul.f32 -1.442695, %v2772_v20 }
 0x3af   :  { %3706 = vpow2.f32 %v3162_v21 }
 0x3b8   :  { %v3705_v9 = vpop.eup %3704 }
 0x3b9   :  { %v2781_v55 = vadd.f32 1.0, %v3705_v9 }
 0x3bb   :  { %3708 = vrcp.f32 %v2781_v55 }
 0x3bc   :  { %v3707_v39 = vpop.eup %3706 }
 0x3bd   :  { %v2782_v40 = vadd.f32 1.0, %v3707_v39 }
 0x3bf   :  { %3710 = vrcp.f32 %v2782_v40 }
 0x3c8   :  { %v3709_v42 = vpop.eup %3708 }
 0x3cc   :  { %v3711_v44 = vpop.eup %3710 }
 0x3cd   :  { %v3170_v41 = vpack.c.bf16 %v3711_v44, %v3709_v42 }
 0x3cf   :  { %3171 = vst [vmem:[#allocation12] sm:$0xff] %v3170_v41  }
 0x3d0   :  { %3823 = shalt.err (!%p3820_p1)
}
 0x3d1   :  { %2808 = dma.vmem_to_hbm [thread:$0]  %s2803_s10, 128, %s3999_s7, [#allocation5], %s3851_s0, %s3851_s0, %s3852_s28  }
 0x3d2   :  { %3838 = dma.done.wait [#allocation5], 128  }
 0x3d3   :  { %3839 = vsyncadd [#allocation5], 4294967168 }
 0x3d4   :  { %2812 = vsyncpa [#allocation4], 1 }
 0x3d5   :  { %2813 = vsyncpa [#allocation7], 1 }
 0x3d6   :  { %2814 = vsyncpa [#allocation10], 1 }
 0x3d7   :  { %2815 = vsyncpa [#allocation5], 1 }

</bundles_post_ra>
